<compile_context>
chip_gen: v7x
topology: tpu7x:2x2x1
jax: 0.10.0
libtpu: 0.0.40
codegen_flags: <defaults>
</compile_context>

<pallas_src>
import jax
import jax.numpy as jnp
from jax.experimental import pallas as pl
from jax.experimental.pallas import tpu as pltpu


def _round_up(n, m):
    return ((n + m - 1) // m) * m


def _make_kernel(num_layers, compute_dtype, approx_recip):
    def swish(z):
        # exp + reciprocal both run on the EUP slot (VPU slots stay free).
        # approx reciprocal only on the bf16 path; exact on the f32 path.
        return z * pl.reciprocal(1.0 + jnp.exp(-z), approx=approx_recip)

    def kernel(x_ref, w1_ref, b1_ref, w2_ref, b2_ref, o_ref):
        # x_ref : (tm, Hp)     row tile, streamed in the caller's dtype
        # w*_ref: (L, Hp, Hp)  pre-transposed weights, resident in VMEM
        # b*_ref: (L, 1, Hp)   biases (f32), resident in VMEM
        x_acc = x_ref[...].astype(jnp.float32)          # residual carried in f32

        def layer(l, x_acc):
            h = jnp.dot(x_acc.astype(compute_dtype), w1_ref[l],
                        preferred_element_type=jnp.float32) + b1_ref[l]
            h = swish(h)
            h = jnp.dot(h.astype(compute_dtype), w2_ref[l],
                        preferred_element_type=jnp.float32) + b2_ref[l]
            h = swish(h)
            return x_acc + h

        if num_layers <= 4:                 # typical DimeNet L<=3: unroll
            for l in range(num_layers):
                x_acc = layer(l, x_acc)
        else:                               # large L: bound live ranges
            x_acc = jax.lax.fori_loop(0, num_layers, layer, x_acc)

        o_ref[...] = x_acc.astype(o_ref.dtype)

    return kernel


def _vmem_cap_bytes():
    try:
        phys = int(getattr(pltpu.get_tpu_info(), "vmem_capacity_bytes"))
    except Exception:
        phys = 64 * 2 ** 20            # conservative (v7x-sized) default
    # ~25% headroom for compiler-managed temporaries / spill space:
    # v7x (64 MiB) -> ~48 MiB,  v5e/v6e (128 MiB) -> ~96 MiB.
    return max(32 * 2 ** 20, (phys * 3) // 4)


# Cache which resident-weight spec flavor compiles on this jax version.
_RESIDENT_MODE = {"mode": None}


def _weight_specs(Lc, Hp, mode):
    if mode == "vmem_whole":
        # whole-array, single-buffered VMEM residents (fetched once).
        r = pl.BlockSpec(memory_space=pltpu.MemorySpace.VMEM)
        return [r, r, r, r]
    # fallback: full-block with constant index_map (fetched once, but the
    # pipeline still allocates a double buffer).
    return [
        pl.BlockSpec((Lc, Hp, Hp), lambda i: (0, 0, 0)),
        pl.BlockSpec((Lc, 1, Hp), lambda i: (0, 0, 0)),
        pl.BlockSpec((Lc, Hp, Hp), lambda i: (0, 0, 0)),
        pl.BlockSpec((Lc, 1, Hp), lambda i: (0, 0, 0)),
    ]


def residual_layer_stack(x, w1s, b1s, w2s, b2s, *, tm=1024, use_bf16=True,
                         bf16_out=False):
    """Fused stack of L DimeNet ResidualLayers.

    x        : [N, H]
    w1s, w2s : [L, H, H]   (PyTorch Linear layout: out x in)
    b1s, b2s : [L, H]
    """
    x = jnp.asarray(x)
    w1s = jnp.asarray(w1s); b1s = jnp.asarray(b1s)
    w2s = jnp.asarray(w2s); b2s = jnp.asarray(b2s)

    N, H = x.shape
    L = w1s.shape[0]

    compute_dtype = jnp.bfloat16 if use_bf16 else jnp.float32
    out_dtype = jnp.bfloat16 if (use_bf16 and bf16_out) else x.dtype

    # Lane-dense padding of the hidden dim only when needed (zero padding is
    # exact: padded lanes see zero weights + zero bias -> swish(0)=0, residual 0).
    Hp = _round_up(H, 128)
    x_p = x if Hp == H else jnp.pad(x, ((0, 0), (0, Hp - H)))
    # Ragged N: cdiv grid + masked last block -> no row padding / x copy, and no
    # wrapper-side cast (the bf16 cast for the MXU happens per tile in-kernel).

    w1t = jnp.swapaxes(w1s, 1, 2)           # so the kernel computes x @ W^T
    w2t = jnp.swapaxes(w2s, 1, 2)
    if Hp != H:
        w1t = jnp.pad(w1t, ((0, 0), (0, Hp - H), (0, Hp - H)))
        w2t = jnp.pad(w2t, ((0, 0), (0, Hp - H), (0, Hp - H)))
        b1s = jnp.pad(b1s, ((0, 0), (0, Hp - H)))
        b2s = jnp.pad(b2s, ((0, 0), (0, Hp - H)))
    w1t = w1t.astype(compute_dtype)
    w2t = w2t.astype(compute_dtype)
    b1p = b1s.astype(jnp.float32).reshape(L, 1, Hp)
    b2p = b2s.astype(jnp.float32).reshape(L, 1, Hp)

    in_item = jnp.dtype(x.dtype).itemsize
    out_item = jnp.dtype(out_dtype).itemsize
    w_item = jnp.dtype(compute_dtype).itemsize

    cap = _vmem_cap_bytes()

    # Row tile: big (amortize per-step overhead), but (a) at least two grid
    # steps so both v7x TensorCores get work, and (b) tiles use at most half
    # the VMEM budget (rest goes to resident weights + compiler temporaries).
    tm_eff = max(8, _round_up(min(tm, _round_up(pl.cdiv(N, 2), 8)), 8))

    def tiles_bytes(t):
        # double-buffered in/out row tiles + f32 working set (x_acc, h, casts)
        return 2 * t * Hp * in_item + 2 * t * Hp * out_item + 6 * t * Hp * 4

    while tm_eff > 8 and tiles_bytes(tm_eff) > cap // 2:
        tm_eff = max(8, _round_up(tm_eff // 2, 8))

    # Resident-weight budget -> chunk the layer stack across calls if needed
    # (guards v7x's 64 MiB VMEM; conservative 2x covers the blocked fallback).
    per_layer_w = 2 * (2 * Hp * Hp * w_item + 2 * Hp * 4)
    w_budget = max(per_layer_w, cap - tiles_bytes(tm_eff) - (8 << 20))
    layers_per_call = max(1, min(L, w_budget // per_layer_w))
    # TODO(synk): if a *single* layer's weights ever exceed the VMEM budget,
    # add a K-tiled weight-streaming variant instead of this layer chunking.

    grid = (pl.cdiv(N, tm_eff),)

    def run_chunk(x_in, lo, hi, chunk_out_dtype):
        Lc = hi - lo
        w1c, w2c = w1t[lo:hi], w2t[lo:hi]
        b1c, b2c = b1p[lo:hi], b2p[lo:hi]

        chunk_w_bytes = Lc * per_layer_w
        vmem_limit = int(min(cap, max(32 * 2 ** 20,
                                      tiles_bytes(tm_eff) + chunk_w_bytes + (8 << 20))))

        cost = pl.CostEstimate(
            flops=4 * Lc * N * Hp * Hp,                 # two (N,Hp)x(Hp,Hp) matmuls/layer
            transcendentals=2 * Lc * N * Hp,            # exp per activation element
            bytes_accessed=N * Hp * (in_item + jnp.dtype(chunk_out_dtype).itemsize)
                           + chunk_w_bytes // 2,
        )

        kernel = _make_kernel(Lc, compute_dtype, approx_recip=use_bf16)

        modes = ([_RESIDENT_MODE["mode"]] if _RESIDENT_MODE["mode"]
                 else ["vmem_whole", "blocked"])
        last_err = None
        for mode in modes:
            try:
                out = pl.pallas_call(
                    kernel,
                    out_shape=jax.ShapeDtypeStruct((N, Hp), chunk_out_dtype),
                    grid_spec=pltpu.PrefetchScalarGridSpec(
                        num_scalar_prefetch=0,
                        grid=grid,
                        in_specs=[pl.BlockSpec((tm_eff, Hp), lambda i: (i, 0))]
                                 + _weight_specs(Lc, Hp, mode),
                        out_specs=pl.BlockSpec((tm_eff, Hp), lambda i: (i, 0)),
                    ),
                    compiler_params=pltpu.CompilerParams(
                        dimension_semantics=("parallel",),   # rows shard across TCs
                        vmem_limit_bytes=vmem_limit,
                    ),
                    cost_estimate=cost,
                )(x_in, w1c, b1c, w2c, b2c)
                out = jax.block_until_ready(out)
                _RESIDENT_MODE["mode"] = mode
                return out
            except Exception as e:           # fall back to known-good spec flavor
                last_err = e
        raise last_err

    cur = x_p
    lo = 0
    while lo < L:
        hi = min(L, lo + int(layers_per_call))
        # intermediates keep x's dtype so the residual stays full precision
        cur = run_chunk(cur, lo, hi, out_dtype if hi == L else x.dtype)
        lo = hi

    return cur if Hp == H else cur[:, :H]


def residual_layer(x, w1, b1, w2, b2, **kwargs):
    """Single DimeNet ResidualLayer: x + act(lin2(act(lin1(x))))."""
    return residual_layer_stack(x, w1[None], b1[None], w2[None], b2[None], **kwargs)


# ----------------------------- reference & init -----------------------------

def glorot_orthogonal_init(key, shape, scale=2.0, dtype=jnp.float32):
    """Deterministic approximation of glorot_orthogonal: orthogonal matrix
    rescaled so Var(W) = scale / (fan_in + fan_out), matching PyG."""
    fan_out, fan_in = shape
    a = jax.random.normal(key, (max(shape), max(shape)), dtype=jnp.float32)
    q, _ = jnp.linalg.qr(a)
    w = q[:fan_out, :fan_in]
    var = jnp.var(w)
    w = w * jnp.sqrt(scale / ((fan_in + fan_out) * jnp.maximum(var, 1e-12)))
    return w.astype(dtype)


def residual_stack_ref(x, w1s, b1s, w2s, b2s):
    def swish(z):
        return z * jax.nn.sigmoid(z)
    for l in range(w1s.shape[0]):
        h = swish(x @ w1s[l].T + b1s[l])
        h = swish(h @ w2s[l].T + b2s[l])
        x = x + h
    return x


if __name__ == "__main__":
    # Small DimeNet-like config; ragged N exercises the masked last-row-block
    # path, H=64 exercises the lane-padding path.
    N, H, L = 500, 64, 2

    keys = jax.random.split(jax.random.PRNGKey(0), 1 + 2 * L)
    x = jax.random.normal(keys[0], (N, H), dtype=jnp.float32)
    w1s = jnp.stack([glorot_orthogonal_init(keys[1 + 2 * l], (H, H), scale=2.0)
                     for l in range(L)])
    w2s = jnp.stack([glorot_orthogonal_init(keys[2 + 2 * l], (H, H), scale=2.0)
                     for l in range(L)])
    b1s = jnp.zeros((L, H), jnp.float32)   # bias filled with 0 per reset_parameters
    b2s = jnp.zeros((L, H), jnp.float32)

    ref = residual_stack_ref(x, w1s, b1s, w2s, b2s)

    # Default fast path: bf16 MXU operands, f32 accumulation/residual, f32 out.
    out = jax.block_until_ready(residual_layer_stack(x, w1s, b1s, w2s, b2s))
    assert out.shape == (N, H) and out.dtype == x.dtype
    assert jnp.allclose(out, ref, atol=0.1, rtol=0.1), "bf16 path mismatch"

    # Exact f32 path (no approx reciprocal) -> tight tolerance.
    out_f32 = jax.block_until_ready(
        residual_layer_stack(x, w1s, b1s, w2s, b2s, use_bf16=False))
    assert jnp.allclose(out_f32, ref, atol=2e-3, rtol=2e-3), "f32 path mismatch"

    # bf16 output streaming (halves writeback traffic) for tolerant consumers.
    out_bf16 = jax.block_until_ready(
        residual_layer_stack(x, w1s, b1s, w2s, b2s, bf16_out=True))
    assert out_bf16.dtype == jnp.bfloat16
    assert jnp.allclose(out_bf16.astype(jnp.float32), ref, atol=0.15, rtol=0.15), \
        "bf16-out mismatch"

    # H already a multiple of 128 -> no wrapper-side pad/copy of x at all.
    H2, N2, L2 = 128, 192, 3
    keys2 = jax.random.split(jax.random.PRNGKey(1), 1 + 2 * L2)
    x2 = jax.random.normal(keys2[0], (N2, H2), dtype=jnp.float32)
    w1s2 = jnp.stack([glorot_orthogonal_init(keys2[1 + 2 * l], (H2, H2), 2.0)
                      for l in range(L2)])
    w2s2 = jnp.stack([glorot_orthogonal_init(keys2[2 + 2 * l], (H2, H2), 2.0)
                      for l in range(L2)])
    b1s2 = jnp.zeros((L2, H2), jnp.float32)
    b2s2 = jnp.zeros((L2, H2), jnp.float32)
    ref2 = residual_stack_ref(x2, w1s2, b1s2, w2s2, b2s2)
    out2 = jax.block_until_ready(
        residual_layer_stack(x2, w1s2, b1s2, w2s2, b2s2, use_bf16=False))
    assert jnp.allclose(out2, ref2, atol=2e-3, rtol=2e-3), "H=128 path mismatch"

    # Single ResidualLayer (the original module's forward), semantics parity.
    out1 = jax.block_until_ready(
        residual_layer(x, w1s[0], b1s[0], w2s[0], b2s[0], use_bf16=False))
    ref1 = residual_stack_ref(x, w1s[:1], b1s[:1], w2s[:1], b2s[:1])
    assert jnp.allclose(out1, ref1, atol=2e-3, rtol=2e-3), "single-layer mismatch"

    print("KERNEL_OK")
</pallas_src>

<mosaic_0001>
module attributes {stable_mosaic.version = 11 : i64} {
  func.func @kernel(%arg0: i32, %arg1: memref<256x128xf32, #tpu.memory_space<vmem>>, %arg2: memref<2x128x128xbf16, #tpu.memory_space<vmem>>, %arg3: memref<2x1x128xf32, #tpu.memory_space<vmem>>, %arg4: memref<2x128x128xbf16, #tpu.memory_space<vmem>>, %arg5: memref<2x1x128xf32, #tpu.memory_space<vmem>>, %arg6: memref<256x128xf32, #tpu.memory_space<vmem>>) attributes {dimension_semantics = [#tpu.dimension_semantics<parallel>], iteration_bounds = array<i64: 2>, scalar_prefetch = 0 : i64, scratch_operands = 0 : i64, tpu.core_type = #tpu.core_type<tc>, window_params = [{transform_indices = @transform_0, window_bounds = array<i64: 256, 128>}, {pipeline_mode = #tpu.pipeline_mode<synchronous>, transform_indices = @transform_1, window_bounds = array<i64: 2, 128, 128>}, {pipeline_mode = #tpu.pipeline_mode<synchronous>, transform_indices = @transform_2, window_bounds = array<i64: 2, 1, 128>}, {pipeline_mode = #tpu.pipeline_mode<synchronous>, transform_indices = @transform_3, window_bounds = array<i64: 2, 128, 128>}, {pipeline_mode = #tpu.pipeline_mode<synchronous>, transform_indices = @transform_4, window_bounds = array<i64: 2, 1, 128>}, {transform_indices = @transform_5, window_bounds = array<i64: 256, 128>}]} {
    %c0 = arith.constant 0 : index
    %c0_0 = arith.constant 0 : index
    %0 = vector.load %arg1[%c0, %c0_0] : memref<256x128xf32, #tpu.memory_space<vmem>>, vector<256x128xf32>
    %1 = arith.truncf %0 : vector<256x128xf32> to vector<256x128xbf16>
    %c0_1 = arith.constant 0 : index
    %c0_2 = arith.constant 0 : index
    %c0_3 = arith.constant 0 : index
    %2 = vector.load %arg2[%c0_1, %c0_2, %c0_3] : memref<2x128x128xbf16, #tpu.memory_space<vmem>>, vector<1x128x128xbf16>
    %3 = vector.shape_cast %2 : vector<1x128x128xbf16> to vector<128x128xbf16>
    %cst = arith.constant dense<0.000000e+00> : vector<256x128xf32>
    %4 = tpu.matmul %1, %3, %cst {dimension_numbers = #tpu.dot_dimension_numbers<[1], [0], [0], [1], [0, 0, 1, 1], [], []>} : vector<256x128xbf16>, vector<128x128xbf16>, vector<256x128xf32> -> vector<256x128xf32>
    %c0_4 = arith.constant 0 : index
    %c0_5 = arith.constant 0 : index
    %c0_6 = arith.constant 0 : index
    %5 = vector.load %arg3[%c0_4, %c0_5, %c0_6] : memref<2x1x128xf32, #tpu.memory_space<vmem>>, vector<1x1x128xf32>
    %6 = vector.shape_cast %5 : vector<1x1x128xf32> to vector<1x128xf32>
    %7 = vector.broadcast %6 : vector<1x128xf32> to vector<256x128xf32>
    %8 = arith.addf %4, %7 : vector<256x128xf32>
    %cst_7 = arith.constant 0.000000e+00 : f32
    %9 = vector.broadcast %cst_7 : f32 to vector<256x128xf32>
    %10 = arith.subf %9, %8 : vector<256x128xf32>
    %11 = math.exp %10 : vector<256x128xf32>
    %cst_8 = arith.constant 1.000000e+00 : f32
    %12 = vector.broadcast %cst_8 : f32 to vector<256x128xf32>
    %13 = arith.addf %12, %11 : vector<256x128xf32>
    %14 = tpu.reciprocal %13 {approx = true} : vector<256x128xf32> -> vector<256x128xf32>
    %15 = arith.mulf %8, %14 : vector<256x128xf32>
    %16 = arith.truncf %15 : vector<256x128xf32> to vector<256x128xbf16>
    %c0_9 = arith.constant 0 : index
    %c0_10 = arith.constant 0 : index
    %c0_11 = arith.constant 0 : index
    %17 = vector.load %arg4[%c0_9, %c0_10, %c0_11] : memref<2x128x128xbf16, #tpu.memory_space<vmem>>, vector<1x128x128xbf16>
    %18 = vector.shape_cast %17 : vector<1x128x128xbf16> to vector<128x128xbf16>
    %cst_12 = arith.constant dense<0.000000e+00> : vector<256x128xf32>
    %19 = tpu.matmul %16, %18, %cst_12 {dimension_numbers = #tpu.dot_dimension_numbers<[1], [0], [0], [1], [0, 0, 1, 1], [], []>} : vector<256x128xbf16>, vector<128x128xbf16>, vector<256x128xf32> -> vector<256x128xf32>
    %c0_13 = arith.constant 0 : index
    %c0_14 = arith.constant 0 : index
    %c0_15 = arith.constant 0 : index
    %20 = vector.load %arg5[%c0_13, %c0_14, %c0_15] : memref<2x1x128xf32, #tpu.memory_space<vmem>>, vector<1x1x128xf32>
    %21 = vector.shape_cast %20 : vector<1x1x128xf32> to vector<1x128xf32>
    %22 = vector.broadcast %21 : vector<1x128xf32> to vector<256x128xf32>
    %23 = arith.addf %19, %22 : vector<256x128xf32>
    %cst_16 = arith.constant 0.000000e+00 : f32
    %24 = vector.broadcast %cst_16 : f32 to vector<256x128xf32>
    %25 = arith.subf %24, %23 : vector<256x128xf32>
    %26 = math.exp %25 : vector<256x128xf32>
    %cst_17 = arith.constant 1.000000e+00 : f32
    %27 = vector.broadcast %cst_17 : f32 to vector<256x128xf32>
    %28 = arith.addf %27, %26 : vector<256x128xf32>
    %29 = tpu.reciprocal %28 {approx = true} : vector<256x128xf32> -> vector<256x128xf32>
    %30 = arith.mulf %23, %29 : vector<256x128xf32>
    %31 = arith.addf %0, %30 : vector<256x128xf32>
    %32 = arith.truncf %31 : vector<256x128xf32> to vector<256x128xbf16>
    %c1 = arith.constant 1 : index
    %c0_18 = arith.constant 0 : index
    %c0_19 = arith.constant 0 : index
    %33 = vector.load %arg2[%c1, %c0_18, %c0_19] : memref<2x128x128xbf16, #tpu.memory_space<vmem>>, vector<1x128x128xbf16>
    %34 = vector.shape_cast %33 : vector<1x128x128xbf16> to vector<128x128xbf16>
    %cst_20 = arith.constant dense<0.000000e+00> : vector<256x128xf32>
    %35 = tpu.matmul %32, %34, %cst_20 {dimension_numbers = #tpu.dot_dimension_numbers<[1], [0], [0], [1], [0, 0, 1, 1], [], []>} : vector<256x128xbf16>, vector<128x128xbf16>, vector<256x128xf32> -> vector<256x128xf32>
    %c1_21 = arith.constant 1 : index
    %c0_22 = arith.constant 0 : index
    %c0_23 = arith.constant 0 : index
    %36 = vector.load %arg3[%c1_21, %c0_22, %c0_23] : memref<2x1x128xf32, #tpu.memory_space<vmem>>, vector<1x1x128xf32>
    %37 = vector.shape_cast %36 : vector<1x1x128xf32> to vector<1x128xf32>
    %38 = vector.broadcast %37 : vector<1x128xf32> to vector<256x128xf32>
    %39 = arith.addf %35, %38 : vector<256x128xf32>
    %cst_24 = arith.constant 0.000000e+00 : f32
    %40 = vector.broadcast %cst_24 : f32 to vector<256x128xf32>
    %41 = arith.subf %40, %39 : vector<256x128xf32>
    %42 = math.exp %41 : vector<256x128xf32>
    %cst_25 = arith.constant 1.000000e+00 : f32
    %43 = vector.broadcast %cst_25 : f32 to vector<256x128xf32>
    %44 = arith.addf %43, %42 : vector<256x128xf32>
    %45 = tpu.reciprocal %44 {approx = true} : vector<256x128xf32> -> vector<256x128xf32>
    %46 = arith.mulf %39, %45 : vector<256x128xf32>
    %47 = arith.truncf %46 : vector<256x128xf32> to vector<256x128xbf16>
    %c1_26 = arith.constant 1 : index
    %c0_27 = arith.constant 0 : index
    %c0_28 = arith.constant 0 : index
    %48 = vector.load %arg4[%c1_26, %c0_27, %c0_28] : memref<2x128x128xbf16, #tpu.memory_space<vmem>>, vector<1x128x128xbf16>
    %49 = vector.shape_cast %48 : vector<1x128x128xbf16> to vector<128x128xbf16>
    %cst_29 = arith.constant dense<0.000000e+00> : vector<256x128xf32>
    %50 = tpu.matmul %47, %49, %cst_29 {dimension_numbers = #tpu.dot_dimension_numbers<[1], [0], [0], [1], [0, 0, 1, 1], [], []>} : vector<256x128xbf16>, vector<128x128xbf16>, vector<256x128xf32> -> vector<256x128xf32>
    %c1_30 = arith.constant 1 : index
    %c0_31 = arith.constant 0 : index
    %c0_32 = arith.constant 0 : index
    %51 = vector.load %arg5[%c1_30, %c0_31, %c0_32] : memref<2x1x128xf32, #tpu.memory_space<vmem>>, vector<1x1x128xf32>
    %52 = vector.shape_cast %51 : vector<1x1x128xf32> to vector<1x128xf32>
    %53 = vector.broadcast %52 : vector<1x128xf32> to vector<256x128xf32>
    %54 = arith.addf %50, %53 : vector<256x128xf32>
    %cst_33 = arith.constant 0.000000e+00 : f32
    %55 = vector.broadcast %cst_33 : f32 to vector<256x128xf32>
    %56 = arith.subf %55, %54 : vector<256x128xf32>
    %57 = math.exp %56 : vector<256x128xf32>
    %cst_34 = arith.constant 1.000000e+00 : f32
    %58 = vector.broadcast %cst_34 : f32 to vector<256x128xf32>
    %59 = arith.addf %58, %57 : vector<256x128xf32>
    %60 = tpu.reciprocal %59 {approx = true} : vector<256x128xf32> -> vector<256x128xf32>
    %61 = arith.mulf %54, %60 : vector<256x128xf32>
    %62 = arith.addf %31, %61 : vector<256x128xf32>
    %c0_35 = arith.constant 0 : index
    %c0_36 = arith.constant 0 : index
    %63 = vector.load %arg6[%c0_35, %c0_36] : memref<256x128xf32, #tpu.memory_space<vmem>>, vector<256x128xf32>
    tpu.vector_store %arg6[%c0_35, %c0_36], %62 {strides = array<i32>} : memref<256x128xf32, #tpu.memory_space<vmem>>, vector<256x128xf32>,
    return
  }
  func.func @transform_0(%arg0: i32) -> (i32, i32) {
    %c0_i32 = arith.constant 0 : i32
    %c0_i32_0 = arith.constant 0 : i32
    return %arg0, %c0_i32 : i32, i32
  }
  func.func @transform_1(%arg0: i32) -> (i32, i32, i32) {
    %c0_i32 = arith.constant 0 : i32
    %c0_i32_0 = arith.constant 0 : i32
    %c0_i32_1 = arith.constant 0 : i32
    %c0_i32_2 = arith.constant 0 : i32
    return %c0_i32, %c0_i32_0, %c0_i32_1 : i32, i32, i32
  }
  func.func @transform_2(%arg0: i32) -> (i32, i32, i32) {
    %c0_i32 = arith.constant 0 : i32
    %c0_i32_0 = arith.constant 0 : i32
    %c0_i32_1 = arith.constant 0 : i32
    %c0_i32_2 = arith.constant 0 : i32
    return %c0_i32, %c0_i32_0, %c0_i32_1 : i32, i32, i32
  }
  func.func @transform_3(%arg0: i32) -> (i32, i32, i32) {
    %c0_i32 = arith.constant 0 : i32
    %c0_i32_0 = arith.constant 0 : i32
    %c0_i32_1 = arith.constant 0 : i32
    %c0_i32_2 = arith.constant 0 : i32
    return %c0_i32, %c0_i32_0, %c0_i32_1 : i32, i32, i32
  }
  func.func @transform_4(%arg0: i32) -> (i32, i32, i32) {
    %c0_i32 = arith.constant 0 : i32
    %c0_i32_0 = arith.constant 0 : i32
    %c0_i32_1 = arith.constant 0 : i32
    %c0_i32_2 = arith.constant 0 : i32
    return %c0_i32, %c0_i32_0, %c0_i32_1 : i32, i32, i32
  }
  func.func @transform_5(%arg0: i32) -> (i32, i32) {
    %c0_i32 = arith.constant 0 : i32
    %c0_i32_0 = arith.constant 0 : i32
    return %arg0, %c0_i32 : i32, i32
  }
}

module attributes {stable_mosaic.version = 11 : i64} {
  func.func @kernel(%arg0: i32, %arg1: memref<256x128xf32, #tpu.memory_space<vmem>>, %arg2: memref<2x128x128xbf16, #tpu.memory_space<vmem>>, %arg3: memref<2x1x128xf32, #tpu.memory_space<vmem>>, %arg4: memref<2x128x128xbf16, #tpu.memory_space<vmem>>, %arg5: memref<2x1x128xf32, #tpu.memory_space<vmem>>, %arg6: memref<256x128xf32, #tpu.memory_space<vmem>>) attributes {dimension_semantics = [#tpu.dimension_semantics<parallel>], iteration_bounds = array<i64: 2>, scalar_prefetch = 0 : i64, scratch_operands = 0 : i64, tpu.core_type = #tpu.core_type<tc>, window_params = [{transform_indices = @transform_0, window_bounds = array<i64: 256, 128>}, {pipeline_mode = #tpu.pipeline_mode<synchronous>, transform_indices = @transform_1, window_bounds = array<i64: 2, 128, 128>}, {pipeline_mode = #tpu.pipeline_mode<synchronous>, transform_indices = @transform_2, window_bounds = array<i64: 2, 1, 128>}, {pipeline_mode = #tpu.pipeline_mode<synchronous>, transform_indices = @transform_3, window_bounds = array<i64: 2, 128, 128>}, {pipeline_mode = #tpu.pipeline_mode<synchronous>, transform_indices = @transform_4, window_bounds = array<i64: 2, 1, 128>}, {transform_indices = @transform_5, window_bounds = array<i64: 256, 128>}]} {
    %c0 = arith.constant 0 : index
    %c0_0 = arith.constant 0 : index
    %0 = vector.load %arg1[%c0, %c0_0] : memref<256x128xf32, #tpu.memory_space<vmem>>, vector<256x128xf32>
    %1 = arith.truncf %0 : vector<256x128xf32> to vector<256x128xbf16>
    %c0_1 = arith.constant 0 : index
    %c0_2 = arith.constant 0 : index
    %c0_3 = arith.constant 0 : index
    %2 = vector.load %arg2[%c0_1, %c0_2, %c0_3] : memref<2x128x128xbf16, #tpu.memory_space<vmem>>, vector<1x128x128xbf16>
    %3 = vector.shape_cast %2 : vector<1x128x128xbf16> to vector<128x128xbf16>
    %cst = arith.constant dense<0.000000e+00> : vector<256x128xf32>
    %4 = tpu.matmul %1, %3, %cst {dimension_numbers = #tpu.dot_dimension_numbers<[1], [0], [0], [1], [0, 0, 1, 1], [], []>} : vector<256x128xbf16>, vector<128x128xbf16>, vector<256x128xf32> -> vector<256x128xf32>
    %c0_4 = arith.constant 0 : index
    %c0_5 = arith.constant 0 : index
    %c0_6 = arith.constant 0 : index
    %5 = vector.load %arg3[%c0_4, %c0_5, %c0_6] : memref<2x1x128xf32, #tpu.memory_space<vmem>>, vector<1x1x128xf32>
    %6 = vector.shape_cast %5 : vector<1x1x128xf32> to vector<1x128xf32>
    %7 = vector.broadcast %6 : vector<1x128xf32> to vector<256x128xf32>
    %8 = arith.addf %4, %7 : vector<256x128xf32>
    %cst_7 = arith.constant 0.000000e+00 : f32
    %9 = vector.broadcast %cst_7 : f32 to vector<256x128xf32>
    %10 = arith.subf %9, %8 : vector<256x128xf32>
    %11 = math.exp %10 : vector<256x128xf32>
    %cst_8 = arith.constant 1.000000e+00 : f32
    %12 = vector.broadcast %cst_8 : f32 to vector<256x128xf32>
    %13 = arith.addf %12, %11 : vector<256x128xf32>
    %14 = tpu.reciprocal %13 {approx = true} : vector<256x128xf32> -> vector<256x128xf32>
    %15 = arith.mulf %8, %14 : vector<256x128xf32>
    %16 = arith.truncf %15 : vector<256x128xf32> to vector<256x128xbf16>
    %c0_9 = arith.constant 0 : index
    %c0_10 = arith.constant 0 : index
    %c0_11 = arith.constant 0 : index
    %17 = vector.load %arg4[%c0_9, %c0_10, %c0_11] : memref<2x128x128xbf16, #tpu.memory_space<vmem>>, vector<1x128x128xbf16>
    %18 = vector.shape_cast %17 : vector<1x128x128xbf16> to vector<128x128xbf16>
    %cst_12 = arith.constant dense<0.000000e+00> : vector<256x128xf32>
    %19 = tpu.matmul %16, %18, %cst_12 {dimension_numbers = #tpu.dot_dimension_numbers<[1], [0], [0], [1], [0, 0, 1, 1], [], []>} : vector<256x128xbf16>, vector<128x128xbf16>, vector<256x128xf32> -> vector<256x128xf32>
    %c0_13 = arith.constant 0 : index
    %c0_14 = arith.constant 0 : index
    %c0_15 = arith.constant 0 : index
    %20 = vector.load %arg5[%c0_13, %c0_14, %c0_15] : memref<2x1x128xf32, #tpu.memory_space<vmem>>, vector<1x1x128xf32>
    %21 = vector.shape_cast %20 : vector<1x1x128xf32> to vector<1x128xf32>
    %22 = vector.broadcast %21 : vector<1x128xf32> to vector<256x128xf32>
    %23 = arith.addf %19, %22 : vector<256x128xf32>
    %cst_16 = arith.constant 0.000000e+00 : f32
    %24 = vector.broadcast %cst_16 : f32 to vector<256x128xf32>
    %25 = arith.subf %24, %23 : vector<256x128xf32>
    %26 = math.exp %25 : vector<256x128xf32>
    %cst_17 = arith.constant 1.000000e+00 : f32
    %27 = vector.broadcast %cst_17 : f32 to vector<256x128xf32>
    %28 = arith.addf %27, %26 : vector<256x128xf32>
    %29 = tpu.reciprocal %28 {approx = true} : vector<256x128xf32> -> vector<256x128xf32>
    %30 = arith.mulf %23, %29 : vector<256x128xf32>
    %31 = arith.addf %0, %30 : vector<256x128xf32>
    %32 = arith.truncf %31 : vector<256x128xf32> to vector<256x128xbf16>
    %c1 = arith.constant 1 : index
    %c0_18 = arith.constant 0 : index
    %c0_19 = arith.constant 0 : index
    %33 = vector.load %arg2[%c1, %c0_18, %c0_19] : memref<2x128x128xbf16, #tpu.memory_space<vmem>>, vector<1x128x128xbf16>
    %34 = vector.shape_cast %33 : vector<1x128x128xbf16> to vector<128x128xbf16>
    %cst_20 = arith.constant dense<0.000000e+00> : vector<256x128xf32>
    %35 = tpu.matmul %32, %34, %cst_20 {dimension_numbers = #tpu.dot_dimension_numbers<[1], [0], [0], [1], [0, 0, 1, 1], [], []>} : vector<256x128xbf16>, vector<128x128xbf16>, vector<256x128xf32> -> vector<256x128xf32>
    %c1_21 = arith.constant 1 : index
    %c0_22 = arith.constant 0 : index
    %c0_23 = arith.constant 0 : index
    %36 = vector.load %arg3[%c1_21, %c0_22, %c0_23] : memref<2x1x128xf32, #tpu.memory_space<vmem>>, vector<1x1x128xf32>
    %37 = vector.shape_cast %36 : vector<1x1x128xf32> to vector<1x128xf32>
    %38 = vector.broadcast %37 : vector<1x128xf32> to vector<256x128xf32>
    %39 = arith.addf %35, %38 : vector<256x128xf32>
    %cst_24 = arith.constant 0.000000e+00 : f32
    %40 = vector.broadcast %cst_24 : f32 to vector<256x128xf32>
    %41 = arith.subf %40, %39 : vector<256x128xf32>
    %42 = math.exp %41 : vector<256x128xf32>
    %cst_25 = arith.constant 1.000000e+00 : f32
    %43 = vector.broadcast %cst_25 : f32 to vector<256x128xf32>
    %44 = arith.addf %43, %42 : vector<256x128xf32>
    %45 = tpu.reciprocal %44 {approx = true} : vector<256x128xf32> -> vector<256x128xf32>
    %46 = arith.mulf %39, %45 : vector<256x128xf32>
    %47 = arith.truncf %46 : vector<256x128xf32> to vector<256x128xbf16>
    %c1_26 = arith.constant 1 : index
    %c0_27 = arith.constant 0 : index
    %c0_28 = arith.constant 0 : index
    %48 = vector.load %arg4[%c1_26, %c0_27, %c0_28] : memref<2x128x128xbf16, #tpu.memory_space<vmem>>, vector<1x128x128xbf16>
    %49 = vector.shape_cast %48 : vector<1x128x128xbf16> to vector<128x128xbf16>
    %cst_29 = arith.constant dense<0.000000e+00> : vector<256x128xf32>
    %50 = tpu.matmul %47, %49, %cst_29 {dimension_numbers = #tpu.dot_dimension_numbers<[1], [0], [0], [1], [0, 0, 1, 1], [], []>} : vector<256x128xbf16>, vector<128x128xbf16>, vector<256x128xf32> -> vector<256x128xf32>
    %c1_30 = arith.constant 1 : index
    %c0_31 = arith.constant 0 : index
    %c0_32 = arith.constant 0 : index
    %51 = vector.load %arg5[%c1_30, %c0_31, %c0_32] : memref<2x1x128xf32, #tpu.memory_space<vmem>>, vector<1x1x128xf32>
    %52 = vector.shape_cast %51 : vector<1x1x128xf32> to vector<1x128xf32>
    %53 = vector.broadcast %52 : vector<1x128xf32> to vector<256x128xf32>
    %54 = arith.addf %50, %53 : vector<256x128xf32>
    %cst_33 = arith.constant 0.000000e+00 : f32
    %55 = vector.broadcast %cst_33 : f32 to vector<256x128xf32>
    %56 = arith.subf %55, %54 : vector<256x128xf32>
    %57 = math.exp %56 : vector<256x128xf32>
    %cst_34 = arith.constant 1.000000e+00 : f32
    %58 = vector.broadcast %cst_34 : f32 to vector<256x128xf32>
    %59 = arith.addf %58, %57 : vector<256x128xf32>
    %60 = tpu.reciprocal %59 {approx = true} : vector<256x128xf32> -> vector<256x128xf32>
    %61 = arith.mulf %54, %60 : vector<256x128xf32>
    %62 = arith.addf %31, %61 : vector<256x128xf32>
    %c0_35 = arith.constant 0 : index
    %c0_36 = arith.constant 0 : index
    %63 = vector.load %arg6[%c0_35, %c0_36] : memref<256x128xf32, #tpu.memory_space<vmem>>, vector<256x128xf32>
    tpu.vector_store %arg6[%c0_35, %c0_36], %62 {strides = array<i32>} : memref<256x128xf32, #tpu.memory_space<vmem>>, vector<256x128xf32>,
    return
  }
  func.func @transform_0(%arg0: i32) -> (i32, i32) {
    %c0_i32 = arith.constant 0 : i32
    %c0_i32_0 = arith.constant 0 : i32
    return %arg0, %c0_i32 : i32, i32
  }
  func.func @transform_1(%arg0: i32) -> (i32, i32, i32) {
    %c0_i32 = arith.constant 0 : i32
    %c0_i32_0 = arith.constant 0 : i32
    %c0_i32_1 = arith.constant 0 : i32
    %c0_i32_2 = arith.constant 0 : i32
    return %c0_i32, %c0_i32_0, %c0_i32_1 : i32, i32, i32
  }
  func.func @transform_2(%arg0: i32) -> (i32, i32, i32) {
    %c0_i32 = arith.constant 0 : i32
    %c0_i32_0 = arith.constant 0 : i32
    %c0_i32_1 = arith.constant 0 : i32
    %c0_i32_2 = arith.constant 0 : i32
    return %c0_i32, %c0_i32_0, %c0_i32_1 : i32, i32, i32
  }
  func.func @transform_3(%arg0: i32) -> (i32, i32, i32) {
    %c0_i32 = arith.constant 0 : i32
    %c0_i32_0 = arith.constant 0 : i32
    %c0_i32_1 = arith.constant 0 : i32
    %c0_i32_2 = arith.constant 0 : i32
    return %c0_i32, %c0_i32_0, %c0_i32_1 : i32, i32, i32
  }
  func.func @transform_4(%arg0: i32) -> (i32, i32, i32) {
    %c0_i32 = arith.constant 0 : i32
    %c0_i32_0 = arith.constant 0 : i32
    %c0_i32_1 = arith.constant 0 : i32
    %c0_i32_2 = arith.constant 0 : i32
    return %c0_i32, %c0_i32_0, %c0_i32_1 : i32, i32, i32
  }
  func.func @transform_5(%arg0: i32) -> (i32, i32) {
    %c0_i32 = arith.constant 0 : i32
    %c0_i32_0 = arith.constant 0 : i32
    return %arg0, %c0_i32 : i32, i32
  }
}

</mosaic_0001>

<bundles_post_ra>
// kernel: tpu_custom_call.1
= control target key start
LH: loop header
LB: loop body
LE: loop exit
PB: predicated region body
PF: predicated region fallthrough
CT: control target
= control target key end

     0   :  { %10 = vsyncpa [#allocation3], 0  ;;  %s4623_s0 = inlined_call_operand.hbm [shape: f32[500,128], index: 0, kind: input, shape index: {}]   ;;  %s4624_s1 = inlined_call_operand.hbm [shape: bf16[2,128,128], index: 1, kind: input, shape index: {}]   ;;  %s4625_s2 = inlined_call_operand.vmem [shape: f32[2,1,128], index: 2, kind: input, shape index: {}]   ;;  %s4626_s3 = inlined_call_operand.hbm [shape: bf16[2,128,128], index: 3, kind: input, shape index: {}]   ;;  %s4627_s4 = inlined_call_operand.vmem [shape: f32[2,1,128], index: 4, kind: input, shape index: {}]   ;;  %s4628_s5 = inlined_call_operand.hbm [shape: f32[500,128], index: 5, kind: output, shape index: {}]  }
   0x1   :  { %12 = vsyncpa [#allocation3 + $0x1], 0 }
   0x2   :  { %13 = vsyncpa [#allocation6], 0 }
   0x3   :  { %14 = vsyncpa [#allocation4], 0 }
   0x4   :  { %16 = vsyncpa [#allocation4 + $0x1], 0  ;;  %s3485_s18 = smov 0   ;;  %s3487_s19 = smov 0  }
   0x5   :  { %s3489_s20 = smov 0   ;;  %s3491_s21 = smov 0  }
   0x6 LB: > { %s3506_s22 = sadd.s32 4294967295, %s3443_s21   ;;  %s2293_s23 = sadd.s32 4294967294, %s3443_s21   ;;  %s3443_s21 = sphi %s3491_s21, %s4686_s21   ;;  %s3439_s20 = sphi %s3489_s20, %s4685_s20   ;;  %s3435_s19 = sphi %s3487_s19, %s4684_s19   ;;  %s3431_s18 = sphi %s3485_s18, %s4683_s18  }
   0x7   : > { %s3510_s24 = sadd.s32 1, %s3443_s21   ;;  %s29_s25 = sadd.s32 1, %s3439_s20 }
   0x8   : > { %s26_s26 = ssub.s32 %s3443_s21, %s3510_s24  ;;  %p36_p0 = scmp.ne.s32.totalorder %s3439_s20, %s3435_s19 }
   0x9   : > { %p27_p1 = scmp.eq.s32.totalorder %s26_s26, 0  ;;  %p37_p2 = scmp.eq.s32.totalorder %s3443_s21, 0 }
   0xa   : > { %p42_p3 = scmp.ne.s32.totalorder %s3435_s19, %s3431_s18  ;;  %p4629_p4 = scmp.eq.s32.totalorder %s3506_s22, 0 }
   0xb   : > { %s3522_s27 = scalar_select %p27_p1, %s3439_s20, %s29_s25  }
   0xc   : > { %p3524_p5 = por %p37_p2, %p36_p0  ;;  %p3530_p6 = por %p4629_p4, %p42_p3 }
   0xd   : > { %4644 = sst [smem:[#allocation12_spill]] %s3522_s27  ;;  %p150_p7 = scmp.eq.s32.totalorder %s3506_s22, 1 }
   0xe   : > { %s4645_s28 = scalar_select %p3524_p5, 1, 0 }
   0xf   : > { %s4646_s29 = scalar_select %p3530_p6, 1, 0 }
  0x10   : > { %p156_p8 = scmp.eq.s32.totalorder %s2293_s23, 1  ;;  %p2294_p9 = scmp.ge.s32.totalorder %s3443_s21, 1 }
  0x11   : > { %p163_p10 = scmp.lt.s32.totalorder %s3443_s21, 3  ;;  %p3537_p11 = por %p150_p7, %p36_p0 }
  0x12   : > { %p3541_p12 = por %p156_p8, %p42_p3  ;;  %s3445_s8 = smov [#allocation5]  }
  0x13   : > { %s4647_s30 = scalar_select %p3537_p11, 1, 0 }
  0x14   : > { %s4648_s6 = scalar_select %p3541_p12, 1, 0 }
  0x15   : > { %p3545_p13 = pnand %p2294_p9, %p163_p10  ;;  %s175_s9 = sshll.u32 %s3445_s8, 4  ;;  %s176_s9 = int_to_ptr.vmem [resolvable:$true] %s175_s9 }
  0x16   : > { %s3446_s11 = smov [#allocation7]   ;;  %s3289_s15 = scalar_lea.hbm %s4624_s1, 2048 }
  0x17   : > { %s4649_s7 = scalar_select %p3545_p13, 1, 0 }
  0x18   : > { %p2657_p1 = pneg %p3545_p13  ;;  %s191_s12 = sshll.u32 %s3446_s11, 4  ;;  %s3557_s12 = int_to_ptr.vmem [resolvable:$true] %s191_s12 }
  0x19   : > { %p3290_p0 = scmp.ne.s32.totalorder %s4624_s1, %s3289_s15  ;;  %p3296_p9 = scmp.lt.u32.totalorder %s3289_s15, %s4624_s1 }
  0x1a   : > { %p3553_p2 = pnand %p2657_p1, %p4629_p4 }
  0x1c   : > { %p3291_p3 = pneg %p3553_p2 }
  0x1e   : > { %p3292_p7 = pnand %p3291_p3, %p3290_p0 }
  0x20   : > { %p3293_p8 = pneg %p3292_p7 }
  0x22   : > { %p3298_p10 = pnand %p3296_p9, %p3293_p8 }
  0x24   : > { %3301 = shalt.err (!%p3298_p10)
}
  0x25   : > { %s3302_s26 = scalar_lea.vmem %s176_s9, 2048  ;;  %p3310_p11 = scmp.lt.s32.totalorder %s176_s9, %s176_s9 }
  0x26   : > { %p3303_p1 = scmp.ne.s32.totalorder %s176_s9, %s3302_s26  ;;  %p3311_p6 = scmp.lt.s32.totalorder %s3302_s26, %s3302_s26 }
  0x28   : > { %p3305_p4 = pnand %p3303_p1, %p3291_p3  ;;  %p3312_p13 = por %p3311_p6, %p3310_p11 }
  0x2a   : > { %p3306_p12 = pneg %p3305_p4 }
  0x2c   : > { %p3313_p5 = pnand %p3312_p13, %p3306_p12 }
  0x2e   : > { %3316 = shalt.err (!%p3313_p5)
}
  0x2f   : > { %s3447_s8 = smov 64   ;;  %s3448_s11 = smov 4  }
  0x30   : > { %2660 = dma.hbm_to_vmem [thread:$0]  (!%p3553_p2), %s4624_s1, 2048, %s176_s9, [#allocation6], %s3447_s8, %s3447_s8, %s3448_s11  }
  0x31   : > { %s3317_s17 = scalar_lea.hbm %s4626_s3, 2048 }
  0x32   : > { %p3318_p4 = scmp.ne.s32.totalorder %s4626_s3, %s3317_s17  ;;  %p3324_p11 = scmp.lt.u32.totalorder %s3317_s17, %s4626_s3 }
  0x34   : > { %p3320_p5 = pnand %p3318_p4, %p3291_p3 }
  0x36   : > { %p3321_p6 = pneg %p3320_p5 }
  0x38   : > { %p3326_p12 = pnand %p3324_p11, %p3321_p6 }
  0x3a   : > { %3329 = shalt.err (!%p3326_p12)
}
  0x3b   : > { %s3330_s9 = scalar_lea.vmem %s3557_s12, 2048  ;;  %p3338_p8 = scmp.lt.s32.totalorder %s3557_s12, %s3557_s12 }
  0x3c   : > { %p3331_p13 = scmp.ne.s32.totalorder %s3557_s12, %s3330_s9  ;;  %p3339_p9 = scmp.lt.s32.totalorder %s3330_s9, %s3330_s9 }
  0x3e   : > { %p3333_p0 = pnand %p3331_p13, %p3291_p3  ;;  %p3340_p10 = por %p3339_p9, %p3338_p8 }
  0x40   : > { %p3334_p7 = pneg %p3333_p0 }
  0x42   : > { %p3341_p1 = pnand %p3340_p10, %p3334_p7 }
  0x44   : > { %3344 = shalt.err (!%p3341_p1)
}
  0x45   : > { %2663 = dma.hbm_to_vmem [thread:$0]  (!%p3553_p2), %s4626_s3, 2048, %s3557_s12, [#allocation6], %s3447_s8, %s3447_s8, %s3448_s11  }
  0x46   : > { %p2297_p4 = scmp.ge.s32.totalorder %s3443_s21, 2 }
  0x47   : > { %p4651_p3 = scmp.ne.s32.totalorder (!%p2297_p4), %s4645_s28, 0 }
  0x48   : > { %204 = sbr.rel (%p2297_p4) target bundleno = 114 (0x72), region = 32 }
  0x4f   : > { %207 = sbr.rel (!%p4651_p3) target bundleno = 114 (0x72), region = 36  ;;  %s208_s14 = sand.u32 (%p4651_p3), 1, %s3439_s20  }
  0x50   : > { %s2299_s15 = sshll.u32 (%p4651_p3), %s3443_s21, 5  ;;  %s2298_s16 = sshll.u32 (%p4651_p3), %s208_s14, 8 }
  0x51   : > { %s214_s17 = ssub.s32 (%p4651_p3), 63, %s2299_s15  ;;  %s3616_s8 = scalar_lea.sflag (%p4651_p3), [#allocation3], %s208_s14 }
  0x52   : > { %p215_p5 = scmp.lt.s32.totalorder (%p4651_p3), %s214_s17, 32  ;;  %s212_s11 = scalar_lea.vmem (%p4651_p3), [#allocation2], %s2298_s16 }
  0x56   : > { %s4688_s17 = smov (!%p215_p5, %s214_s17), 32 }
  0x57   : > { %s3613_s10 = sshll.u32 %s4688_s17, 7 }
  0x58   : > { %s219_s12 = ssub.s32 4096, %s3613_s10 }
  0x59   : > { %220 = vsyncadd %s3616_s8, %s219_s12  ;;  %p2301_p2 = scmp.ne.s32.totalorder %s3613_s10, 0  ;;  %s2357_s28 = sshll.u32 %s3443_s21, 12 }
  0x5a   : > { %s3624_s26 = scalar_lea.hbm %s4623_s0, %s2357_s28  ;;  %s225_s9 = sshll.u32 %s212_s11, 4  ;;  %s3626_s9 = int_to_ptr.vmem [resolvable:$true] %s225_s9 }
  0x5b   : > { %s3345_s27 = scalar_lea.hbm %s3624_s26, %s3613_s10  ;;  %s3349_s15 = scalar_lea.hbm %s4623_s0, 8064 }
  0x5c   : > { %p3346_p6 = scmp.ne.s32.totalorder %s3624_s26, %s3345_s27  ;;  %p3350_p13 = scmp.lt.u32.totalorder %s3624_s26, %s4623_s0 }
  0x5d   : > { %p3351_p0 = scmp.lt.u32.totalorder %s3349_s15, %s3345_s27  ;;  %p3353_p8 = scmp.lt.u32.totalorder %s3345_s27, %s3624_s26 }
  0x5e   : > { %p3347_p11 = pnand %p3346_p6, %p2301_p2 }
  0x5f   : > { %p3352_p7 = por %p3351_p0, %p3350_p13 }
  0x60   : > { %p3348_p12 = pneg %p3347_p11 }
  0x61   : > { %p3354_p9 = por %p3353_p8, %p3352_p7 }
  0x63   : > { %p3355_p10 = pnand %p3354_p9, %p3348_p12 }
  0x65   : > { %3358 = shalt.err (!%p3355_p10)
}
  0x66   : > { %s3359_s12 = scalar_lea.vmem %s3626_s9, %s3613_s10  ;;  %s3449_s11 = smov [#allocation2]  }
  0x67   : > { %p3360_p1 = scmp.ne.s32.totalorder %s3626_s9, %s3359_s12  ;;  %s3363_s28 = sshll.u32 %s3449_s11, 4  ;;  %s3364_s28 = int_to_ptr.vmem [resolvable:$false] %s3363_s28 }
  0x68   : > { %s3365_s23 = scalar_lea.vmem %s3364_s28, 8192  ;;  %p3366_p6 = scmp.lt.s32.totalorder %s3626_s9, %s3364_s28 }
  0x69   : > { %p3361_p3 = pnand %p3360_p1, %p2301_p2  ;;  %p3367_p11 = scmp.lt.s32.totalorder %s3365_s23, %s3359_s12 }
  0x6b   : > { %p3362_p5 = pneg %p3361_p3  ;;  %p3368_p13 = por %p3367_p11, %p3366_p6 }
  0x6d   : > { %p3369_p0 = pnand %p3368_p13, %p3362_p5 }
  0x6f   : > { %3372 = shalt.err (!%p3369_p0)
}
  0x70   : > { %s3450_s25 = smov 128   ;;  %s3451_s27 = smov 8  }
  0x71   : > { %231 = dma.hbm_to_vmem [thread:$0]  (%p2301_p2), %s3624_s26, %s3613_s10, %s3626_s9, %s3616_s8, %s3450_s25, %s3450_s25, %s3451_s27  }
  0x72 PF: > { %p4652_p12 = scmp.ne.s32.totalorder %s4649_s7, 0 }
  0x74   : > { %237 = sbr.rel (%p4652_p12) target bundleno = 1271 (0x4f7), region = 40 }
  0x7b   : > { %s3656_s13 = sand.u32 1, %s3435_s19   ;;  %p4653_p7 = scmp.ne.s32.totalorder %s4646_s29, 0 }
  0x7c   : > { %s2306_s14 = sshll.u32 %s3656_s13, 8  ;;  %s240_s15 = scalar_lea.sflag [#allocation3], %s3656_s13 }
  0x7d   : > { %s3662_s16 = scalar_lea.vmem [#allocation2], %s2306_s14 }
  0x7e   : > { %3418 = dma.done.wait (%p4653_p7), %s240_s15, 4096  }
  0x7f   : > { %3420 = vsyncadd (%p4653_p7), %s240_s15, 4294963200  ;;  %p4654_p2 = scmp.eq.s32.totalorder %s3506_s22, 0 }
  0x81   : > { %3422 = dma.done.wait (%p4654_p2), [#allocation6], 4096   ;;  %p4655_p8 = pmov %p4654_p2 }
  0x82   : > { %v2713_v0 = vld [vmem:[#allocation5] sm:$0xff]   ;;  %v2714_v1 = vld [vmem:[#allocation5 + $0x8] sm:$0xff]   ;;  %v2715_v2 = vld [vmem:[#allocation5 + $0x10] sm:$0xff]   ;;  %s4388_s11 = scalar_lea.vmem [#allocation8], %s2306_s14  ;;  %s2182_s28 = scalar_lea.sflag [#allocation4], %s3656_s13 }
  0x83   : > { %3424 = vsyncadd (%p4655_p8), [#allocation6], 4294963200  ;;  %2455 = vmatprep.subr.bf16.mxu0 %v2713_v0  ;;  %v2716_v3 = vld [vmem:[#allocation5 + $0x18] sm:$0xff]   ;;  %v289_v4 = vld [vmem:[%s3662_s16] sm:$0xff]  ;;  %p4680_p9 = scmp.ne.s32.totalorder %s4647_s30, 0 }
  0x84   : > { %2456 = vmatpush3.bf16.msra.mxu0 %v2713_v0  ;;  %v290_v5 = vld [vmem:[%s3662_s16 + $0x8] sm:$0xff]  ;;  %v2717_v7 = vld [vmem:[#allocation5 + $0x20] sm:$0xff]   ;;  %v2719_v9 = vld [vmem:[#allocation5 + $0x30] sm:$0xff]   ;;  %s2349_s23 = sshll.u32 (%p4680_p9), %s3506_s22, 5 }
  0x85   : > { %2457 = vmatprep.subr.bf16.mxu0 %v2714_v1  ;;  %v321_v6 = vpack.c.bf16 %v290_v5, %v289_v4  ;;  %v2718_v8 = vld [vmem:[#allocation5 + $0x28] sm:$0xff]   ;;  %v2720_v10 = vld [vmem:[#allocation5 + $0x38] sm:$0xff]   ;;  %v291_v11 = vld [vmem:[%s3662_s16 + $0x10] sm:$0xff]  ;;  %s2190_s25 = ssub.s32 (%p4680_p9), 63, %s2349_s23 }
  0x86   : > { %v292_v12 = vld [vmem:[%s3662_s16 + $0x18] sm:$0xff]  ;;  %v293_v13 = vld [vmem:[%s3662_s16 + $0x20] sm:$0xff]  ;;  %v294_v14 = vld [vmem:[%s3662_s16 + $0x28] sm:$0xff]  ;;  %p2191_p10 = scmp.lt.s32.totalorder (%p4680_p9), %s2190_s25, 32 }
  0x87   : > { %2471 = vmatprep.mubr.bf16.mxu0 %v321_v6  ;;  %v322_v15 = vpack.c.bf16 %v292_v12, %v291_v11  ;;  %v323_v16 = vpack.c.bf16 %v294_v14, %v293_v13  ;;  %v295_v17 = vld [vmem:[%s3662_s16 + $0x30] sm:$0xff]  ;;  %v296_v18 = vld [vmem:[%s3662_s16 + $0x38] sm:$0xff]  ;;  %v297_v19 = vld [vmem:[%s3662_s16 + $0x40] sm:$0xff] }
  0x88   : > { %2458 = vmatpush3.bf16.msra.mxu0 %v2714_v1  ;;  %v298_v20 = vld [vmem:[%s3662_s16 + $0x48] sm:$0xff]  ;;  %v324_v21 = vpack.c.bf16 %v296_v18, %v295_v17  ;;  %v299_v23 = vld [vmem:[%s3662_s16 + $0x50] sm:$0xff]  ;;  %v300_v24 = vld [vmem:[%s3662_s16 + $0x58] sm:$0xff] }
  0x89   : > { %2459 = vmatprep.subr.bf16.mxu0 %v2715_v2  ;;  %v325_v22 = vpack.c.bf16 %v298_v20, %v297_v19  ;;  %v301_v25 = vld [vmem:[%s3662_s16 + $0x60] sm:$0xff]  ;;  %v302_v26 = vld [vmem:[%s3662_s16 + $0x68] sm:$0xff]  ;;  %v326_v27 = vpack.c.bf16 %v300_v24, %v299_v23  ;;  %v303_v29 = vld [vmem:[%s3662_s16 + $0x70] sm:$0xff] }
  0x8a   : > { %v327_v28 = vpack.c.bf16 %v302_v26, %v301_v25  ;;  %v304_v30 = vld [vmem:[%s3662_s16 + $0x78] sm:$0xff]  ;;  %v305_v31 = vld [vmem:[%s3662_s16 + $0x80] sm:$0xff]  ;;  %v306_v32 = vld [vmem:[%s3662_s16 + $0x88] sm:$0xff] }
  0x8b   : > { %v328_v33 = vpack.c.bf16 %v304_v30, %v303_v29  ;;  %v329_v34 = vpack.c.bf16 %v306_v32, %v305_v31  ;;  %v307_v35 = vld [vmem:[%s3662_s16 + $0x90] sm:$0xff]  ;;  %v308_v36 = vld [vmem:[%s3662_s16 + $0x98] sm:$0xff]  ;;  %v309_v37 = vld [vmem:[%s3662_s16 + $0xa0] sm:$0xff] }
  0x8c   : > { %2460 = vmatpush3.bf16.msra.mxu0 %v2715_v2  ;;  %v310_v38 = vld [vmem:[%s3662_s16 + $0xa8] sm:$0xff]  ;;  %v330_v39 = vpack.c.bf16 %v308_v36, %v307_v35  ;;  %v311_v41 = vld [vmem:[%s3662_s16 + $0xb0] sm:$0xff]  ;;  %v312_v42 = vld [vmem:[%s3662_s16 + $0xb8] sm:$0xff] }
  0x8d   : > { %2461 = vmatprep.subr.bf16.mxu0 %v2716_v3  ;;  %v331_v40 = vpack.c.bf16 %v310_v38, %v309_v37  ;;  %v313_v43 = vld [vmem:[%s3662_s16 + $0xc0] sm:$0xff]  ;;  %v314_v44 = vld [vmem:[%s3662_s16 + $0xc8] sm:$0xff]  ;;  %v332_v45 = vpack.c.bf16 %v312_v42, %v311_v41  ;;  %v315_v47 = vld [vmem:[%s3662_s16 + $0xd0] sm:$0xff] }
  0x8e   : > { %v333_v46 = vpack.c.bf16 %v314_v44, %v313_v43  ;;  %v316_v48 = vld [vmem:[%s3662_s16 + $0xd8] sm:$0xff]  ;;  %v317_v49 = vld [vmem:[%s3662_s16 + $0xe0] sm:$0xff]  ;;  %v318_v50 = vld [vmem:[%s3662_s16 + $0xe8] sm:$0xff] }
  0x8f   : > { %v334_v51 = vpack.c.bf16 %v316_v48, %v315_v47  ;;  %v335_v52 = vpack.c.bf16 %v318_v50, %v317_v49  ;;  %v319_v53 = vld [vmem:[%s3662_s16 + $0xf0] sm:$0xff]  ;;  %v320_v54 = vld [vmem:[%s3662_s16 + $0xf8] sm:$0xff]  ;;  %v2721_v56 = vld [vmem:[#allocation7] sm:$0xff]  }
  0x90   : > { %2462 = vmatpush3.bf16.msra.mxu0 %v2716_v3  ;;  %v336_v55 = vpack.c.bf16 %v320_v54, %v319_v53  ;;  %2503 = vmatprep.subr.bf16.mxu1 %v2721_v56  ;;  %v2722_v57 = vld [vmem:[#allocation7 + $0x8] sm:$0xff]   ;;  %v2723_v58 = vld [vmem:[#allocation7 + $0x10] sm:$0xff]   ;;  %v2724_v59 = vld [vmem:[#allocation7 + $0x18] sm:$0xff]  }
  0x91   : > { %2463 = vmatprep.subr.bf16.mxu0 %v2717_v7  ;;  %2504 = vmatpush3.bf16.msra.mxu1 %v2721_v56  ;;  %v2725_v60 = vld [vmem:[#allocation7 + $0x20] sm:$0xff]   ;;  %v2726_v61 = vld [vmem:[#allocation7 + $0x28] sm:$0xff]   ;;  %v2727_v62 = vld [vmem:[#allocation7 + $0x30] sm:$0xff]  }
  0x92   : > { %2505 = vmatprep.subr.bf16.mxu1 %v2722_v57  ;;  %v2728_v63 = vld [vmem:[#allocation7 + $0x38] sm:$0xff]   ;;  %v2729_v0 = vld [vmem:[#allocation5 + $0x40] sm:$0xff]   ;;  %v2730_v1 = vld [vmem:[#allocation5 + $0x48] sm:$0xff]  }
  0x93   : > { %v2731_v2 = vld [vmem:[#allocation5 + $0x50] sm:$0xff]   ;;  %v3707_v3 = vld [vmem:[%s4625_s2] ss:$0 sm:$0xff] }
  0x94   : > { %2464 = vmatpush3.bf16.msra.mxu0 %v2717_v7 }
  0x95   : > { %2465 = vmatprep.subr.bf16.mxu0 %v2718_v8  ;;  %2506 = vmatpush3.bf16.msra.mxu1 %v2722_v57 }
  0x96   : > { %2507 = vmatprep.subr.bf16.mxu1 %v2723_v58 }
  0x98   : > { %2466 = vmatpush3.bf16.msra.mxu0 %v2718_v8 }
  0x99   : > { %2467 = vmatprep.subr.bf16.mxu0 %v2719_v9  ;;  %2508 = vmatpush3.bf16.msra.mxu1 %v2723_v58 }
  0x9a   : > { %2509 = vmatprep.subr.bf16.mxu1 %v2724_v59 }
  0x9c   : > { %2468 = vmatpush3.bf16.msra.mxu0 %v2719_v9 }
  0x9d   : > { %2469 = vmatprep.subr.bf16.mxu0 %v2720_v10  ;;  %2510 = vmatpush3.bf16.msra.mxu1 %v2724_v59 }
  0x9e   : > { %2511 = vmatprep.subr.bf16.mxu1 %v2725_v60 }
  0xa0   : > { %2470 = vmatpush3.bf16.msra.mxu0 %v2720_v10 }
  0xa1   : > { %2512 = vmatpush3.bf16.msra.mxu1 %v2725_v60  ;;  %2551 = vmatprep.subr.bf16.mxu0 %v2729_v0 }
  0xa2   : > { %2513 = vmatprep.subr.bf16.mxu1 %v2726_v61 }
  0xa3   : > { %2472 = vmatmul.mubr.bf16.vlgmr.msra.gmra.mrb[0].mxu0 %v322_v15 }
  0xa4   : > { %2475 = vmatprep.mubr.bf16.mxu0 %v323_v16  ;;  %2552 = vmatpush3.bf16.msra.mxu0 %v2729_v0 }
  0xa5   : > { %2514 = vmatpush3.bf16.msra.mxu1 %v2726_v61  ;;  %2553 = vmatprep.subr.bf16.mxu0 %v2730_v1 }
  0xa6   : > { %2515 = vmatprep.subr.bf16.mxu1 %v2727_v62 }
  0xa8   : > { %2554 = vmatpush3.bf16.msra.mxu0 %v2730_v1 }
  0xa9   : > { %2516 = vmatpush3.bf16.msra.mxu1 %v2727_v62  ;;  %2555 = vmatprep.subr.bf16.mxu0 %v2731_v2 }
  0xaa   : > { %2517 = vmatprep.subr.bf16.mxu1 %v2728_v63 }
  0xab   : > { %2476 = vmatmul.mubr.bf16.gmra.mrb[4].mxu0 %v324_v21 }
  0xac   : > { %2479 = vmatprep.mubr.bf16.mxu0 %v325_v22  ;;  %2556 = vmatpush3.bf16.msra.mxu0 %v2731_v2 }
  0xad   : > { %2518 = vmatpush3.bf16.msra.mxu1 %v2728_v63 }
  0xb3   : > { %2480 = vmatmul.mubr.bf16.gmra.mrb[8].mxu0 %v326_v27 }
  0xb4   : > { %2483 = vmatprep.mubr.bf16.mxu0 %v327_v28 }
  0xbb   : > { %2484 = vmatmul.mubr.bf16.gmra.mrb[12].mxu0 %v328_v33 }
  0xbc   : > { %2487 = vmatprep.mubr.bf16.mxu0 %v329_v34 }
  0xc3   : > { %2488 = vmatmul.mubr.bf16.gmra.mrb[16].mxu0 %v330_v39 }
  0xc4   : > { %2491 = vmatprep.mubr.bf16.mxu0 %v331_v40 }
  0xcb   : > { %2492 = vmatmul.mubr.bf16.gmra.mrb[20].mxu0 %v332_v45 }
  0xcc   : > { %2495 = vmatprep.mubr.bf16.mxu0 %v333_v46 }
  0xd3   : > { %2496 = vmatmul.mubr.bf16.gmra.mrb[24].mxu0 %v334_v51 }
  0xd4   : > { %2499 = vmatprep.mubr.bf16.mxu0 %v335_v52 }
  0xdb   : > { %2500 = vmatmul.mubr.bf16.gmra.mrb[28].mxu0 %v336_v55 }
 0x176   : > { %v2473_v4 = vpop.f32.mrb[0].mxu0 }
 0x177   : > { %v3710_v5 = vadd.f32 %v2473_v4, %v3707_v3  ;;  %v442_v6 = vpop.f32.mrb[1].mxu0 }
 0x178   : > { %v3713_v7 = vadd.f32 %v3707_v3, %v442_v6  ;;  %v2474_v8 = vpop.f32.mrb[2].mxu0 }
 0x179   : > { %v571_v9 = vsub.f32 0.0, %v3710_v5  ;;  %v3717_v10 = vadd.f32 %v2474_v8, %v3707_v3  ;;  %v445_v11 = vpop.f32.mrb[3].mxu0 }
 0x17a   : > { %v569_v12 = vsub.f32 0.0, %v3713_v7  ;;  %v3721_v13 = vadd.f32 %v3707_v3, %v445_v11 }
 0x17b   : > { %v605_v14 = vmul.f32 1.442695, %v571_v9  ;;  %v572_v15 = vsub.f32 0.0, %v3717_v10 }
 0x17c   : > { %v601_v16 = vmul.f32 1.442695, %v569_v12  ;;  %v570_v17 = vsub.f32 0.0, %v3721_v13 }
 0x17d   : > { %2745 = vpow2.f32 %v605_v14  ;;  %v607_v18 = vmul.f32 1.442695, %v572_v15 }
 0x17e   : > { %2747 = vpow2.f32 %v601_v16  ;;  %v603_v19 = vmul.f32 1.442695, %v570_v17  ;;  %v2477_v20 = vpop.f32.mrb[4].mxu0 }
 0x17f   : > { %2749 = vpow2.f32 %v607_v18  ;;  %v3726_v21 = vadd.f32 %v2477_v20, %v3707_v3  ;;  %v458_v22 = vpop.f32.mrb[5].mxu0 }
 0x180   : > { %2751 = vpow2.f32 %v603_v19  ;;  %v3729_v23 = vadd.f32 %v3707_v3, %v458_v22  ;;  %v2478_v24 = vpop.f32.mrb[6].mxu0 }
 0x181   : > { %v575_v25 = vsub.f32 0.0, %v3726_v21  ;;  %v3733_v26 = vadd.f32 %v2478_v24, %v3707_v3  ;;  %v461_v27 = vpop.f32.mrb[7].mxu0 }
 0x182   : > { %v573_v28 = vsub.f32 0.0, %v3729_v23  ;;  %v3737_v29 = vadd.f32 %v3707_v3, %v461_v27 }
 0x183   : > { %v613_v30 = vmul.f32 1.442695, %v575_v25  ;;  %v576_v31 = vsub.f32 0.0, %v3733_v26 }
 0x184   : > { %v609_v32 = vmul.f32 1.442695, %v573_v28  ;;  %v574_v33 = vsub.f32 0.0, %v3737_v29 }
 0x185   : > { %2753 = vpow2.f32 %v613_v30  ;;  %v615_v34 = vmul.f32 1.442695, %v576_v31 }
 0x186   : > { %2755 = vpow2.f32 %v609_v32  ;;  %v611_v35 = vmul.f32 1.442695, %v574_v33  ;;  %v2481_v36 = vpop.f32.mrb[8].mxu0 }
 0x187   : > { %v2746_v37 = vpop.eup %2745  ;;  %2757 = vpow2.f32 %v615_v34  ;;  %v3742_v38 = vadd.f32 %v2481_v36, %v3707_v3  ;;  %v474_v39 = vpop.f32.mrb[9].mxu0 }
 0x188   : > { %v2748_v40 = vpop.eup %2747  ;;  %v667_v41 = vadd.f32 1.0, %v2746_v37  ;;  %2759 = vpow2.f32 %v611_v35  ;;  %v3745_v42 = vadd.f32 %v3707_v3, %v474_v39  ;;  %v2482_v43 = vpop.f32.mrb[10].mxu0 }
 0x189   : > { %v2750_v44 = vpop.eup %2749  ;;  %v665_v45 = vadd.f32 1.0, %v2748_v40  ;;  %v579_v46 = vsub.f32 0.0, %v3742_v38  ;;  %v3749_v47 = vadd.f32 %v2482_v43, %v3707_v3  ;;  %v477_v48 = vpop.f32.mrb[11].mxu0 }
 0x18a   : > { %v2752_v49 = vpop.eup %2751  ;;  %2761 = vrcp.f32 %v667_v41  ;;  %v668_v50 = vadd.f32 1.0, %v2750_v44  ;;  %v577_v51 = vsub.f32 0.0, %v3745_v42  ;;  %v3753_v52 = vadd.f32 %v3707_v3, %v477_v48 }
 0x18b   : > { %2763 = vrcp.f32 %v665_v45  ;;  %v666_v53 = vadd.f32 1.0, %v2752_v49  ;;  %v621_v54 = vmul.f32 1.442695, %v579_v46  ;;  %v580_v55 = vsub.f32 0.0, %v3749_v47 }
 0x18c   : > { %2765 = vrcp.f32 %v668_v50  ;;  %v617_v56 = vmul.f32 1.442695, %v577_v51  ;;  %v578_v57 = vsub.f32 0.0, %v3753_v52 }
 0x18d   : > { %2767 = vrcp.f32 %v666_v53  ;;  %v623_v58 = vmul.f32 1.442695, %v580_v55 }
 0x18e   : > { %2769 = vpow2.f32 %v621_v54  ;;  %v619_v59 = vmul.f32 1.442695, %v578_v57  ;;  %v2485_v60 = vpop.f32.mrb[12].mxu0 }
 0x18f   : > { %v2754_v61 = vpop.eup %2753  ;;  %2771 = vpow2.f32 %v617_v56  ;;  %v3758_v62 = vadd.f32 %v2485_v60, %v3707_v3  ;;  %v490_v63 = vpop.f32.mrb[13].mxu0 }
 0x190   : > { %v2756_v0 = vpop.eup %2755  ;;  %v671_v1 = vadd.f32 1.0, %v2754_v61  ;;  %2773 = vpow2.f32 %v623_v58  ;;  %v3761_v2 = vadd.f32 %v3707_v3, %v490_v63  ;;  %v2486_v4 = vpop.f32.mrb[14].mxu0 }
 0x191   : > { %v2758_v6 = vpop.eup %2757  ;;  %v669_v8 = vadd.f32 1.0, %v2756_v0  ;;  %2775 = vpow2.f32 %v619_v59  ;;  %v583_v9 = vsub.f32 0.0, %v3758_v62  ;;  %v3765_v11 = vadd.f32 %v2486_v4, %v3707_v3  ;;  %v493_v12 = vpop.f32.mrb[15].mxu0 }
 0x192   : > { %v2760_v14 = vpop.eup %2759  ;;  %2777 = vrcp.f32 %v671_v1  ;;  %v672_v15 = vadd.f32 1.0, %v2758_v6  ;;  %v581_v16 = vsub.f32 0.0, %v3761_v2  ;;  %v3769_v17 = vadd.f32 %v3707_v3, %v493_v12 }
 0x193   : > { %2779 = vrcp.f32 %v669_v8  ;;  %v670_v18 = vadd.f32 1.0, %v2760_v14  ;;  %v629_v19 = vmul.f32 1.442695, %v583_v9  ;;  %v584_v20 = vsub.f32 0.0, %v3765_v11 }
 0x194   : > { %v2762_v22 = vpop.eup %2761  ;;  %2781 = vrcp.f32 %v672_v15  ;;  %v625_v24 = vmul.f32 1.442695, %v581_v16  ;;  %v582_v25 = vsub.f32 0.0, %v3769_v17 }
 0x195   : > { %v2764_v27 = vpop.eup %2763  ;;  %2783 = vrcp.f32 %v670_v18  ;;  %v631_v28 = vmul.f32 1.442695, %v584_v20  ;;  %v731_v34 = vmul.f32 %v2762_v22, %v3710_v5 }
 0x196   : > { %v2766_v30 = vpop.eup %2765  ;;  %2785 = vpow2.f32 %v629_v19  ;;  %v627_v31 = vmul.f32 1.442695, %v582_v25  ;;  %v2489_v32 = vpop.f32.mrb[16].mxu0  ;;  %v729_v37 = vmul.f32 %v2764_v27, %v3713_v7 }
 0x197   : > { %v2768_v33 = vpop.eup %2767  ;;  %2787 = vpow2.f32 %v625_v24  ;;  %v3775_v35 = vadd.f32 %v2489_v32, %v3707_v3  ;;  %v506_v36 = vpop.f32.mrb[17].mxu0  ;;  %v732_v40 = vmul.f32 %v2766_v30, %v3717_v10 }
 0x198   : > { %v2770_v39 = vpop.eup %2769  ;;  %2789 = vpow2.f32 %v631_v28  ;;  %v3780_v41 = vadd.f32 %v3707_v3, %v506_v36  ;;  %v2490_v43 = vpop.f32.mrb[18].mxu0  ;;  %v730_v44 = vmul.f32 %v2768_v33, %v3721_v13 }
 0x199   : > { %v2772_v45 = vpop.eup %2771  ;;  %v675_v46 = vadd.f32 1.0, %v2770_v39  ;;  %2791 = vpow2.f32 %v627_v31  ;;  %v587_v5 = vsub.f32 0.0, %v3775_v35  ;;  %v3785_v48 = vadd.f32 %v2490_v43, %v3707_v3  ;;  %v509_v49 = vpop.f32.mrb[19].mxu0 }
 0x19a   : > { %v2774_v7 = vpop.eup %2773  ;;  %v673_v50 = vadd.f32 1.0, %v2772_v45  ;;  %v585_v10 = vsub.f32 0.0, %v3780_v41  ;;  %v3789_v51 = vadd.f32 %v3707_v3, %v509_v49  ;;  %v761_v53 = vpack.c.bf16 %v730_v44, %v729_v37 }
 0x19b   : > { %v2776_v54 = vpop.eup %2775  ;;  %2793 = vrcp.f32 %v675_v46  ;;  %v676_v13 = vadd.f32 1.0, %v2774_v7  ;;  %v637_v55 = vmul.f32 1.442695, %v587_v5  ;;  %v588_v56 = vsub.f32 0.0, %v3785_v48 }
 0x19c   : > { %v2778_v57 = vpop.eup %2777  ;;  %2795 = vrcp.f32 %v673_v50  ;;  %v674_v58 = vadd.f32 1.0, %v2776_v54  ;;  %v633_v59 = vmul.f32 1.442695, %v585_v10  ;;  %v586_v60 = vsub.f32 0.0, %v3789_v51  ;;  %2519 = vmatprep.mubr.bf16.mxu1 %v761_v53 }
 0x19d   : > { %v2780_v61 = vpop.eup %2779  ;;  %2797 = vrcp.f32 %v676_v13  ;;  %v639_v63 = vmul.f32 1.442695, %v588_v56  ;;  %v762_v0 = vpack.c.bf16 %v732_v40, %v731_v34  ;;  %v735_v9 = vmul.f32 %v2778_v57, %v3726_v21 }
 0x19e   : > { %v2782_v1 = vpop.eup %2781  ;;  %2799 = vrcp.f32 %v674_v58  ;;  %v635_v4 = vmul.f32 1.442695, %v586_v60  ;;  %v2493_v6 = vpop.f32.mrb[20].mxu0  ;;  %v733_v12 = vmul.f32 %v2780_v61, %v3729_v23 }
 0x19f   : > { %v2784_v8 = vpop.eup %2783  ;;  %2801 = vpow2.f32 %v637_v55  ;;  %2520 = vmatmul.mubr.bf16.vlgmr.msra.gmra.mrb[0].mxu1 %v762_v0  ;;  %v3796_v14 = vadd.f32 %v2493_v6, %v3707_v3  ;;  %v522_v15 = vpop.f32.mrb[21].mxu0  ;;  %v736_v18 = vmul.f32 %v2782_v1, %v3733_v26 }
 0x1a0   : > { %v2786_v16 = vpop.eup %2785  ;;  %v734_v19 = vmul.f32 %v2784_v8, %v3737_v29  ;;  %2803 = vpow2.f32 %v633_v59  ;;  %v3801_v20 = vadd.f32 %v3707_v3, %v522_v15  ;;  %v2494_v22 = vpop.f32.mrb[22].mxu0 }
 0x1a1   : > { %v2788_v24 = vpop.eup %2787  ;;  %v679_v21 = vadd.f32 1.0, %v2786_v16  ;;  %2805 = vpow2.f32 %v639_v63  ;;  %v591_v23 = vsub.f32 0.0, %v3796_v14  ;;  %v3805_v25 = vadd.f32 %v2494_v22, %v3707_v3  ;;  %v525_v27 = vpop.f32.mrb[23].mxu0 }
 0x1a2   : > { %v2790_v28 = vpop.eup %2789  ;;  %v677_v30 = vadd.f32 1.0, %v2788_v24  ;;  %2807 = vpow2.f32 %v635_v4  ;;  %v589_v26 = vsub.f32 0.0, %v3801_v20  ;;  %v3809_v29 = vadd.f32 %v3707_v3, %v525_v27 }
 0x1a3   : > { %v2792_v31 = vpop.eup %2791  ;;  %2809 = vrcp.f32 %v679_v21  ;;  %v680_v32 = vadd.f32 1.0, %v2790_v28  ;;  %v645_v33 = vmul.f32 1.442695, %v591_v23  ;;  %v592_v34 = vsub.f32 0.0, %v3805_v25 }
 0x1a4   : > { %2811 = vrcp.f32 %v677_v30  ;;  %v678_v36 = vadd.f32 1.0, %v2792_v31  ;;  %v641_v37 = vmul.f32 1.442695, %v589_v26  ;;  %v590_v39 = vsub.f32 0.0, %v3809_v29 }
 0x1a5   : > { %v2794_v40 = vpop.eup %2793  ;;  %2813 = vrcp.f32 %v680_v32  ;;  %v647_v43 = vmul.f32 1.442695, %v592_v34  ;;  %v763_v44 = vpack.c.bf16 %v734_v19, %v733_v12  ;;  %v764_v45 = vpack.c.bf16 %v736_v18, %v735_v9 }
 0x1a6   : > { %v2796_v46 = vpop.eup %2795  ;;  %2815 = vrcp.f32 %v678_v36  ;;  %v643_v5 = vmul.f32 1.442695, %v590_v39  ;;  %v2497_v49 = vpop.f32.mrb[24].mxu0  ;;  %v739_v4 = vmul.f32 %v2794_v40, %v3742_v38 }
 0x1a7   : > { %v2798_v7 = vpop.eup %2797  ;;  %2817 = vpow2.f32 %v645_v33  ;;  %2523 = vmatprep.mubr.bf16.mxu1 %v763_v44  ;;  %v3814_v50 = vadd.f32 %v2497_v49, %v3707_v3  ;;  %v538_v10 = vpop.f32.mrb[25].mxu0  ;;  %v737_v54 = vmul.f32 %v2796_v46, %v3745_v42 }
 0x1a8   : > { %v2800_v53 = vpop.eup %2799  ;;  %v740_v13 = vmul.f32 %v2798_v7, %v3749_v47  ;;  %2819 = vpow2.f32 %v641_v37  ;;  %2524 = vmatmul.mubr.bf16.gmra.mrb[4].mxu1 %v764_v45  ;;  %v3819_v55 = vadd.f32 %v3707_v3, %v538_v10  ;;  %v2498_v56 = vpop.f32.mrb[26].mxu0 }
 0x1a9   : > { %v2802_v57 = vpop.eup %2801  ;;  %v738_v58 = vmul.f32 %v2800_v53, %v3753_v52  ;;  %2821 = vpow2.f32 %v647_v43  ;;  %v595_v59 = vsub.f32 0.0, %v3814_v50  ;;  %v3824_v60 = vadd.f32 %v2498_v56, %v3707_v3  ;;  %v541_v61 = vpop.f32.mrb[27].mxu0 }
 0x1aa   : > { %v2804_v63 = vpop.eup %2803  ;;  %v683_v42 = vadd.f32 1.0, %v2802_v57  ;;  %2823 = vpow2.f32 %v643_v5  ;;  %v593_v47 = vsub.f32 0.0, %v3819_v55  ;;  %v3828_v0 = vadd.f32 %v3707_v3, %v541_v61 }
 0x1ab   : > { %v2806_v1 = vpop.eup %2805  ;;  %v681_v6 = vadd.f32 1.0, %v2804_v63  ;;  %v596_v52 = vsub.f32 0.0, %v3824_v60  ;;  %v765_v8 = vpack.c.bf16 %v738_v58, %v737_v54  ;;  %v653_v15 = vmul.f32 1.442695, %v595_v59 }
 0x1ac   : > { %v2808_v9 = vpop.eup %2807  ;;  %2825 = vrcp.f32 %v683_v42  ;;  %v684_v12 = vadd.f32 1.0, %v2806_v1  ;;  %v594_v16 = vsub.f32 0.0, %v3828_v0  ;;  %v649_v22 = vmul.f32 1.442695, %v593_v47 }
 0x1ad   : > { %v2810_v18 = vpop.eup %2809  ;;  %2827 = vrcp.f32 %v681_v6  ;;  %v682_v19 = vadd.f32 1.0, %v2808_v9  ;;  %2527 = vmatprep.mubr.bf16.mxu1 %v765_v8  ;;  %v766_v24 = vpack.c.bf16 %v740_v13, %v739_v4  ;;  %v655_v23 = vmul.f32 1.442695, %v596_v52 }
 0x1ae   : > { %v2812_v21 = vpop.eup %2811  ;;  %2829 = vrcp.f32 %v684_v12  ;;  %v2501_v38 = vpop.f32.mrb[28].mxu0  ;;  %v651_v28 = vmul.f32 1.442695, %v594_v16  ;;  %v743_v32 = vmul.f32 %v2810_v18, %v3758_v62 }
 0x1af   : > { %v2814_v27 = vpop.eup %2813  ;;  %2831 = vrcp.f32 %v682_v19  ;;  %v3834_v30 = vadd.f32 %v2501_v38, %v3707_v3  ;;  %v554_v26 = vpop.f32.mrb[29].mxu0  ;;  %v741_v49 = vmul.f32 %v2812_v21, %v3761_v2 }
 0x1b0   : > { %v2816_v31 = vpop.eup %2815  ;;  %v744_v33 = vmul.f32 %v2814_v27, %v3765_v11  ;;  %2833 = vpow2.f32 %v653_v15  ;;  %2528 = vmatmul.mubr.bf16.gmra.mrb[8].mxu1 %v766_v24  ;;  %v3839_v34 = vadd.f32 %v3707_v3, %v554_v26  ;;  %v2502_v36 = vpop.f32.mrb[30].mxu0 }
 0x1b1   : > { %v2818_v37 = vpop.eup %2817  ;;  %v742_v39 = vmul.f32 %v2816_v31, %v3769_v17  ;;  %2835 = vpow2.f32 %v649_v22  ;;  %v599_v40 = vsub.f32 0.0, %v3834_v30  ;;  %v3844_v43 = vadd.f32 %v2502_v36, %v3707_v3  ;;  %v557_v44 = vpop.f32.mrb[31].mxu0 }
 0x1b2   : > { %v2820_v45 = vpop.eup %2819  ;;  %v687_v62 = vadd.f32 1.0, %v2818_v37  ;;  %2837 = vpow2.f32 %v655_v23  ;;  %v597_v11 = vsub.f32 0.0, %v3839_v34  ;;  %v3848_v46 = vadd.f32 %v3707_v3, %v557_v44 }
 0x1b3   : > { %v2822_v5 = vpop.eup %2821  ;;  %v685_v7 = vadd.f32 1.0, %v2820_v45  ;;  %2839 = vpow2.f32 %v651_v28  ;;  %v600_v17 = vsub.f32 0.0, %v3844_v43  ;;  %v661_v54 = vmul.f32 1.442695, %v599_v40 }
 0x1b4   : > { %v2824_v10 = vpop.eup %2823  ;;  %2841 = vrcp.f32 %v687_v62  ;;  %v688_v53 = vadd.f32 1.0, %v2822_v5  ;;  %v598_v13 = vsub.f32 0.0, %v3848_v46  ;;  %v657_v57 = vmul.f32 1.442695, %v597_v11 }
 0x1b5   : > { %2843 = vrcp.f32 %v685_v7  ;;  %v686_v56 = vadd.f32 1.0, %v2824_v10  ;;  %v767_v58 = vpack.c.bf16 %v742_v39, %v741_v49  ;;  %v663_v3 = vmul.f32 1.442695, %v600_v17 }
 0x1b6   : > { %v2826_v59 = vpop.eup %2825  ;;  %2845 = vrcp.f32 %v688_v53  ;;  %v768_v61 = vpack.c.bf16 %v744_v33, %v743_v32  ;;  %v659_v2 = vmul.f32 1.442695, %v598_v13 }
 0x1b7   : > { %v2828_v63 = vpop.eup %2827  ;;  %2847 = vrcp.f32 %v686_v56  ;;  %2531 = vmatprep.mubr.bf16.mxu1 %v767_v58  ;;  %v747_v1 = vmul.f32 %v2826_v59, %v3775_v35  ;;  %v2733_v59 = vld [vmem:[#allocation5 + $0x60] sm:$0xff]  }
 0x1b8   : > { %v2830_v42 = vpop.eup %2829  ;;  %2849 = vpow2.f32 %v661_v54  ;;  %2532 = vmatmul.mubr.bf16.gmra.mrb[12].mxu1 %v768_v61  ;;  %v745_v52 = vmul.f32 %v2828_v63, %v3780_v41  ;;  %v2739_v61 = vld [vmem:[#allocation7 + $0x50] sm:$0xff]   ;;  %v2740_v63 = vld [vmem:[#allocation7 + $0x58] sm:$0xff]  }
 0x1b9   : > { %v2832_v47 = vpop.eup %2831  ;;  %v748_v4 = vmul.f32 %v2830_v42, %v3785_v48  ;;  %2851 = vpow2.f32 %v657_v57 }
 0x1ba   : > { %v2834_v6 = vpop.eup %2833  ;;  %v746_v8 = vmul.f32 %v2832_v47, %v3789_v51  ;;  %2853 = vpow2.f32 %v663_v3  ;;  %v2734_v3 = vld [vmem:[#allocation5 + $0x68] sm:$0xff]  }
 0x1bb   : > { %v2836_v9 = vpop.eup %2835  ;;  %v691_v12 = vadd.f32 1.0, %v2834_v6  ;;  %2855 = vpow2.f32 %v659_v2  ;;  %v770_v15 = vpack.c.bf16 %v748_v4, %v747_v1  ;;  %v3872_v2 = vld [vmem:[%s4627_s4] ss:$0 sm:$0xff] }
 0x1bc   : > { %v2838_v16 = vpop.eup %2837  ;;  %v689_v18 = vadd.f32 1.0, %v2836_v9  ;;  %v769_v19 = vpack.c.bf16 %v746_v8, %v745_v52 }
 0x1bd   : > { %v2840_v22 = vpop.eup %2839  ;;  %2857 = vrcp.f32 %v691_v12  ;;  %v692_v24 = vadd.f32 1.0, %v2838_v16 }
 0x1be   : > { %v2842_v35 = vpop.eup %2841  ;;  %2859 = vrcp.f32 %v689_v18  ;;  %v690_v48 = vadd.f32 1.0, %v2840_v22  ;;  %2535 = vmatprep.mubr.bf16.mxu1 %v769_v19 }
 0x1bf   : > { %v2844_v21 = vpop.eup %2843  ;;  %2861 = vrcp.f32 %v692_v24  ;;  %v751_v23 = vmul.f32 %v2842_v35, %v3796_v14 }
 0x1c0   : > { %v2846_v41 = vpop.eup %2845  ;;  %2863 = vrcp.f32 %v690_v48  ;;  %2536 = vmatmul.mubr.bf16.gmra.mrb[16].mxu1 %v770_v15  ;;  %v749_v28 = vmul.f32 %v2844_v21, %v3801_v20 }
 0x1c1   : > { %v2848_v51 = vpop.eup %2847  ;;  %v752_v38 = vmul.f32 %v2846_v41, %v3805_v25 }
 0x1c2   : > { %v2850_v27 = vpop.eup %2849  ;;  %v750_v26 = vmul.f32 %v2848_v51, %v3809_v29 }
 0x1c3   : > { %v2852_v31 = vpop.eup %2851  ;;  %v695_v32 = vadd.f32 1.0, %v2850_v27  ;;  %v772_v33 = vpack.c.bf16 %v752_v38, %v751_v23 }
 0x1c4   : > { %v2854_v36 = vpop.eup %2853  ;;  %v693_v37 = vadd.f32 1.0, %v2852_v31  ;;  %v771_v39 = vpack.c.bf16 %v750_v26, %v749_v28 }
 0x1c5   : > { %v2856_v40 = vpop.eup %2855  ;;  %2865 = vrcp.f32 %v695_v32  ;;  %v696_v44 = vadd.f32 1.0, %v2854_v36 }
 0x1c6   : > { %2867 = vrcp.f32 %v693_v37  ;;  %v694_v45 = vadd.f32 1.0, %v2856_v40  ;;  %2539 = vmatprep.mubr.bf16.mxu1 %v771_v39 }
 0x1c7   : > { %v2858_v14 = vpop.eup %2857  ;;  %2869 = vrcp.f32 %v696_v44 }
 0x1c8   : > { %v2860_v25 = vpop.eup %2859  ;;  %2871 = vrcp.f32 %v694_v45  ;;  %2540 = vmatmul.mubr.bf16.gmra.mrb[20].mxu1 %v772_v33  ;;  %v755_v29 = vmul.f32 %v2858_v14, %v3814_v50 }
 0x1c9   : > { %v2862_v20 = vpop.eup %2861  ;;  %v753_v5 = vmul.f32 %v2860_v25, %v3819_v55 }
 0x1ca   : > { %v2864_v62 = vpop.eup %2863  ;;  %v756_v11 = vmul.f32 %v2862_v20, %v3824_v60 }
 0x1cb   : > { %v754_v49 = vmul.f32 %v2864_v62, %v3828_v0  ;;  %v2732_v0 = vld [vmem:[#allocation5 + $0x58] sm:$0xff]  }
 0x1cc   : > { %v774_v7 = vpack.c.bf16 %v756_v11, %v755_v29  ;;  %2557 = vmatprep.subr.bf16.mxu0 %v2732_v0 }
 0x1cd   : > { %v773_v17 = vpack.c.bf16 %v754_v49, %v753_v5  ;;  %2558 = vmatpush3.bf16.msra.mxu0 %v2732_v0 }
 0x1ce   : > { %2559 = vmatprep.subr.bf16.mxu0 %v2733_v59 }
 0x1cf   : > { %v2866_v10 = vpop.eup %2865  ;;  %2543 = vmatprep.mubr.bf16.mxu1 %v773_v17 }
 0x1d0   : > { %v2868_v53 = vpop.eup %2867  ;;  %2544 = vmatmul.mubr.bf16.gmra.mrb[24].mxu1 %v774_v7  ;;  %v759_v56 = vmul.f32 %v2866_v10, %v3834_v30  ;;  %v2735_v30 = vld [vmem:[#allocation5 + $0x70] sm:$0xff]  }
 0x1d1   : > { %v2870_v54 = vpop.eup %2869  ;;  %v757_v50 = vmul.f32 %v2868_v53, %v3839_v34  ;;  %2560 = vmatpush3.bf16.msra.mxu0 %v2733_v59  ;;  %v2737_v34 = vld [vmem:[#allocation7 + $0x40] sm:$0xff]  }
 0x1d2   : > { %v2872_v13 = vpop.eup %2871  ;;  %v760_v57 = vmul.f32 %v2870_v54, %v3844_v43  ;;  %2561 = vmatprep.subr.bf16.mxu0 %v2734_v3  ;;  %v2736_v43 = vld [vmem:[#allocation5 + $0x78] sm:$0xff]   ;;  %2599 = vmatprep.subr.bf16.mxu1 %v2737_v34 }
 0x1d3   : > { %v758_v60 = vmul.f32 %v2872_v13, %v3848_v46  ;;  %v2738_v46 = vld [vmem:[#allocation7 + $0x48] sm:$0xff]   ;;  %2600 = vmatpush3.bf16.msra.mxu1 %v2737_v34 }
 0x1d4   : > { %v776_v58 = vpack.c.bf16 %v760_v57, %v759_v56  ;;  %2601 = vmatprep.subr.bf16.mxu1 %v2738_v46 }
 0x1d5   : > { %v775_v55 = vpack.c.bf16 %v758_v60, %v757_v50  ;;  %2562 = vmatpush3.bf16.msra.mxu0 %v2734_v3 }
 0x1d6   : > { %2563 = vmatprep.subr.bf16.mxu0 %v2735_v30 }
 0x1d7   : > { %2547 = vmatprep.mubr.bf16.mxu1 %v775_v55  ;;  %2602 = vmatpush3.bf16.msra.mxu1 %v2738_v46 }
 0x1d8   : > { %2548 = vmatmul.mubr.bf16.gmra.mrb[28].mxu1 %v776_v58  ;;  %2603 = vmatprep.subr.bf16.mxu1 %v2739_v61 }
 0x1d9   : > { %2564 = vmatpush3.bf16.msra.mxu0 %v2735_v30 }
 0x1da   : > { %2565 = vmatprep.subr.bf16.mxu0 %v2736_v43 }
 0x1db   : > { %2604 = vmatpush3.bf16.msra.mxu1 %v2739_v61 }
 0x1dc   : > { %2605 = vmatprep.subr.bf16.mxu1 %v2740_v63 }
 0x1dd   : > { %2566 = vmatpush3.bf16.msra.mxu0 %v2736_v43 }
 0x1df   : > { %2606 = vmatpush3.bf16.msra.mxu1 %v2740_v63 }
 0x272   : > { %v2521_v42 = vpop.f32.mrb[0].mxu1 }
 0x273   : > { %v3875_v47 = vadd.f32 %v2521_v42, %v3872_v2  ;;  %v882_v1 = vpop.f32.mrb[1].mxu1 }
 0x274   : > { %v3878_v4 = vadd.f32 %v3872_v2, %v882_v1  ;;  %v2522_v6 = vpop.f32.mrb[2].mxu1 }
 0x275   : > { %v1011_v52 = vsub.f32 0.0, %v3875_v47  ;;  %v3882_v8 = vadd.f32 %v2522_v6, %v3872_v2  ;;  %v885_v9 = vpop.f32.mrb[3].mxu1 }
 0x276   : > { %v1009_v12 = vsub.f32 0.0, %v3878_v4  ;;  %v3886_v15 = vadd.f32 %v3872_v2, %v885_v9 }
 0x277   : > { %v1045_v16 = vmul.f32 1.442695, %v1011_v52  ;;  %v1012_v18 = vsub.f32 0.0, %v3882_v8 }
 0x278   : > { %v1041_v19 = vmul.f32 1.442695, %v1009_v12  ;;  %v1010_v22 = vsub.f32 0.0, %v3886_v15 }
 0x279   : > { %2873 = vpow2.f32 %v1045_v16  ;;  %v1047_v24 = vmul.f32 1.442695, %v1012_v18 }
 0x27a   : > { %2875 = vpow2.f32 %v1041_v19  ;;  %v1043_v35 = vmul.f32 1.442695, %v1010_v22 }
 0x27b   : > { %2877 = vpow2.f32 %v1047_v24  ;;  %v2525_v48 = vpop.f32.mrb[4].mxu1 }
 0x27c   : > { %2879 = vpow2.f32 %v1043_v35  ;;  %v3891_v21 = vadd.f32 %v2525_v48, %v3872_v2  ;;  %v898_v41 = vpop.f32.mrb[5].mxu1 }
 0x27d   : > { %v3894_v51 = vadd.f32 %v3872_v2, %v898_v41  ;;  %v2526_v23 = vpop.f32.mrb[6].mxu1 }
 0x27e   : > { %v1015_v38 = vsub.f32 0.0, %v3891_v21  ;;  %v3898_v27 = vadd.f32 %v2526_v23, %v3872_v2  ;;  %v901_v28 = vpop.f32.mrb[7].mxu1 }
 0x27f   : > { %v1013_v26 = vsub.f32 0.0, %v3894_v51  ;;  %v3902_v31 = vadd.f32 %v3872_v2, %v901_v28 }
 0x280   : > { %v1053_v32 = vmul.f32 1.442695, %v1015_v38  ;;  %v1016_v33 = vsub.f32 0.0, %v3898_v27 }
 0x281   : > { %v1049_v36 = vmul.f32 1.442695, %v1013_v26  ;;  %v1014_v37 = vsub.f32 0.0, %v3902_v31 }
 0x282   : > { %2881 = vpow2.f32 %v1053_v32  ;;  %v1055_v39 = vmul.f32 1.442695, %v1016_v33 }
 0x283   : > { %v2874_v40 = vpop.eup %2873  ;;  %2883 = vpow2.f32 %v1049_v36  ;;  %v1051_v44 = vmul.f32 1.442695, %v1014_v37  ;;  %v2529_v45 = vpop.f32.mrb[8].mxu1 }
 0x284   : > { %v2876_v14 = vpop.eup %2875  ;;  %v1107_v25 = vadd.f32 1.0, %v2874_v40  ;;  %2885 = vpow2.f32 %v1055_v39  ;;  %v3907_v20 = vadd.f32 %v2529_v45, %v3872_v2  ;;  %v914_v62 = vpop.f32.mrb[9].mxu1 }
 0x285   : > { %v2878_v29 = vpop.eup %2877  ;;  %v1105_v11 = vadd.f32 1.0, %v2876_v14  ;;  %2887 = vpow2.f32 %v1051_v44  ;;  %v3910_v5 = vadd.f32 %v3872_v2, %v914_v62  ;;  %v2530_v49 = vpop.f32.mrb[10].mxu1  ;;  %v3257_v14 = vld [vmem:[%s3662_s16 + $0x10] sm:$0xff] }
 0x286   : > { %v2880_v7 = vpop.eup %2879  ;;  %2889 = vrcp.f32 %v1107_v25  ;;  %v1108_v17 = vadd.f32 1.0, %v2878_v29  ;;  %v1019_v10 = vsub.f32 0.0, %v3907_v20  ;;  %v3914_v53 = vadd.f32 %v2530_v49, %v3872_v2  ;;  %v917_v54 = vpop.f32.mrb[11].mxu1 }
 0x287   : > { %2891 = vrcp.f32 %v1105_v11  ;;  %v1106_v13 = vadd.f32 1.0, %v2880_v7  ;;  %v1017_v56 = vsub.f32 0.0, %v3910_v5  ;;  %v3918_v57 = vadd.f32 %v3872_v2, %v917_v54  ;;  %v3259_v54 = vld [vmem:[%s3662_s16 + $0x8] sm:$0xff] }
 0x288   : > { %2893 = vrcp.f32 %v1108_v17  ;;  %v1061_v50 = vmul.f32 1.442695, %v1019_v10  ;;  %v1020_v60 = vsub.f32 0.0, %v3914_v53 }
 0x289   : > { %2895 = vrcp.f32 %v1106_v13  ;;  %v1057_v58 = vmul.f32 1.442695, %v1017_v56  ;;  %v1018_v55 = vsub.f32 0.0, %v3918_v57 }
 0x28a   : > { %2897 = vpow2.f32 %v1061_v50  ;;  %v1063_v0 = vmul.f32 1.442695, %v1020_v60 }
 0x28b   : > { %2899 = vpow2.f32 %v1057_v58  ;;  %v1059_v59 = vmul.f32 1.442695, %v1018_v55  ;;  %v2533_v3 = vpop.f32.mrb[12].mxu1  ;;  %v3260_v58 = vld [vmem:[%s3662_s16] sm:$0xff] }
 0x28c   : > { %v2882_v30 = vpop.eup %2881  ;;  %2901 = vpow2.f32 %v1063_v0  ;;  %v3923_v43 = vadd.f32 %v2533_v3, %v3872_v2  ;;  %v930_v34 = vpop.f32.mrb[13].mxu1 }
 0x28d   : > { %v2884_v46 = vpop.eup %2883  ;;  %v1111_v61 = vadd.f32 1.0, %v2882_v30  ;;  %2903 = vpow2.f32 %v1059_v59  ;;  %v3926_v63 = vadd.f32 %v3872_v2, %v930_v34  ;;  %v2534_v42 = vpop.f32.mrb[14].mxu1 }
 0x28e   : > { %v2886_v1 = vpop.eup %2885  ;;  %v1109_v6 = vadd.f32 1.0, %v2884_v46  ;;  %v1023_v52 = vsub.f32 0.0, %v3923_v43  ;;  %v3930_v9 = vadd.f32 %v2534_v42, %v3872_v2  ;;  %v933_v12 = vpop.f32.mrb[15].mxu1 }
 0x28f   : > { %v2888_v16 = vpop.eup %2887  ;;  %2905 = vrcp.f32 %v1111_v61  ;;  %v1112_v18 = vadd.f32 1.0, %v2886_v1  ;;  %v1021_v19 = vsub.f32 0.0, %v3926_v63  ;;  %v3934_v22 = vadd.f32 %v3872_v2, %v933_v12 }
 0x290   : > { %v2890_v24 = vpop.eup %2889  ;;  %2907 = vrcp.f32 %v1109_v6  ;;  %v1110_v35 = vadd.f32 1.0, %v2888_v16  ;;  %v1069_v48 = vmul.f32 1.442695, %v1023_v52  ;;  %v1024_v41 = vsub.f32 0.0, %v3930_v9 }
 0x291   : > { %v2892_v23 = vpop.eup %2891  ;;  %v1171_v38 = vmul.f32 %v2890_v24, %v3875_v47  ;;  %2909 = vrcp.f32 %v1112_v18  ;;  %v1065_v28 = vmul.f32 1.442695, %v1021_v19  ;;  %v1022_v26 = vsub.f32 0.0, %v3934_v22 }
 0x292   : > { %v2894_v32 = vpop.eup %2893  ;;  %2911 = vrcp.f32 %v1110_v35  ;;  %v1071_v33 = vmul.f32 1.442695, %v1024_v41  ;;  %v1169_v37 = vmul.f32 %v2892_v23, %v3878_v4  ;;  %v3258_v4 = vld [vmem:[%s3662_s16 + $0x18] sm:$0xff] }
 0x293   : > { %v2896_v36 = vpop.eup %2895  ;;  %v1172_v39 = vmul.f32 %v2894_v32, %v3882_v8  ;;  %2913 = vpow2.f32 %v1069_v48  ;;  %v1067_v40 = vmul.f32 1.442695, %v1022_v26  ;;  %v2537_v44 = vpop.f32.mrb[16].mxu1  ;;  %v3942_v47 = vadd.f32 %v3257_v14, %v1171_v38  ;;  %v3262_v14 = vld [vmem:[%s3662_s16 + $0x28] sm:$0xff] }
 0x294   : > { %v2898_v45 = vpop.eup %2897  ;;  %v1170_v25 = vmul.f32 %v2896_v36, %v3886_v15  ;;  %2915 = vpow2.f32 %v1065_v28  ;;  %v3946_v62 = vadd.f32 %v2537_v44, %v3872_v2  ;;  %v946_v29 = vpop.f32.mrb[17].mxu1  ;;  %v3959_v55 = vadd.f32 %v3260_v58, %v1169_v37  ;;  %v3261_v37 = vld [vmem:[%s3662_s16 + $0x20] sm:$0xff] }
 0x295   : > { %v2900_v11 = vpop.eup %2899  ;;  %v3949_v49 = vadd.f32 %v3258_v4, %v1172_v39  ;;  %v1115_v8 = vadd.f32 1.0, %v2898_v45  ;;  %2917 = vpow2.f32 %v1071_v33  ;;  %v3952_v7 = vadd.f32 %v3872_v2, %v946_v29  ;;  %v2538_v17 = vpop.f32.mrb[18].mxu1 }
 0x296   : > { %v2902_v10 = vpop.eup %2901  ;;  %v3955_v13 = vadd.f32 %v3259_v54, %v1170_v25  ;;  %v1113_v15 = vadd.f32 1.0, %v2900_v11  ;;  %2919 = vpow2.f32 %v1067_v40  ;;  %v1027_v56 = vsub.f32 0.0, %v3946_v62  ;;  %v949_v50 = vpop.f32.mrb[19].mxu1 }
 0x297   : > { %v2904_v60 = vpop.eup %2903  ;;  %2921 = vrcp.f32 %v1115_v8  ;;  %v1116_v0 = vadd.f32 1.0, %v2902_v10  ;;  %v1025_v59 = vsub.f32 0.0, %v3952_v7  ;;  %v3963_v34 = vadd.f32 %v2538_v17, %v3872_v2 }
 0x298   : > { %2923 = vrcp.f32 %v1113_v15  ;;  %v1114_v3 = vadd.f32 1.0, %v2904_v60  ;;  %v1077_v30 = vmul.f32 1.442695, %v1027_v56  ;;  %v3966_v42 = vadd.f32 %v3872_v2, %v949_v50  ;;  %v3263_v50 = vld [vmem:[%s3662_s16 + $0x30] sm:$0xff] }
 0x299   : > { %v2906_v46 = vpop.eup %2905  ;;  %2925 = vrcp.f32 %v1116_v0  ;;  %v1073_v61 = vmul.f32 1.442695, %v1025_v59  ;;  %v1233_v1 = vpack.c.bf16 %v3955_v13, %v3959_v55  ;;  %v1234_v52 = vpack.c.bf16 %v3949_v49, %v3942_v47 }
 0x29a   : > { %v2908_v6 = vpop.eup %2907  ;;  %2927 = vrcp.f32 %v1114_v3  ;;  %v1028_v12 = vsub.f32 0.0, %v3963_v34  ;;  %v1026_v19 = vsub.f32 0.0, %v3966_v42  ;;  %v1175_v48 = vmul.f32 %v2906_v46, %v3891_v21 }
 0x29b   : > { %v2910_v16 = vpop.eup %2909  ;;  %v1173_v18 = vmul.f32 %v2908_v6, %v3894_v51  ;;  %2929 = vpow2.f32 %v1077_v30  ;;  %v2541_v24 = vpop.f32.mrb[20].mxu1  ;;  %2567 = vmatprep.mubr.bf16.mxu0 %v1233_v1  ;;  %v3264_v6 = vld [vmem:[%s3662_s16 + $0x38] sm:$0xff] }
 0x29c   : > { %v2912_v35 = vpop.eup %2911  ;;  %2931 = vpow2.f32 %v1073_v61  ;;  %v1079_v41 = vmul.f32 1.442695, %v1028_v12  ;;  %v962_v23 = vpop.f32.mrb[21].mxu1  ;;  %2568 = vmatmul.mubr.bf16.vlgmr.msra.gmra.mrb[32].mxu0 %v1234_v52  ;;  %v1176_v28 = vmul.f32 %v2910_v16, %v3898_v27  ;;  %v1075_v51 = vmul.f32 1.442695, %v1026_v19 }
 0x29d   : > { %v2914_v38 = vpop.eup %2913  ;;  %v1174_v26 = vmul.f32 %v2912_v35, %v3902_v31  ;;  %v3979_v32 = vadd.f32 %v2541_v24, %v3872_v2  ;;  %v2542_v33 = vpop.f32.mrb[22].mxu1  ;;  %v3982_v39 = vadd.f32 %v3261_v37, %v1173_v18  ;;  %v3985_v40 = vadd.f32 %v3872_v2, %v962_v23  ;;  %v3265_v23 = vld [vmem:[%s3662_s16 + $0x40] sm:$0xff] }
 0x29e   : > { %v2916_v36 = vpop.eup %2915  ;;  %v1119_v21 = vadd.f32 1.0, %v2914_v38  ;;  %2933 = vpow2.f32 %v1079_v41  ;;  %v965_v44 = vpop.f32.mrb[23].mxu1  ;;  %v3993_v8 = vadd.f32 %v2542_v33, %v3872_v2  ;;  %v3999_v60 = vadd.f32 %v3263_v50, %v1175_v48 }
 0x29f   : > { %v2918_v45 = vpop.eup %2917  ;;  %v3988_v27 = vadd.f32 %v3262_v14, %v1174_v26  ;;  %v1117_v31 = vadd.f32 1.0, %v2916_v36  ;;  %2935 = vpow2.f32 %v1075_v51  ;;  %v1031_v25 = vsub.f32 0.0, %v3979_v32  ;;  %v3266_v51 = vld [vmem:[%s3662_s16 + $0x48] sm:$0xff] }
 0x2a0   : > { %v2920_v29 = vpop.eup %2919  ;;  %2937 = vrcp.f32 %v1119_v21  ;;  %v1120_v11 = vadd.f32 1.0, %v2918_v45  ;;  %v1029_v4 = vsub.f32 0.0, %v3985_v40  ;;  %v3996_v15 = vadd.f32 %v3872_v2, %v965_v44 }
 0x2a1   : > { %v2922_v17 = vpop.eup %2921  ;;  %2939 = vrcp.f32 %v1117_v31  ;;  %v1118_v10 = vadd.f32 1.0, %v2920_v29  ;;  %v1085_v54 = vmul.f32 1.442695, %v1031_v25  ;;  %v1032_v0 = vsub.f32 0.0, %v3993_v8 }
 0x2a2   : > { %v2924_v56 = vpop.eup %2923  ;;  %2941 = vrcp.f32 %v1120_v11  ;;  %v1081_v58 = vmul.f32 1.442695, %v1029_v4  ;;  %v1030_v30 = vsub.f32 0.0, %v3996_v15  ;;  %v1235_v61 = vpack.c.bf16 %v3988_v27, %v3982_v39 }
 0x2a3   : > { %v2926_v59 = vpop.eup %2925  ;;  %v1177_v3 = vmul.f32 %v2924_v56, %v3910_v5  ;;  %2943 = vrcp.f32 %v1118_v10  ;;  %v2545_v46 = vpop.f32.mrb[24].mxu1  ;;  %v4007_v52 = vadd.f32 %v3264_v6, %v1176_v28  ;;  %v1179_v12 = vmul.f32 %v2922_v17, %v3907_v20  ;;  %v3267_v56 = vld [vmem:[%s3662_s16 + $0x50] sm:$0xff] }
 0x2a4   : > { %v2928_v1 = vpop.eup %2927  ;;  %2945 = vpow2.f32 %v1085_v54  ;;  %v1087_v16 = vmul.f32 1.442695, %v1032_v0  ;;  %v978_v18 = vpop.f32.mrb[25].mxu1  ;;  %v1180_v5 = vmul.f32 %v2926_v59, %v3914_v53  ;;  %v1083_v35 = vmul.f32 1.442695, %v1030_v30  ;;  %2571 = vmatprep.mubr.bf16.mxu0 %v1235_v61 }
 0x2a5   : > { %v2930_v19 = vpop.eup %2929  ;;  %v1178_v24 = vmul.f32 %v2928_v1, %v3918_v57  ;;  %2947 = vpow2.f32 %v1081_v58  ;;  %v2546_v48 = vpop.f32.mrb[26].mxu1  ;;  %v4013_v38 = vadd.f32 %v3265_v23, %v1177_v3  ;;  %v4016_v20 = vadd.f32 %v2545_v46, %v3872_v2 }
 0x2a6   : > { %v2932_v41 = vpop.eup %2931  ;;  %v1123_v28 = vadd.f32 1.0, %v2930_v19  ;;  %2949 = vpow2.f32 %v1087_v16  ;;  %v981_v26 = vpop.f32.mrb[27].mxu1  ;;  %v4022_v57 = vadd.f32 %v3872_v2, %v978_v18  ;;  %v1236_v21 = vpack.c.bf16 %v4007_v52, %v3999_v60  ;;  %v3268_v16 = vld [vmem:[%s3662_s16 + $0x58] sm:$0xff] }
 0x2a7   : > { %v4019_v33 = vadd.f32 %v3266_v51, %v1178_v24  ;;  %v1121_v53 = vadd.f32 1.0, %v2932_v41  ;;  %2951 = vpow2.f32 %v1083_v35  ;;  %v1035_v37 = vsub.f32 0.0, %v4016_v20 }
 0x2a8   : > { %v2934_v36 = vpop.eup %2933  ;;  %2953 = vrcp.f32 %v1123_v28  ;;  %v4028_v44 = vadd.f32 %v2546_v48, %v3872_v2  ;;  %v1033_v31 = vsub.f32 0.0, %v4022_v57  ;;  %v4032_v25 = vadd.f32 %v3872_v2, %v981_v26  ;;  %2572 = vmatmul.mubr.bf16.gmra.mrb[36].mxu0 %v1236_v21  ;;  %v3269_v26 = vld [vmem:[%s3662_s16 + $0x60] sm:$0xff] }
 0x2a9   : > { %v2936_v45 = vpop.eup %2935  ;;  %2955 = vrcp.f32 %v1121_v53  ;;  %v1124_v14 = vadd.f32 1.0, %v2934_v36  ;;  %v1093_v4 = vmul.f32 1.442695, %v1035_v37  ;;  %v1237_v10 = vpack.c.bf16 %v4019_v33, %v4013_v38  ;;  %v3270_v36 = vld [vmem:[%s3662_s16 + $0x68] sm:$0xff] }
 0x2aa   : > { %v2938_v29 = vpop.eup %2937  ;;  %v1122_v11 = vadd.f32 1.0, %v2936_v45  ;;  %v1036_v17 = vsub.f32 0.0, %v4028_v44  ;;  %v4038_v50 = vadd.f32 %v3267_v56, %v1179_v12  ;;  %v1089_v58 = vmul.f32 1.442695, %v1033_v31 }
 0x2ab   : > { %v2940_v54 = vpop.eup %2939  ;;  %2957 = vrcp.f32 %v1124_v14  ;;  %v1034_v0 = vsub.f32 0.0, %v4032_v25  ;;  %v2549_v59 = vpop.f32.mrb[28].mxu1  ;;  %2575 = vmatprep.mubr.bf16.mxu0 %v1237_v10  ;;  %v4046_v12 = vadd.f32 %v3268_v16, %v1180_v5  ;;  %v1183_v18 = vmul.f32 %v2938_v29, %v3923_v43 }
 0x2ac   : > { %v2942_v3 = vpop.eup %2941  ;;  %v1181_v30 = vmul.f32 %v2940_v54, %v3926_v63  ;;  %2959 = vrcp.f32 %v1122_v11  ;;  %v1095_v46 = vmul.f32 1.442695, %v1036_v17  ;;  %v4043_v61 = vadd.f32 %v2549_v59, %v3872_v2  ;;  %v994_v1 = vpop.f32.mrb[29].mxu1 }
 0x2ad   : > { %v2944_v6 = vpop.eup %2943  ;;  %2961 = vpow2.f32 %v1093_v4  ;;  %v1091_v19 = vmul.f32 1.442695, %v1034_v0  ;;  %v2550_v24 = vpop.f32.mrb[30].mxu1  ;;  %v1184_v63 = vmul.f32 %v2942_v3, %v3930_v9  ;;  %v4056_v43 = vadd.f32 %v3872_v2, %v994_v1  ;;  %v3272_v1 = vld [vmem:[%s3662_s16 + $0x70] sm:$0xff] }
 0x2ae   : > { %v2946_v35 = vpop.eup %2945  ;;  %v1182_v48 = vmul.f32 %v2944_v6, %v3934_v22  ;;  %2963 = vpow2.f32 %v1089_v58  ;;  %v1039_v41 = vsub.f32 0.0, %v4043_v61  ;;  %v997_v23 = vpop.f32.mrb[31].mxu1  ;;  %v4053_v51 = vadd.f32 %v3269_v26, %v1181_v30  ;;  %v3271_v58 = vld [vmem:[%s3662_s16 + $0x78] sm:$0xff] }
 0x2af   : > { %v2948_v28 = vpop.eup %2947  ;;  %v1127_v5 = vadd.f32 1.0, %v2946_v35  ;;  %2965 = vpow2.f32 %v1095_v46  ;;  %v1037_v14 = vsub.f32 0.0, %v4056_v43  ;;  %v1238_v31 = vpack.c.bf16 %v4046_v12, %v4038_v50 }
 0x2b0   : > { %v2950_v53 = vpop.eup %2949  ;;  %v4059_v37 = vadd.f32 %v3270_v36, %v1182_v48  ;;  %v1125_v9 = vadd.f32 1.0, %v2948_v28  ;;  %2967 = vpow2.f32 %v1091_v19  ;;  %v1101_v22 = vmul.f32 1.442695, %v1039_v41 }
 0x2b1   : > { %v2952_v21 = vpop.eup %2951  ;;  %2969 = vrcp.f32 %v1127_v5  ;;  %v1128_v45 = vadd.f32 1.0, %v2950_v53  ;;  %v4065_v4 = vadd.f32 %v2550_v24, %v3872_v2  ;;  %v4068_v17 = vadd.f32 %v3872_v2, %v997_v23  ;;  %2576 = vmatmul.mubr.bf16.gmra.mrb[40].mxu0 %v1238_v31  ;;  %v3273_v23 = vld [vmem:[%s3662_s16 + $0x80] sm:$0xff] }
 0x2b2   : > { %v2954_v29 = vpop.eup %2953  ;;  %2971 = vrcp.f32 %v1125_v9  ;;  %v1126_v11 = vadd.f32 1.0, %v2952_v21  ;;  %v1097_v54 = vmul.f32 1.442695, %v1037_v14  ;;  %v1239_v56 = vpack.c.bf16 %v4059_v37, %v4053_v51  ;;  %v3275_v14 = vld [vmem:[%s3662_s16 + $0x98] sm:$0xff] }
 0x2b3   : > { %v2956_v10 = vpop.eup %2955  ;;  %2973 = vrcp.f32 %v1128_v45  ;;  %v4073_v0 = vadd.f32 %v3271_v58, %v1184_v63  ;;  %v1040_v59 = vsub.f32 0.0, %v4065_v4  ;;  %v1038_v3 = vsub.f32 0.0, %v4068_v17 }
 0x2b4   : > { %2975 = vrcp.f32 %v1126_v11  ;;  %v1185_v2 = vmul.f32 %v2956_v10, %v3952_v7  ;;  %2579 = vmatprep.mubr.bf16.mxu0 %v1239_v56  ;;  %v4079_v6 = vadd.f32 %v3272_v1, %v1183_v18  ;;  %v3274_v18 = vld [vmem:[%s3662_s16 + $0x88] sm:$0xff]  ;;  %v3276_v10 = vld [vmem:[%s3662_s16 + $0x90] sm:$0xff] }
 0x2b5   : > { %v2958_v30 = vpop.eup %2957  ;;  %2977 = vpow2.f32 %v1101_v22  ;;  %v1103_v16 = vmul.f32 1.442695, %v1040_v59  ;;  %v1099_v35 = vmul.f32 1.442695, %v1038_v3  ;;  %v3278_v1 = vld [vmem:[%s3662_s16 + $0xa8] sm:$0xff] }
 0x2b6   : > { %v2960_v46 = vpop.eup %2959  ;;  %2979 = vpow2.f32 %v1097_v54  ;;  %v1188_v48 = vmul.f32 %v2958_v30, %v3963_v34  ;;  %v1240_v7 = vpack.c.bf16 %v4073_v0, %v4079_v6  ;;  %v4086_v28 = vadd.f32 %v3273_v23, %v1185_v2  ;;  %v3277_v2 = vld [vmem:[%s3662_s16 + $0xa0] sm:$0xff] }
 0x2b7   : > { %v2962_v19 = vpop.eup %2961  ;;  %v1186_v24 = vmul.f32 %v2960_v46, %v3966_v42  ;;  %2981 = vpow2.f32 %v1103_v16  ;;  %v1187_v42 = vmul.f32 %v2954_v29, %v3946_v62 }
 0x2b8   : > { %v2964_v63 = vpop.eup %2963  ;;  %2983 = vpow2.f32 %v1099_v35  ;;  %v1131_v36 = vadd.f32 1.0, %v2962_v19  ;;  %v4095_v31 = vadd.f32 %v3275_v14, %v1188_v48  ;;  %v3282_v14 = vld [vmem:[%s3662_s16 + $0xc8] sm:$0xff] }
 0x2b9   : > { %v2966_v41 = vpop.eup %2965  ;;  %v4089_v26 = vadd.f32 %v3274_v18, %v1186_v24  ;;  %v1129_v5 = vadd.f32 1.0, %v2964_v63  ;;  %2580 = vmatmul.mubr.bf16.gmra.mrb[44].mxu0 %v1240_v7  ;;  %v4099_v54 = vadd.f32 %v3276_v10, %v1187_v42 }
 0x2ba   : > { %v2968_v53 = vpop.eup %2967  ;;  %v1132_v34 = vadd.f32 1.0, %v2966_v41 }
 0x2bb   : > { %v2970_v9 = vpop.eup %2969  ;;  %2985 = vrcp.f32 %v1129_v5  ;;  %v1130_v22 = vadd.f32 1.0, %v2968_v53  ;;  %v1241_v21 = vpack.c.bf16 %v4089_v26, %v4086_v28  ;;  %v1242_v30 = vpack.c.bf16 %v4095_v31, %v4099_v54  ;;  %v3280_v53 = vld [vmem:[%s3662_s16 + $0xb0] sm:$0xff] }
 0x2bc   : > { %v2972_v45 = vpop.eup %2971  ;;  %2987 = vrcp.f32 %v1132_v34  ;;  %v1191_v63 = vmul.f32 %v2970_v9, %v3979_v32 }
 0x2bd   : > { %v2974_v11 = vpop.eup %2973  ;;  %v1189_v62 = vmul.f32 %v2972_v45, %v3985_v40  ;;  %2989 = vrcp.f32 %v1130_v22  ;;  %2583 = vmatprep.mubr.bf16.mxu0 %v1241_v21  ;;  %v3281_v21 = vld [vmem:[%s3662_s16 + $0xc0] sm:$0xff] }
 0x2be   : > { %v2976_v29 = vpop.eup %2975  ;;  %2991 = vrcp.f32 %v1131_v36  ;;  %v1192_v40 = vmul.f32 %v2974_v11, %v3993_v8  ;;  %v3279_v8 = vld [vmem:[%s3662_s16 + $0xb8] sm:$0xff]  ;;  %v4119_v42 = vadd.f32 %v3280_v53, %v1191_v63 }
 0x2bf   : > { %v2978_v56 = vpop.eup %2977  ;;  %v1190_v58 = vmul.f32 %v2976_v29, %v3996_v15  ;;  %v4105_v46 = vadd.f32 %v3277_v2, %v1189_v62  ;;  %v3283_v29 = vld [vmem:[%s3662_s16 + $0xd8] sm:$0xff] }
 0x2c0   : > { %v2980_v59 = vpop.eup %2979  ;;  %v1135_v3 = vadd.f32 1.0, %v2978_v56  ;;  %v4115_v23 = vadd.f32 %v3279_v8, %v1192_v40  ;;  %4659 = vst [vmem:[#allocation16_spill] sm:$0xff] %v4119_v42  ;;  %v2743_v8 = vld [vmem:[#allocation7 + $0x70] sm:$0xff]  }
 0x2c1   : > { %4656 = vst [vmem:[#allocation13_spill] sm:$0xff] %v4105_v46  ;;  %v4109_v16 = vadd.f32 %v3278_v1, %v1190_v58  ;;  %v1133_v19 = vadd.f32 1.0, %v2980_v59  ;;  %v2982_v24 = vpop.eup %2981  ;;  %2584 = vmatmul.mubr.bf16.gmra.mrb[48].mxu0 %v1242_v30  ;;  %v3284_v58 = vld [vmem:[%s3662_s16 + $0xd0] sm:$0xff] }
 0x2c2   : > { %v2984_v35 = vpop.eup %2983  ;;  %v1136_v15 = vadd.f32 1.0, %v2982_v24  ;;  %4658 = vst [vmem:[#allocation15_spill] sm:$0xff] %v4115_v23  ;;  %v1244_v22 = vpack.c.bf16 %v4115_v23, %v4119_v42 }
 0x2c3   : > { %4657 = vst [vmem:[#allocation14_spill] sm:$0xff] %v4109_v16  ;;  %2993 = vrcp.f32 %v1133_v19  ;;  %v1243_v48 = vpack.c.bf16 %v4109_v16, %v4105_v46  ;;  %v1134_v7 = vadd.f32 1.0, %v2984_v35  ;;  %v3285_v19 = vld [vmem:[%s3662_s16 + $0xe0] sm:$0xff]  ;;  %v3286_v35 = vld [vmem:[%s3662_s16 + $0xe8] sm:$0xff] }
 0x2c4   : > { %2995 = vrcp.f32 %v1135_v3 }
 0x2c5   : > { %v2986_v41 = vpop.eup %2985  ;;  %2997 = vrcp.f32 %v1136_v15  ;;  %2587 = vmatprep.mubr.bf16.mxu0 %v1243_v48  ;;  %v3287_v15 = vld [vmem:[%s3662_s16 + $0xf8] sm:$0xff] }
 0x2c6   : > { %v2988_v18 = vpop.eup %2987  ;;  %v1193_v32 = vmul.f32 %v2986_v41, %v4022_v57  ;;  %2999 = vrcp.f32 %v1134_v7  ;;  %v2741_v7 = vld [vmem:[#allocation7 + $0x60] sm:$0xff]   ;;  %v2742_v41 = vld [vmem:[#allocation7 + $0x68] sm:$0xff]  }
 0x2c7   : > { %v2990_v5 = vpop.eup %2989  ;;  %v1196_v9 = vmul.f32 %v2988_v18, %v4028_v44  ;;  %2607 = vmatprep.subr.bf16.mxu1 %v2741_v7  ;;  %v2744_v18 = vld [vmem:[#allocation7 + $0x78] sm:$0xff]  }
 0x2c8   : > { %v2992_v36 = vpop.eup %2991  ;;  %v1194_v34 = vmul.f32 %v2990_v5, %v4032_v25  ;;  %v4126_v45 = vadd.f32 %v3281_v21, %v1193_v32  ;;  %2608 = vmatpush3.bf16.msra.mxu1 %v2741_v7  ;;  %v4165_v32 = vld [vmem:[%s4625_s2 + $0x1] ss:$0 sm:$0xff] }
 0x2c9   : > { %v1195_v11 = vmul.f32 %v2992_v36, %v4016_v20  ;;  %2588 = vmatmul.mubr.bf16.gmra.mrb[52].mxu0 %v1244_v22  ;;  %v4135_v44 = vadd.f32 %v3283_v29, %v1196_v9  ;;  %2609 = vmatprep.subr.bf16.mxu1 %v2742_v41 }
 0x2ca   : > { %4660 = vst [vmem:[#allocation17_spill] sm:$0xff] %v4126_v45  ;;  %v4129_v57 = vadd.f32 %v3282_v14, %v1194_v34 }
 0x2cb   : > { %4662 = vst [vmem:[#allocation19_spill] sm:$0xff] %v4135_v44  ;;  %v4138_v59 = vadd.f32 %v3284_v58, %v1195_v11 }
 0x2cc   : > { %4661 = vst [vmem:[#allocation18_spill] sm:$0xff] %v4129_v57  ;;  %v1245_v62 = vpack.c.bf16 %v4129_v57, %v4126_v45  ;;  %2610 = vmatpush3.bf16.msra.mxu1 %v2742_v41 }
 0x2cd   : > { %v2994_v25 = vpop.eup %2993  ;;  %4663 = vst [vmem:[#allocation20_spill] sm:$0xff] %v4138_v59  ;;  %v1246_v40 = vpack.c.bf16 %v4135_v44, %v4138_v59  ;;  %2611 = vmatprep.subr.bf16.mxu1 %v2743_v8 }
 0x2ce   : > { %v2996_v10 = vpop.eup %2995  ;;  %2591 = vmatprep.mubr.bf16.mxu0 %v1245_v62  ;;  %v1197_v20 = vmul.f32 %v2994_v25, %v4056_v43 }
 0x2cf   : > { %v2998_v56 = vpop.eup %2997  ;;  %v1199_v1 = vmul.f32 %v2996_v10, %v4043_v61 }
 0x2d0   : > { %v3000_v3 = vpop.eup %2999  ;;  %v1200_v30 = vmul.f32 %v2998_v56, %v4065_v4  ;;  %v4147_v24 = vadd.f32 %v3285_v19, %v1197_v20  ;;  %v3288_v4 = vld [vmem:[%s3662_s16 + $0xf0] sm:$0xff]  ;;  %2612 = vmatpush3.bf16.msra.mxu1 %v2743_v8 }
 0x2d1   : > { %v1198_v2 = vmul.f32 %v3000_v3, %v4068_v17  ;;  %2592 = vmatmul.mubr.bf16.gmra.mrb[56].mxu0 %v1246_v40  ;;  %v4158_v17 = vadd.f32 %v3288_v4, %v1199_v1  ;;  %2613 = vmatprep.subr.bf16.mxu1 %v2744_v18 }
 0x2d2   : > { %4664 = vst [vmem:[#allocation21_spill] sm:$0xff] %v4147_v24  ;;  %v4153_v48 = vadd.f32 %v3287_v15, %v1200_v30 }
 0x2d3   : > { %v4150_v63 = vadd.f32 %v3286_v35, %v1198_v2  ;;  %4667 = vst [vmem:[#allocation24_spill] sm:$0xff] %v4158_v17 }
 0x2d4   : > { %4666 = vst [vmem:[#allocation23_spill] sm:$0xff] %v4153_v48  ;;  %v1248_v61 = vpack.c.bf16 %v4153_v48, %v4158_v17  ;;  %2614 = vmatpush3.bf16.msra.mxu1 %v2744_v18 }
 0x2d5   : > { %4665 = vst [vmem:[#allocation22_spill] sm:$0xff] %v4150_v63  ;;  %v1247_v43 = vpack.c.bf16 %v4150_v63, %v4147_v24 }
 0x2d7   : > { %2595 = vmatprep.mubr.bf16.mxu0 %v1247_v43 }
 0x2d9   : > { %2596 = vmatmul.mubr.bf16.gmra.mrb[60].mxu0 %v1248_v61 }
 0x36f   : > { %v2569_v5 = vpop.f32.mrb[32].mxu0 }
 0x370   : > { %v4168_v53 = vadd.f32 %v2569_v5, %v4165_v32  ;;  %v1356_v36 = vpop.f32.mrb[33].mxu0 }
 0x371   : > { %v4171_v34 = vadd.f32 %v4165_v32, %v1356_v36  ;;  %v2570_v9 = vpop.f32.mrb[34].mxu0 }
 0x372   : > { %v1485_v22 = vsub.f32 0.0, %v4168_v53  ;;  %v4175_v21 = vadd.f32 %v2570_v9, %v4165_v32  ;;  %v1359_v14 = vpop.f32.mrb[35].mxu0 }
 0x373   : > { %v1483_v11 = vsub.f32 0.0, %v4171_v34  ;;  %v4179_v62 = vadd.f32 %v4165_v32, %v1359_v14 }
 0x374   : > { %v1519_v25 = vmul.f32 1.442695, %v1485_v22  ;;  %v1486_v29 = vsub.f32 0.0, %v4175_v21 }
 0x375   : > { %v1515_v10 = vmul.f32 1.442695, %v1483_v11  ;;  %v1484_v56 = vsub.f32 0.0, %v4179_v62 }
 0x376   : > { %3001 = vpow2.f32 %v1519_v25  ;;  %v1521_v58 = vmul.f32 1.442695, %v1486_v29 }
 0x377   : > { %3003 = vpow2.f32 %v1515_v10  ;;  %v1517_v20 = vmul.f32 1.442695, %v1484_v56 }
 0x378   : > { %3005 = vpow2.f32 %v1521_v58 }
 0x379   : > { %3007 = vpow2.f32 %v1517_v20 }
 0x37b   : > { %v2573_v3 = vpop.f32.mrb[36].mxu0 }
 0x37c   : > { %v4184_v30 = vadd.f32 %v2573_v3, %v4165_v32  ;;  %v1372_v2 = vpop.f32.mrb[37].mxu0 }
 0x37d   : > { %v4187_v40 = vadd.f32 %v4165_v32, %v1372_v2  ;;  %v2574_v1 = vpop.f32.mrb[38].mxu0 }
 0x37e   : > { %v1489_v35 = vsub.f32 0.0, %v4184_v30  ;;  %v4191_v15 = vadd.f32 %v2574_v1, %v4165_v32  ;;  %v1375_v43 = vpop.f32.mrb[39].mxu0 }
 0x37f   : > { %v1487_v7 = vsub.f32 0.0, %v4187_v40  ;;  %v4195_v41 = vadd.f32 %v4165_v32, %v1375_v43 }
 0x380   : > { %v3002_v19 = vpop.eup %3001  ;;  %v1490_v5 = vsub.f32 0.0, %v4191_v15  ;;  %v1527_v22 = vmul.f32 1.442695, %v1489_v35 }
 0x381   : > { %v3004_v4 = vpop.eup %3003  ;;  %v1581_v61 = vadd.f32 1.0, %v3002_v19  ;;  %v1488_v14 = vsub.f32 0.0, %v4195_v41  ;;  %v1523_v25 = vmul.f32 1.442695, %v1487_v7 }
 0x382   : > { %v3006_v8 = vpop.eup %3005  ;;  %v1579_v18 = vadd.f32 1.0, %v3004_v4  ;;  %v1529_v29 = vmul.f32 1.442695, %v1490_v5 }
 0x383   : > { %v3008_v36 = vpop.eup %3007  ;;  %3009 = vrcp.f32 %v1581_v61  ;;  %v1582_v9 = vadd.f32 1.0, %v3006_v8  ;;  %v1525_v10 = vmul.f32 1.442695, %v1488_v14 }
 0x384   : > { %3011 = vrcp.f32 %v1579_v18  ;;  %v1580_v11 = vadd.f32 1.0, %v3008_v36  ;;  %v2577_v56 = vpop.f32.mrb[40].mxu0 }
 0x385   : > { %3013 = vrcp.f32 %v1582_v9  ;;  %v4200_v58 = vadd.f32 %v2577_v56, %v4165_v32  ;;  %v1388_v20 = vpop.f32.mrb[41].mxu0 }
 0x386   : > { %3015 = vrcp.f32 %v1580_v11  ;;  %v4203_v3 = vadd.f32 %v4165_v32, %v1388_v20  ;;  %v2578_v2 = vpop.f32.mrb[42].mxu0 }
 0x387   : > { %3017 = vpow2.f32 %v1527_v22  ;;  %v1493_v1 = vsub.f32 0.0, %v4200_v58  ;;  %v4207_v19 = vadd.f32 %v2578_v2, %v4165_v32  ;;  %v1391_v35 = vpop.f32.mrb[43].mxu0 }
 0x388   : > { %3019 = vpow2.f32 %v1523_v25  ;;  %v1491_v43 = vsub.f32 0.0, %v4203_v3  ;;  %v4211_v4 = vadd.f32 %v4165_v32, %v1391_v35 }
 0x389   : > { %3021 = vpow2.f32 %v1529_v29  ;;  %v1535_v61 = vmul.f32 1.442695, %v1493_v1  ;;  %v1494_v7 = vsub.f32 0.0, %v4207_v19 }
 0x38a   : > { %3023 = vpow2.f32 %v1525_v10  ;;  %v1531_v8 = vmul.f32 1.442695, %v1491_v43  ;;  %v1492_v18 = vsub.f32 0.0, %v4211_v4 }
 0x38b   : > { %3025 = vpow2.f32 %v1535_v61  ;;  %v1537_v36 = vmul.f32 1.442695, %v1494_v7 }
 0x38c   : > { %3027 = vpow2.f32 %v1531_v8  ;;  %v1533_v22 = vmul.f32 1.442695, %v1492_v18  ;;  %v2581_v14 = vpop.f32.mrb[44].mxu0 }
 0x38d   : > { %v3010_v5 = vpop.eup %3009  ;;  %3029 = vpow2.f32 %v1537_v36  ;;  %v4216_v25 = vadd.f32 %v2581_v14, %v4165_v32  ;;  %v1404_v29 = vpop.f32.mrb[45].mxu0 }
 0x38e   : > { %v3012_v9 = vpop.eup %3011  ;;  %v1645_v56 = vmul.f32 %v3010_v5, %v4168_v53  ;;  %3031 = vpow2.f32 %v1533_v22  ;;  %v4221_v2 = vadd.f32 %v4165_v32, %v1404_v29  ;;  %v2582_v1 = vpop.f32.mrb[46].mxu0 }
 0x38f   : > { %v3014_v11 = vpop.eup %3013  ;;  %v1643_v43 = vmul.f32 %v3012_v9, %v4171_v34  ;;  %v1497_v7 = vsub.f32 0.0, %v4216_v25  ;;  %v4227_v8 = vadd.f32 %v2582_v1, %v4165_v32  ;;  %v1407_v18 = vpop.f32.mrb[47].mxu0 }
 0x390   : > { %v3016_v10 = vpop.eup %3015  ;;  %v1646_v20 = vmul.f32 %v3014_v11, %v4175_v21  ;;  %v1495_v21 = vsub.f32 0.0, %v4221_v2  ;;  %v4231_v11 = vadd.f32 %v4165_v32, %v1407_v18 }
 0x391   : > { %v3018_v35 = vpop.eup %3017  ;;  %v1644_v61 = vmul.f32 %v3016_v10, %v4179_v62  ;;  %v1543_v9 = vmul.f32 1.442695, %v1497_v7  ;;  %v1498_v10 = vsub.f32 0.0, %v4227_v8 }
 0x392   : > { %v3020_v36 = vpop.eup %3019  ;;  %v1676_v53 = vpack.c.bf16 %v1646_v20, %v1645_v56  ;;  %v1585_v5 = vadd.f32 1.0, %v3018_v35  ;;  %v1539_v63 = vmul.f32 1.442695, %v1495_v21  ;;  %v1496_v35 = vsub.f32 0.0, %v4231_v11 }
 0x393   : > { %v3022_v22 = vpop.eup %3021  ;;  %v1583_v14 = vadd.f32 1.0, %v3020_v36  ;;  %v1675_v29 = vpack.c.bf16 %v1644_v61, %v1643_v43  ;;  %v1545_v7 = vmul.f32 1.442695, %v1498_v10 }
 0x394   : > { %v3024_v34 = vpop.eup %3023  ;;  %3033 = vrcp.f32 %v1585_v5  ;;  %v1586_v62 = vadd.f32 1.0, %v3022_v22  ;;  %v2585_v56 = vpop.f32.mrb[48].mxu0 }
 0x395   : > { %3035 = vrcp.f32 %v1583_v14  ;;  %v1584_v1 = vadd.f32 1.0, %v3024_v34  ;;  %2615 = vmatprep.mubr.bf16.mxu1 %v1675_v29  ;;  %v3026_v20 = vpop.eup %3025  ;;  %v4236_v18 = vadd.f32 %v2585_v56, %v4165_v32  ;;  %v1420_v43 = vpop.f32.mrb[49].mxu0 }
 0x396   : > { %3037 = vrcp.f32 %v1586_v62  ;;  %2616 = vmatmul.mubr.bf16.vlgmr.msra.gmra.mrb[32].mxu1 %v1676_v53  ;;  %v3028_v61 = vpop.eup %3027  ;;  %v1589_v36 = vadd.f32 1.0, %v3026_v20  ;;  %v4239_v5 = vadd.f32 %v4165_v32, %v1420_v43  ;;  %v2586_v21 = vpop.f32.mrb[50].mxu0  ;;  %v1541_v20 = vmul.f32 1.442695, %v1496_v35 }
 0x397   : > { %3039 = vrcp.f32 %v1584_v1  ;;  %v3030_v22 = vpop.eup %3029  ;;  %v1587_v14 = vadd.f32 1.0, %v3028_v61  ;;  %v1501_v53 = vsub.f32 0.0, %v4236_v18  ;;  %v4243_v29 = vadd.f32 %v2586_v21, %v4165_v32  ;;  %v1423_v34 = vpop.f32.mrb[51].mxu0 }
 0x398   : > { %3041 = vpow2.f32 %v1543_v9  ;;  %v3032_v62 = vpop.eup %3031  ;;  %v1590_v1 = vadd.f32 1.0, %v3030_v22  ;;  %v1499_v56 = vsub.f32 0.0, %v4239_v5  ;;  %v4247_v9 = vadd.f32 %v4165_v32, %v1423_v34 }
 0x399   : > { %3043 = vpow2.f32 %v1539_v63  ;;  %v1588_v10 = vadd.f32 1.0, %v3032_v62  ;;  %v1502_v43 = vsub.f32 0.0, %v4243_v29  ;;  %v1551_v63 = vmul.f32 1.442695, %v1501_v53 }
 0x39a   : > { %3045 = vrcp.f32 %v1589_v36  ;;  %v1500_v61 = vsub.f32 0.0, %v4247_v9  ;;  %v1547_v21 = vmul.f32 1.442695, %v1499_v56 }
 0x39b   : > { %3047 = vrcp.f32 %v1587_v14  ;;  %v1553_v36 = vmul.f32 1.442695, %v1502_v43 }
 0x39c   : > { %3049 = vrcp.f32 %v1590_v1  ;;  %v2589_v22 = vpop.f32.mrb[52].mxu0  ;;  %v1549_v17 = vmul.f32 1.442695, %v1500_v61 }
 0x39d   : > { %3051 = vrcp.f32 %v1588_v10  ;;  %v4252_v34 = vadd.f32 %v2589_v22, %v4165_v32  ;;  %v1436_v14 = vpop.f32.mrb[53].mxu0 }
 0x39e   : > { %v3034_v48 = vpop.eup %3033  ;;  %3053 = vpow2.f32 %v1545_v7  ;;  %v4257_v1 = vadd.f32 %v4165_v32, %v1436_v14  ;;  %v2590_v56 = vpop.f32.mrb[54].mxu0 }
 0x39f   : > { %v3036_v24 = vpop.eup %3035  ;;  %3055 = vpow2.f32 %v1541_v20  ;;  %v1649_v62 = vmul.f32 %v3034_v48, %v4184_v30  ;;  %v1505_v20 = vsub.f32 0.0, %v4252_v34  ;;  %v4262_v43 = vadd.f32 %v2590_v56, %v4165_v32  ;;  %v1439_v61 = vpop.f32.mrb[55].mxu0 }
 0x3a0   : > { %v3038_v35 = vpop.eup %3037  ;;  %v1647_v53 = vmul.f32 %v3036_v24, %v4187_v40  ;;  %3057 = vpow2.f32 %v1551_v63  ;;  %v1503_v24 = vsub.f32 0.0, %v4257_v1  ;;  %v4267_v30 = vadd.f32 %v4165_v32, %v1439_v61 }
 0x3a1   : > { %v3040_v7 = vpop.eup %3039  ;;  %v1650_v10 = vmul.f32 %v3038_v35, %v4191_v15  ;;  %3059 = vpow2.f32 %v1547_v21  ;;  %v1559_v15 = vmul.f32 1.442695, %v1505_v20  ;;  %v1506_v21 = vsub.f32 0.0, %v4262_v43 }
 0x3a2   : > { %v3042_v22 = vpop.eup %3041  ;;  %v1648_v48 = vmul.f32 %v3040_v7, %v4195_v41  ;;  %3061 = vpow2.f32 %v1553_v36  ;;  %v1555_v56 = vmul.f32 1.442695, %v1503_v24  ;;  %v1504_v57 = vsub.f32 0.0, %v4267_v30 }
 0x3a3   : > { %v3044_v40 = vpop.eup %3043  ;;  %v1593_v63 = vadd.f32 1.0, %v3042_v22  ;;  %3063 = vpow2.f32 %v1549_v17  ;;  %v1561_v41 = vmul.f32 1.442695, %v1506_v21  ;;  %v1678_v36 = vpack.c.bf16 %v1650_v10, %v1649_v62 }
 0x3a4   : > { %v3046_v14 = vpop.eup %3045  ;;  %v1591_v35 = vadd.f32 1.0, %v3044_v40  ;;  %v1677_v44 = vpack.c.bf16 %v1648_v48, %v1647_v53  ;;  %v1557_v61 = vmul.f32 1.442695, %v1504_v57  ;;  %v2593_v59 = vpop.f32.mrb[56].mxu0 }
 0x3a5   : > { %v3048_v45 = vpop.eup %3047  ;;  %3065 = vrcp.f32 %v1593_v63  ;;  %v4272_v17 = vadd.f32 %v2593_v59, %v4165_v32  ;;  %v1452_v20 = vpop.f32.mrb[57].mxu0 }
 0x3a6   : > { %v3050_v7 = vpop.eup %3049  ;;  %3067 = vrcp.f32 %v1591_v35  ;;  %2619 = vmatprep.mubr.bf16.mxu1 %v1677_v44  ;;  %v4276_v53 = vadd.f32 %v4165_v32, %v1452_v20  ;;  %v2594_v62 = vpop.f32.mrb[58].mxu0  ;;  %v1653_v20 = vmul.f32 %v3046_v14, %v4200_v58 }
 0x3a7   : > { %v3052_v22 = vpop.eup %3051  ;;  %3069 = vpow2.f32 %v1559_v15  ;;  %2620 = vmatmul.mubr.bf16.gmra.mrb[36].mxu1 %v1678_v36  ;;  %v1509_v57 = vsub.f32 0.0, %v4272_v17  ;;  %v4280_v44 = vadd.f32 %v2594_v62, %v4165_v32  ;;  %v1455_v63 = vpop.f32.mrb[59].mxu0  ;;  %v1654_v15 = vmul.f32 %v3050_v7, %v4207_v19 }
 0x3a8   : > { %v3054_v24 = vpop.eup %3053  ;;  %v1652_v40 = vmul.f32 %v3052_v22, %v4211_v4  ;;  %3071 = vpow2.f32 %v1555_v56  ;;  %v1507_v4 = vsub.f32 0.0, %v4276_v53  ;;  %v1651_v56 = vmul.f32 %v3048_v45, %v4203_v3 }
 0x3a9   : > { %v3056_v10 = vpop.eup %3055  ;;  %v1594_v48 = vadd.f32 1.0, %v3054_v24  ;;  %3073 = vpow2.f32 %v1561_v41  ;;  %v1510_v41 = vsub.f32 0.0, %v4280_v44  ;;  %v4288_v62 = vadd.f32 %v4165_v32, %v1455_v63 }
 0x3aa   : > { %v3058_v59 = vpop.eup %3057  ;;  %v1592_v21 = vadd.f32 1.0, %v3056_v10  ;;  %3075 = vpow2.f32 %v1557_v61  ;;  %v1567_v61 = vmul.f32 1.442695, %v1509_v57  ;;  %v1679_v10 = vpack.c.bf16 %v1652_v40, %v1651_v56 }
 0x3ab   : > { %v3060_v35 = vpop.eup %3059  ;;  %3077 = vrcp.f32 %v1594_v48  ;;  %v1597_v36 = vadd.f32 1.0, %v3058_v59  ;;  %v1563_v45 = vmul.f32 1.442695, %v1507_v4  ;;  %v1680_v3 = vpack.c.bf16 %v1654_v15, %v1653_v20 }
 0x3ac   : > { %v3062_v22 = vpop.eup %3061  ;;  %3079 = vrcp.f32 %v1592_v21  ;;  %v1595_v24 = vadd.f32 1.0, %v3060_v35  ;;  %v2597_v48 = vpop.f32.mrb[60].mxu0  ;;  %v1569_v23 = vmul.f32 1.442695, %v1510_v41  ;;  %2623 = vmatprep.mubr.bf16.mxu1 %v1679_v10  ;;  %v1508_v21 = vsub.f32 0.0, %v4288_v62 }
 0x3ad   : > { %v3064_v19 = vpop.eup %3063  ;;  %3081 = vrcp.f32 %v1597_v36  ;;  %v1598_v7 = vadd.f32 1.0, %v3062_v22  ;;  %v4291_v58 = vadd.f32 %v2597_v48, %v4165_v32  ;;  %v1468_v14 = vpop.f32.mrb[61].mxu0 }
 0x3ae   : > { %3083 = vrcp.f32 %v1595_v24  ;;  %v1596_v16 = vadd.f32 1.0, %v3064_v19  ;;  %v4295_v40 = vadd.f32 %v4165_v32, %v1468_v14  ;;  %v2598_v57 = vpop.f32.mrb[62].mxu0  ;;  %v1565_v10 = vmul.f32 1.442695, %v1508_v21 }
 0x3af   : > { %v3066_v59 = vpop.eup %3065  ;;  %3085 = vrcp.f32 %v1598_v7  ;;  %2624 = vmatmul.mubr.bf16.gmra.mrb[40].mxu1 %v1680_v3  ;;  %v1513_v15 = vsub.f32 0.0, %v4291_v58  ;;  %v4299_v35 = vadd.f32 %v2598_v57, %v4165_v32  ;;  %v1471_v56 = vpop.f32.mrb[63].mxu0 }
 0x3b0   : > { %v3068_v63 = vpop.eup %3067  ;;  %3087 = vrcp.f32 %v1596_v16  ;;  %v1511_v16 = vsub.f32 0.0, %v4295_v40  ;;  %v4303_v22 = vadd.f32 %v4165_v32, %v1471_v56 }
 0x3b1   : > { %v3070_v4 = vpop.eup %3069  ;;  %3089 = vpow2.f32 %v1567_v61  ;;  %v1514_v19 = vsub.f32 0.0, %v4299_v35 }
 0x3b2   : > { %v3072_v36 = vpop.eup %3071  ;;  %v1601_v41 = vadd.f32 1.0, %v3070_v4  ;;  %3091 = vpow2.f32 %v1563_v45  ;;  %v1512_v3 = vsub.f32 0.0, %v4303_v22  ;;  %v1575_v45 = vmul.f32 1.442695, %v1513_v15 }
 0x3b3   : > { %v3074_v20 = vpop.eup %3073  ;;  %v1599_v24 = vadd.f32 1.0, %v3072_v36  ;;  %3093 = vpow2.f32 %v1569_v23  ;;  %v1657_v4 = vmul.f32 %v3066_v59, %v4216_v25  ;;  %v1571_v56 = vmul.f32 1.442695, %v1511_v16 }
 0x3b4   : > { %v3076_v7 = vpop.eup %3075  ;;  %3095 = vrcp.f32 %v1601_v41  ;;  %v1602_v61 = vadd.f32 1.0, %v3074_v20  ;;  %v1655_v36 = vmul.f32 %v3068_v63, %v4221_v2  ;;  %v1577_v21 = vmul.f32 1.442695, %v1514_v19 }
 0x3b5   : > { %v3078_v48 = vpop.eup %3077  ;;  %3097 = vrcp.f32 %v1599_v24  ;;  %v1600_v14 = vadd.f32 1.0, %v3076_v7  ;;  %v1573_v46 = vmul.f32 1.442695, %v1512_v3 }
 0x3b6   : > { %v3080_v57 = vpop.eup %3079  ;;  %v1658_v32 = vmul.f32 %v3078_v48, %v4227_v8  ;;  %3099 = vrcp.f32 %v1602_v61 }
 0x3b7   : > { %v3082_v23 = vpop.eup %3081  ;;  %v1656_v41 = vmul.f32 %v3080_v57, %v4231_v11  ;;  %3101 = vrcp.f32 %v1600_v14 }
 0x3b8   : > { %v3084_v20 = vpop.eup %3083  ;;  %3103 = vpow2.f32 %v1565_v10  ;;  %v1682_v24 = vpack.c.bf16 %v1658_v32, %v1657_v4  ;;  %v1661_v25 = vmul.f32 %v3082_v23, %v4236_v18 }
 0x3b9   : > { %v3086_v7 = vpop.eup %3085  ;;  %3105 = vpow2.f32 %v1575_v45  ;;  %v1681_v15 = vpack.c.bf16 %v1656_v41, %v1655_v36  ;;  %v1659_v2 = vmul.f32 %v3084_v20, %v4239_v5 }
 0x3ba   : > { %v3088_v42 = vpop.eup %3087  ;;  %v1662_v8 = vmul.f32 %v3086_v7, %v4243_v29  ;;  %3107 = vpow2.f32 %v1571_v56 }
 0x3bb   : > { %v3090_v59 = vpop.eup %3089  ;;  %v1660_v11 = vmul.f32 %v3088_v42, %v4247_v9  ;;  %3109 = vpow2.f32 %v1577_v21  ;;  %2627 = vmatprep.mubr.bf16.mxu1 %v1681_v15 }
 0x3bc   : > { %v3092_v63 = vpop.eup %3091  ;;  %v1605_v16 = vadd.f32 1.0, %v3090_v59  ;;  %3111 = vpow2.f32 %v1573_v46  ;;  %2628 = vmatmul.mubr.bf16.gmra.mrb[44].mxu1 %v1682_v24  ;;  %v1684_v19 = vpack.c.bf16 %v1662_v8, %v1661_v25 }
 0x3bd   : > { %v3094_v61 = vpop.eup %3093  ;;  %v1683_v10 = vpack.c.bf16 %v1660_v11, %v1659_v2  ;;  %v1603_v29 = vadd.f32 1.0, %v3092_v63 }
 0x3be   : > { %v3096_v3 = vpop.eup %3095  ;;  %3113 = vrcp.f32 %v1605_v16  ;;  %v1606_v18 = vadd.f32 1.0, %v3094_v61 }
 0x3bf   : > { %v3098_v48 = vpop.eup %3097  ;;  %2631 = vmatprep.mubr.bf16.mxu1 %v1683_v10  ;;  %v1665_v42 = vmul.f32 %v3096_v3, %v4252_v34 }
 0x3c0   : > { %v3100_v14 = vpop.eup %3099  ;;  %3115 = vrcp.f32 %v1606_v18  ;;  %v1663_v46 = vmul.f32 %v3098_v48, %v4257_v1 }
 0x3c1   : > { %v3102_v5 = vpop.eup %3101  ;;  %v1666_v9 = vmul.f32 %v3100_v14, %v4262_v43  ;;  %3117 = vrcp.f32 %v1603_v29 }
 0x3c2   : > { %v3104_v45 = vpop.eup %3103  ;;  %v1664_v57 = vmul.f32 %v3102_v5, %v4267_v30 }
 0x3c3   : > { %v3106_v4 = vpop.eup %3105  ;;  %v1604_v32 = vadd.f32 1.0, %v3104_v45  ;;  %v1686_v56 = vpack.c.bf16 %v1666_v9, %v1665_v42 }
 0x3c4   : > { %v3108_v23 = vpop.eup %3107  ;;  %v1609_v36 = vadd.f32 1.0, %v3106_v4  ;;  %2632 = vmatmul.mubr.bf16.gmra.mrb[48].mxu1 %v1684_v19  ;;  %v1685_v41 = vpack.c.bf16 %v1664_v57, %v1663_v46 }
 0x3c5   : > { %v3110_v21 = vpop.eup %3109  ;;  %3119 = vrcp.f32 %v1604_v32  ;;  %v1607_v20 = vadd.f32 1.0, %v3108_v23 }
 0x3c6   : > { %v3112_v24 = vpop.eup %3111  ;;  %3121 = vrcp.f32 %v1609_v36  ;;  %v1610_v34 = vadd.f32 1.0, %v3110_v21  ;;  %2635 = vmatprep.mubr.bf16.mxu1 %v1685_v41 }
 0x3c7   : > { %3123 = vrcp.f32 %v1607_v20  ;;  %v1608_v43 = vadd.f32 1.0, %v3112_v24 }
 0x3c8   : > { %v3114_v1 = vpop.eup %3113  ;;  %3125 = vrcp.f32 %v1610_v34 }
 0x3c9   : > { %3127 = vrcp.f32 %v1608_v43  ;;  %v1669_v7 = vmul.f32 %v3114_v1, %v4272_v17 }
 0x3ca   : > { %v3116_v30 = vpop.eup %3115 }
 0x3cb   : > { %v1670_v15 = vmul.f32 %v3116_v30, %v4280_v44  ;;  %v3118_v25 = vpop.eup %3117 }
 0x3cc   : > { %2636 = vmatmul.mubr.bf16.gmra.mrb[52].mxu1 %v1686_v56  ;;  %v1667_v11 = vmul.f32 %v3118_v25, %v4276_v53  ;;  %v4330_v53 = vld [vmem:[%s4627_s4 + $0x1] ss:$0 sm:$0xff] }
 0x3cd   : > { %v1688_v8 = vpack.c.bf16 %v1670_v15, %v1669_v7 }
 0x3cf   : > { %v3120_v59 = vpop.eup %3119 }
 0x3d0   : > { %v3122_v2 = vpop.eup %3121  ;;  %v1668_v63 = vmul.f32 %v3120_v59, %v4288_v62 }
 0x3d1   : > { %v3124_v16 = vpop.eup %3123  ;;  %v1673_v3 = vmul.f32 %v3122_v2, %v4291_v58 }
 0x3d2   : > { %v3126_v19 = vpop.eup %3125  ;;  %v1687_v61 = vpack.c.bf16 %v1668_v63, %v1667_v11  ;;  %v1671_v17 = vmul.f32 %v3124_v16, %v4295_v40 }
 0x3d3   : > { %v3128_v10 = vpop.eup %3127  ;;  %v1674_v18 = vmul.f32 %v3126_v19, %v4299_v35 }
 0x3d4   : > { %v1672_v44 = vmul.f32 %v3128_v10, %v4303_v22  ;;  %2639 = vmatprep.mubr.bf16.mxu1 %v1687_v61 }
 0x3d5   : > { %2640 = vmatmul.mubr.bf16.gmra.mrb[56].mxu1 %v1688_v8  ;;  %v1690_v48 = vpack.c.bf16 %v1674_v18, %v1673_v3 }
 0x3d6   : > { %v1689_v29 = vpack.c.bf16 %v1672_v44, %v1671_v17 }
 0x3d8   : > { %2643 = vmatprep.mubr.bf16.mxu1 %v1689_v29 }
 0x3dd   : > { %2644 = vmatmul.mubr.bf16.gmra.mrb[60].mxu1 %v1690_v48 }
 0x469   : > { %v2617_v62 = vpop.f32.mrb[32].mxu1 }
 0x46a   : > { %v4333_v58 = vadd.f32 %v2617_v62, %v4330_v53  ;;  %v1798_v35 = vpop.f32.mrb[33].mxu1 }
 0x46b   : > { %v4336_v40 = vadd.f32 %v4330_v53, %v1798_v35  ;;  %v2618_v22 = vpop.f32.mrb[34].mxu1 }
 0x46c   : > { %v1927_v14 = vsub.f32 0.0, %v4333_v58  ;;  %v4340_v5 = vadd.f32 %v2618_v22, %v4330_v53  ;;  %v1801_v42 = vpop.f32.mrb[35].mxu1 }
 0x46d   : > { %v1925_v9 = vsub.f32 0.0, %v4336_v40  ;;  %v4344_v45 = vadd.f32 %v4330_v53, %v1801_v42 }
 0x46e   : > { %v1961_v46 = vmul.f32 1.442695, %v1927_v14  ;;  %v1928_v57 = vsub.f32 0.0, %v4340_v5 }
 0x46f   : > { %v1957_v4 = vmul.f32 1.442695, %v1925_v9  ;;  %v1926_v32 = vsub.f32 0.0, %v4344_v45 }
 0x470   : > { %3129 = vpow2.f32 %v1961_v46  ;;  %v1963_v56 = vmul.f32 1.442695, %v1928_v57 }
 0x471   : > { %3131 = vpow2.f32 %v1957_v4  ;;  %v1959_v23 = vmul.f32 1.442695, %v1926_v32 }
 0x472   : > { %3133 = vpow2.f32 %v1963_v56 }
 0x473   : > { %3135 = vpow2.f32 %v1959_v23 }
 0x47a   : > { %v3130_v36 = vpop.eup %3129  ;;  %v2621_v41 = vpop.f32.mrb[36].mxu1 }
 0x47b   : > { %v3132_v21 = vpop.eup %3131  ;;  %v2023_v20 = vadd.f32 1.0, %v3130_v36  ;;  %v4349_v24 = vadd.f32 %v2621_v41, %v4330_v53  ;;  %v1814_v34 = vpop.f32.mrb[37].mxu1 }
 0x47c   : > { %v3134_v43 = vpop.eup %3133  ;;  %v2021_v1 = vadd.f32 1.0, %v3132_v21  ;;  %v4352_v30 = vadd.f32 %v4330_v53, %v1814_v34  ;;  %v2622_v7 = vpop.f32.mrb[38].mxu1 }
 0x47d   : > { %v3136_v15 = vpop.eup %3135  ;;  %3137 = vrcp.f32 %v2023_v20  ;;  %v2024_v25 = vadd.f32 1.0, %v3134_v43  ;;  %v1931_v8 = vsub.f32 0.0, %v4349_v24  ;;  %v4356_v59 = vadd.f32 %v2622_v7, %v4330_v53  ;;  %v1817_v2 = vpop.f32.mrb[39].mxu1 }
 0x47e   : > { %3139 = vrcp.f32 %v2021_v1  ;;  %v2022_v11 = vadd.f32 1.0, %v3136_v15  ;;  %v1929_v63 = vsub.f32 0.0, %v4352_v30  ;;  %v4360_v16 = vadd.f32 %v4330_v53, %v1817_v2 }
 0x47f   : > { %3141 = vrcp.f32 %v2024_v25  ;;  %v1969_v19 = vmul.f32 1.442695, %v1931_v8  ;;  %v1932_v61 = vsub.f32 0.0, %v4356_v59 }
 0x480   : > { %3143 = vrcp.f32 %v2022_v11  ;;  %v1965_v10 = vmul.f32 1.442695, %v1929_v63  ;;  %v1930_v3 = vsub.f32 0.0, %v4360_v16 }
 0x481   : > { %3145 = vpow2.f32 %v1969_v19  ;;  %v1971_v18 = vmul.f32 1.442695, %v1932_v61 }
 0x482   : > { %3147 = vpow2.f32 %v1965_v10  ;;  %v1967_v17 = vmul.f32 1.442695, %v1930_v3  ;;  %v2625_v44 = vpop.f32.mrb[40].mxu1 }
 0x483   : > { %3149 = vpow2.f32 %v1971_v18  ;;  %v4365_v48 = vadd.f32 %v2625_v44, %v4330_v53  ;;  %v1830_v29 = vpop.f32.mrb[41].mxu1 }
 0x484   : > { %3151 = vpow2.f32 %v1967_v17  ;;  %v4368_v62 = vadd.f32 %v4330_v53, %v1830_v29  ;;  %v2626_v35 = vpop.f32.mrb[42].mxu1 }
 0x485   : > { %v1935_v22 = vsub.f32 0.0, %v4365_v48  ;;  %v4372_v14 = vadd.f32 %v2626_v35, %v4330_v53  ;;  %v1833_v42 = vpop.f32.mrb[43].mxu1 }
 0x486   : > { %v1933_v46 = vsub.f32 0.0, %v4368_v62  ;;  %v4376_v57 = vadd.f32 %v4330_v53, %v1833_v42 }
 0x487   : > { %v3138_v9 = vpop.eup %3137  ;;  %v1977_v56 = vmul.f32 1.442695, %v1935_v22  ;;  %v1936_v23 = vsub.f32 0.0, %v4372_v14 }
 0x488   : > { %v3140_v4 = vpop.eup %3139  ;;  %v2087_v32 = vmul.f32 %v3138_v9, %v4333_v58  ;;  %v1973_v21 = vmul.f32 1.442695, %v1933_v46  ;;  %v1934_v20 = vsub.f32 0.0, %v4376_v57 }
 0x489   : > { %v3142_v36 = vpop.eup %3141  ;;  %v2085_v41 = vmul.f32 %v3140_v4, %v4336_v40  ;;  %3153 = vpow2.f32 %v1977_v56  ;;  %v1979_v7 = vmul.f32 1.442695, %v1936_v23 }
 0x48a   : > { %v3144_v34 = vpop.eup %3143  ;;  %v2119_v43 = vadd.f32 %v2087_v32, %v3942_v47  ;;  %v2088_v1 = vmul.f32 %v3142_v36, %v4340_v5  ;;  %3155 = vpow2.f32 %v1973_v21  ;;  %v1975_v8 = vmul.f32 1.442695, %v1934_v20 }
 0x48b   : > { %v3146_v15 = vpop.eup %3145  ;;  %v2117_v58 = vadd.f32 %v2085_v41, %v3959_v55  ;;  %v2086_v25 = vmul.f32 %v3144_v34, %v4344_v45  ;;  %3157 = vpow2.f32 %v1979_v7 }
 0x48c   : > { %v3148_v2 = vpop.eup %3147  ;;  %2151 = vst [vmem:[%s4388_s11 + $0x10] sm:$0xff] %v2119_v43  ;;  %v2120_v47 = vadd.f32 %v2088_v1, %v3949_v49  ;;  %v2027_v40 = vadd.f32 1.0, %v3146_v15  ;;  %3159 = vpow2.f32 %v1975_v8 }
 0x48d   : > { %v3150_v5 = vpop.eup %3149  ;;  %2149 = vst [vmem:[%s4388_s11] sm:$0xff] %v2117_v58  ;;  %v2118_v55 = vadd.f32 %v2086_v25, %v3955_v13  ;;  %v2025_v45 = vadd.f32 1.0, %v3148_v2 }
 0x48e   : > { %v3152_v11 = vpop.eup %3151  ;;  %2152 = vst [vmem:[%s4388_s11 + $0x18] sm:$0xff] %v2120_v47  ;;  %3161 = vrcp.f32 %v2027_v40  ;;  %v2028_v63 = vadd.f32 1.0, %v3150_v5 }
 0x48f   : > { %2150 = vst [vmem:[%s4388_s11 + $0x8] sm:$0xff] %v2118_v55  ;;  %3163 = vrcp.f32 %v2025_v45  ;;  %v2026_v19 = vadd.f32 1.0, %v3152_v11  ;;  %v2629_v61 = vpop.f32.mrb[44].mxu1 }
 0x490   : > { %3165 = vrcp.f32 %v2028_v63  ;;  %v4397_v10 = vadd.f32 %v2629_v61, %v4330_v53  ;;  %v1846_v49 = vpop.f32.mrb[45].mxu1 }
 0x491   : > { %3167 = vrcp.f32 %v2026_v19  ;;  %v4400_v3 = vadd.f32 %v4330_v53, %v1846_v49  ;;  %v2630_v13 = vpop.f32.mrb[46].mxu1 }
 0x492   : > { %v1939_v18 = vsub.f32 0.0, %v4397_v10  ;;  %v4404_v17 = vadd.f32 %v2630_v13, %v4330_v53  ;;  %v1849_v44 = vpop.f32.mrb[47].mxu1 }
 0x493   : > { %v1937_v29 = vsub.f32 0.0, %v4400_v3  ;;  %v4408_v35 = vadd.f32 %v4330_v53, %v1849_v44  ;;  %v3154_v22 = vpop.eup %3153 }
 0x494   : > { %v1985_v42 = vmul.f32 1.442695, %v1939_v18  ;;  %v1940_v9 = vsub.f32 0.0, %v4404_v17  ;;  %v3156_v46 = vpop.eup %3155  ;;  %v2031_v4 = vadd.f32 1.0, %v3154_v22 }
 0x495   : > { %v1938_v32 = vsub.f32 0.0, %v4408_v35  ;;  %v3158_v56 = vpop.eup %3157  ;;  %v2029_v23 = vadd.f32 1.0, %v3156_v46  ;;  %v1981_v21 = vmul.f32 1.442695, %v1937_v29 }
 0x496   : > { %3169 = vpow2.f32 %v1985_v42  ;;  %v3160_v36 = vpop.eup %3159  ;;  %v2032_v41 = vadd.f32 1.0, %v3158_v56  ;;  %v1987_v1 = vmul.f32 1.442695, %v1940_v9 }
 0x497   : > { %3171 = vrcp.f32 %v2031_v4  ;;  %v2633_v20 = vpop.f32.mrb[48].mxu1  ;;  %v2030_v43 = vadd.f32 1.0, %v3160_v36  ;;  %v1983_v8 = vmul.f32 1.442695, %v1938_v32 }
 0x498   : > { %v3162_v34 = vpop.eup %3161  ;;  %3173 = vrcp.f32 %v2029_v23  ;;  %v4413_v7 = vadd.f32 %v2633_v20, %v4330_v53  ;;  %v1862_v15 = vpop.f32.mrb[49].mxu1 }
 0x499   : > { %v3164_v58 = vpop.eup %3163  ;;  %v2091_v25 = vmul.f32 %v3162_v34, %v4349_v24  ;;  %3175 = vrcp.f32 %v2032_v41  ;;  %v4417_v2 = vadd.f32 %v4330_v53, %v1862_v15  ;;  %v2634_v47 = vpop.f32.mrb[50].mxu1 }
 0x49a   : > { %v3166_v40 = vpop.eup %3165  ;;  %v2089_v5 = vmul.f32 %v3164_v58, %v4352_v30  ;;  %3177 = vrcp.f32 %v2030_v43  ;;  %v1943_v55 = vsub.f32 0.0, %v4413_v7  ;;  %v4422_v45 = vadd.f32 %v2634_v47, %v4330_v53  ;;  %v1865_v11 = vpop.f32.mrb[51].mxu1 }
 0x49b   : > { %v3168_v63 = vpop.eup %3167  ;;  %v2123_v24 = vadd.f32 %v2091_v25, %v3999_v60  ;;  %v2092_v19 = vmul.f32 %v3166_v40, %v4356_v59  ;;  %3179 = vpow2.f32 %v1981_v21  ;;  %v1941_v61 = vsub.f32 0.0, %v4417_v2 }
 0x49c   : > { %v2121_v49 = vadd.f32 %v2089_v5, %v3982_v39  ;;  %v2090_v30 = vmul.f32 %v3168_v63, %v4360_v16  ;;  %3181 = vpow2.f32 %v1987_v1  ;;  %v1993_v13 = vmul.f32 1.442695, %v1943_v55 }
 0x49d   : > { %2155 = vst [vmem:[%s4388_s11 + $0x30] sm:$0xff] %v2123_v24  ;;  %v2124_v18 = vadd.f32 %v2092_v19, %v4007_v52  ;;  %3183 = vpow2.f32 %v1983_v8  ;;  %v1989_v44 = vmul.f32 1.442695, %v1941_v61  ;;  %v1944_v60 = vsub.f32 0.0, %v4422_v45 }
 0x49e   : > { %2153 = vst [vmem:[%s4388_s11 + $0x20] sm:$0xff] %v2121_v49  ;;  %v2122_v59 = vadd.f32 %v2090_v30, %v3988_v27  ;;  %3185 = vpow2.f32 %v1993_v13  ;;  %v4435_v29 = vadd.f32 %v4330_v53, %v1865_v11 }
 0x49f   : > { %2156 = vst [vmem:[%s4388_s11 + $0x38] sm:$0xff] %v2124_v18  ;;  %3187 = vpow2.f32 %v1989_v44  ;;  %v1995_v39 = vmul.f32 1.442695, %v1944_v60  ;;  %v2637_v16 = vpop.f32.mrb[52].mxu1 }
 0x4a0   : > { %v3170_v22 = vpop.eup %3169  ;;  %2154 = vst [vmem:[%s4388_s11 + $0x28] sm:$0xff] %v2122_v59  ;;  %v1942_v42 = vsub.f32 0.0, %v4435_v29  ;;  %v4441_v52 = vadd.f32 %v2637_v16, %v4330_v53  ;;  %v1878_v9 = vpop.f32.mrb[53].mxu1 }
 0x4a1   : > { %v3172_v46 = vpop.eup %3171  ;;  %v2035_v4 = vadd.f32 1.0, %v3170_v22  ;;  %3189 = vpow2.f32 %v1995_v39  ;;  %v4444_v27 = vadd.f32 %v4330_v53, %v1878_v9  ;;  %v2638_v32 = vpop.f32.mrb[54].mxu1 }
 0x4a2   : > { %v3174_v56 = vpop.eup %3173  ;;  %v2095_v23 = vmul.f32 %v3172_v46, %v4365_v48  ;;  %v1991_v36 = vmul.f32 1.442695, %v1942_v42  ;;  %v1947_v41 = vsub.f32 0.0, %v4441_v52  ;;  %v4449_v21 = vadd.f32 %v2638_v32, %v4330_v53  ;;  %v1881_v20 = vpop.f32.mrb[55].mxu1 }
 0x4a3   : > { %v3176_v34 = vpop.eup %3175  ;;  %v2093_v43 = vmul.f32 %v3174_v56, %v4368_v62  ;;  %3191 = vrcp.f32 %v2035_v4  ;;  %v1945_v1 = vsub.f32 0.0, %v4444_v27  ;;  %v4454_v15 = vadd.f32 %v4330_v53, %v1881_v20 }
 0x4a4   : > { %v3178_v58 = vpop.eup %3177  ;;  %v2127_v48 = vadd.f32 %v2095_v23, %v4038_v50  ;;  %v2096_v25 = vmul.f32 %v3176_v34, %v4372_v14  ;;  %3193 = vpow2.f32 %v1991_v36  ;;  %v2001_v8 = vmul.f32 1.442695, %v1947_v41 }
 0x4a5   : > { %v3180_v47 = vpop.eup %3179  ;;  %v2125_v40 = vadd.f32 %v2093_v43, %v4013_v38  ;;  %v2094_v62 = vmul.f32 %v3178_v58, %v4376_v57  ;;  %v1997_v5 = vmul.f32 1.442695, %v1945_v1  ;;  %v1948_v55 = vsub.f32 0.0, %v4449_v21 }
 0x4a6   : > { %v3182_v11 = vpop.eup %3181  ;;  %2159 = vst [vmem:[%s4388_s11 + $0x50] sm:$0xff] %v2127_v48  ;;  %v2128_v63 = vadd.f32 %v2096_v25, %v4046_v12  ;;  %v2033_v24 = vadd.f32 1.0, %v3180_v47  ;;  %3195 = vpow2.f32 %v2001_v8  ;;  %v1946_v38 = vsub.f32 0.0, %v4454_v15 }
 0x4a7   : > { %v3184_v50 = vpop.eup %3183  ;;  %2157 = vst [vmem:[%s4388_s11 + $0x40] sm:$0xff] %v2125_v40  ;;  %v2126_v14 = vadd.f32 %v2094_v62, %v4019_v33  ;;  %v2036_v19 = vadd.f32 1.0, %v3182_v11  ;;  %3197 = vpow2.f32 %v1997_v5  ;;  %v2003_v12 = vmul.f32 1.442695, %v1948_v55 }
 0x4a8   : > { %v3186_v61 = vpop.eup %3185  ;;  %2160 = vst [vmem:[%s4388_s11 + $0x58] sm:$0xff] %v2128_v63  ;;  %3199 = vrcp.f32 %v2033_v24  ;;  %v2034_v57 = vadd.f32 1.0, %v3184_v50  ;;  %v2641_v49 = vpop.f32.mrb[56].mxu1  ;;  %v1999_v16 = vmul.f32 1.442695, %v1946_v38 }
 0x4a9   : > { %v3188_v30 = vpop.eup %3187  ;;  %2158 = vst [vmem:[%s4388_s11 + $0x48] sm:$0xff] %v2126_v14  ;;  %3201 = vrcp.f32 %v2036_v19  ;;  %v2039_v13 = vadd.f32 1.0, %v3186_v61  ;;  %v4469_v18 = vadd.f32 %v2641_v49, %v4330_v53  ;;  %v1894_v44 = vpop.f32.mrb[57].mxu1 }
 0x4aa   : > { %3203 = vrcp.f32 %v2034_v57  ;;  %v2037_v33 = vadd.f32 1.0, %v3188_v30  ;;  %v4472_v60 = vadd.f32 %v4330_v53, %v1894_v44  ;;  %v2642_v59 = vpop.f32.mrb[58].mxu1 }
 0x4ab   : > { %v3190_v39 = vpop.eup %3189  ;;  %3205 = vrcp.f32 %v2039_v13  ;;  %v1951_v22 = vsub.f32 0.0, %v4469_v18  ;;  %v4476_v42 = vadd.f32 %v2642_v59, %v4330_v53  ;;  %v1897_v9 = vpop.f32.mrb[59].mxu1 }
 0x4ac   : > { %3207 = vrcp.f32 %v2037_v33  ;;  %v2040_v46 = vadd.f32 1.0, %v3190_v39  ;;  %v1949_v4 = vsub.f32 0.0, %v4472_v60  ;;  %v4480_v32 = vadd.f32 %v4330_v53, %v1897_v9 }
 0x4ad   : > { %v3192_v56 = vpop.eup %3191  ;;  %3209 = vpow2.f32 %v2003_v12  ;;  %v2009_v23 = vmul.f32 1.442695, %v1951_v22  ;;  %v1952_v36 = vsub.f32 0.0, %v4476_v42 }
 0x4ae   : > { %v3194_v41 = vpop.eup %3193  ;;  %v2099_v20 = vmul.f32 %v3192_v56, %v4397_v10  ;;  %3211 = vrcp.f32 %v2040_v46  ;;  %v2005_v34 = vmul.f32 1.442695, %v1949_v4  ;;  %v1950_v43 = vsub.f32 0.0, %v4480_v32 }
 0x4af   : > { %v2038_v1 = vadd.f32 1.0, %v3194_v41  ;;  %3213 = vpow2.f32 %v1999_v16  ;;  %v2011_v40 = vmul.f32 1.442695, %v1952_v36 }
 0x4b0   : > { %v3196_v58 = vpop.eup %3195  ;;  %v2131_v48 = vadd.f32 %v2099_v20, %v4079_v6  ;;  %3215 = vpow2.f32 %v2009_v23  ;;  %v2645_v25 = vpop.f32.mrb[60].mxu1  ;;  %v2007_v11 = vmul.f32 1.442695, %v1950_v43 }
 0x4b1   : > { %v3198_v8 = vpop.eup %3197  ;;  %3217 = vrcp.f32 %v2038_v1  ;;  %v2043_v47 = vadd.f32 1.0, %v3196_v58  ;;  %v4487_v62 = vadd.f32 %v2645_v25, %v4330_v53  ;;  %v1910_v10 = vpop.f32.mrb[61].mxu1 }
 0x4b2   : > { %v3200_v5 = vpop.eup %3199  ;;  %2163 = vst [vmem:[%s4388_s11 + $0x70] sm:$0xff] %v2131_v48  ;;  %v2041_v55 = vadd.f32 1.0, %v3198_v8  ;;  %3219 = vpow2.f32 %v2005_v34  ;;  %v4491_v63 = vadd.f32 %v4330_v53, %v1910_v10  ;;  %v2646_v24 = vpop.f32.mrb[62].mxu1 }
 0x4b3   : > { %v3202_v6 = vpop.eup %3201  ;;  %v2097_v50 = vmul.f32 %v3200_v5, %v4400_v3  ;;  %3221 = vrcp.f32 %v2043_v47  ;;  %v1955_v14 = vsub.f32 0.0, %v4487_v62  ;;  %v4496_v19 = vadd.f32 %v2646_v24, %v4330_v53  ;;  %v1913_v38 = vpop.f32.mrb[63].mxu1  ;;  %v4669_v5 = vld [vmem:[#allocation13_spill] sm:$0xff] }
 0x4b4   : > { %v3204_v61 = vpop.eup %3203  ;;  %v2100_v57 = vmul.f32 %v3202_v6, %v4404_v17  ;;  %3223 = vrcp.f32 %v2041_v55  ;;  %v1953_v49 = vsub.f32 0.0, %v4491_v63  ;;  %v4501_v30 = vadd.f32 %v4330_v53, %v1913_v38 }
 0x4b5   : > { %v3206_v13 = vpop.eup %3205  ;;  %v2129_v3 = vadd.f32 %v2097_v50, %v4053_v51  ;;  %v2098_v12 = vmul.f32 %v3204_v61, %v4408_v35  ;;  %3225 = vpow2.f32 %v2011_v40  ;;  %v2017_v44 = vmul.f32 1.442695, %v1955_v14 }
 0x4b6   : > { %v3208_v33 = vpop.eup %3207  ;;  %v2132_v59 = vadd.f32 %v2100_v57, %v4073_v0  ;;  %v2103_v39 = vmul.f32 %v3206_v13, %v4413_v7  ;;  %3227 = vpow2.f32 %v2007_v11  ;;  %v2013_v17 = vmul.f32 1.442695, %v1953_v49  ;;  %v4670_v57 = vld [vmem:[#allocation15_spill] sm:$0xff] }
 0x4b7   : > { %v3210_v16 = vpop.eup %3209  ;;  %2161 = vst [vmem:[%s4388_s11 + $0x60] sm:$0xff] %v2129_v3  ;;  %v2130_v53 = vadd.f32 %v2098_v12, %v4059_v37  ;;  %v2101_v51 = vmul.f32 %v3208_v33, %v4417_v2  ;;  %3229 = vpow2.f32 %v2017_v44  ;;  %v1956_v35 = vsub.f32 0.0, %v4496_v19  ;;  %v4671_v33 = vld [vmem:[#allocation14_spill] sm:$0xff] }
 0x4b8   : > { %v3212_v22 = vpop.eup %3211  ;;  %2164 = vst [vmem:[%s4388_s11 + $0x78] sm:$0xff] %v2132_v59  ;;  %v2135_v0 = vadd.f32 %v2103_v39, %v4099_v54  ;;  %v2044_v9 = vadd.f32 1.0, %v3210_v16  ;;  %3231 = vpow2.f32 %v2013_v17  ;;  %v1954_v7 = vsub.f32 0.0, %v4501_v30  ;;  %v4672_v39 = vld [vmem:[#allocation20_spill] sm:$0xff] }
 0x4b9   : > { %v3214_v46 = vpop.eup %3213  ;;  %2162 = vst [vmem:[%s4388_s11 + $0x68] sm:$0xff] %v2130_v53  ;;  %v2133_v4 = vadd.f32 %v2101_v51, %v4086_v28  ;;  %v2104_v37 = vmul.f32 %v3212_v22, %v4422_v45  ;;  %v2019_v2 = vmul.f32 1.442695, %v1956_v35 }
 0x4ba   : > { %v3216_v56 = vpop.eup %3215  ;;  %2167 = vst [vmem:[%s4388_s11 + $0x90] sm:$0xff] %v2135_v0  ;;  %3233 = vrcp.f32 %v2044_v9  ;;  %v2042_v23 = vadd.f32 1.0, %v3214_v46  ;;  %v2015_v36 = vmul.f32 1.442695, %v1954_v7  ;;  %v4674_v7 = vld [vmem:[#allocation19_spill] sm:$0xff] }
 0x4bb   : > { %v3218_v41 = vpop.eup %3217  ;;  %2165 = vst [vmem:[%s4388_s11 + $0x80] sm:$0xff] %v2133_v4  ;;  %v2136_v54 = vadd.f32 %v2104_v37, %v4095_v31  ;;  %v2047_v20 = vadd.f32 1.0, %v3216_v56  ;;  %3235 = vpow2.f32 %v2019_v2  ;;  %v4675_v4 = vld [vmem:[#allocation18_spill] sm:$0xff]  ;;  %v4676_v56 = vld [vmem:[#allocation24_spill] sm:$0xff] }
 0x4bc   : > { %v3220_v34 = vpop.eup %3219  ;;  %v2102_v43 = vmul.f32 %v3218_v41, %v4435_v29  ;;  %3237 = vrcp.f32 %v2042_v23  ;;  %v4668_v29 = vld [vmem:[#allocation16_spill] sm:$0xff] }
 0x4bd   : > { %v3222_v28 = vpop.eup %3221  ;;  %2168 = vst [vmem:[%s4388_s11 + $0x98] sm:$0xff] %v2136_v54  ;;  %3239 = vrcp.f32 %v2047_v20  ;;  %v2045_v45 = vadd.f32 1.0, %v3220_v34  ;;  %v4678_v20 = vld [vmem:[#allocation23_spill] sm:$0xff] }
 0x4be   : > { %v3224_v1 = vpop.eup %3223  ;;  %v2134_v58 = vadd.f32 %v2102_v43, %v4089_v26  ;;  %v2107_v48 = vmul.f32 %v3222_v28, %v4441_v52  ;;  %3241 = vpow2.f32 %v2015_v36  ;;  %v4677_v36 = vld [vmem:[#allocation21_spill] sm:$0xff]  ;;  %v4679_v43 = vld [vmem:[#allocation22_spill] sm:$0xff] }
 0x4bf   : > { %v3226_v31 = vpop.eup %3225  ;;  %v2105_v25 = vmul.f32 %v3224_v1, %v4444_v27  ;;  %3243 = vrcp.f32 %v2045_v45 }
 0x4c0   : > { %v3228_v8 = vpop.eup %3227  ;;  %2166 = vst [vmem:[%s4388_s11 + $0x88] sm:$0xff] %v2134_v58  ;;  %v2139_v47 = vadd.f32 %v2107_v48, %v4668_v29  ;;  %v2048_v40 = vadd.f32 1.0, %v3226_v31 }
 0x4c1   : > { %v3230_v10 = vpop.eup %3229  ;;  %v2137_v55 = vadd.f32 %v2105_v25, %v4669_v5  ;;  %v2046_v11 = vadd.f32 1.0, %v3228_v8 }
 0x4c2   : > { %v3232_v24 = vpop.eup %3231  ;;  %2171 = vst [vmem:[%s4388_s11 + $0xb0] sm:$0xff] %v2139_v47  ;;  %3245 = vrcp.f32 %v2048_v40  ;;  %v2051_v26 = vadd.f32 1.0, %v3230_v10 }
 0x4c3   : > { %2169 = vst [vmem:[%s4388_s11 + $0xa0] sm:$0xff] %v2137_v55  ;;  %3247 = vrcp.f32 %v2046_v11  ;;  %v2049_v52 = vadd.f32 1.0, %v3232_v24 }
 0x4c4   : > { %v3234_v6 = vpop.eup %3233  ;;  %3249 = vrcp.f32 %v2051_v26 }
 0x4c5   : > { %v3236_v27 = vpop.eup %3235  ;;  %v2108_v50 = vmul.f32 %v3234_v6, %v4449_v21  ;;  %3251 = vrcp.f32 %v2049_v52 }
 0x4c6   : > { %v3238_v14 = vpop.eup %3237  ;;  %v2052_v38 = vadd.f32 1.0, %v3236_v27 }
 0x4c7   : > { %v3240_v61 = vpop.eup %3239  ;;  %v2140_v49 = vadd.f32 %v2108_v50, %v4670_v57  ;;  %v2106_v13 = vmul.f32 %v3238_v14, %v4454_v15  ;;  %v4673_v15 = vld [vmem:[#allocation17_spill] sm:$0xff] }
 0x4c8   : > { %v3242_v3 = vpop.eup %3241  ;;  %v2111_v12 = vmul.f32 %v3240_v61, %v4469_v18  ;;  %3253 = vrcp.f32 %v2052_v38 }
 0x4c9   : > { %v3244_v44 = vpop.eup %3243  ;;  %2172 = vst [vmem:[%s4388_s11 + $0xb8] sm:$0xff] %v2140_v49  ;;  %v2138_v59 = vadd.f32 %v2106_v13, %v4671_v33  ;;  %v2050_v21 = vadd.f32 1.0, %v3242_v3 }
 0x4ca   : > { %v2143_v17 = vadd.f32 %v2111_v12, %v4672_v39  ;;  %v2109_v16 = vmul.f32 %v3244_v44, %v4472_v60 }
 0x4cb   : > { %2170 = vst [vmem:[%s4388_s11 + $0xa8] sm:$0xff] %v2138_v59  ;;  %3255 = vrcp.f32 %v2050_v21 }
 0x4cc   : > { %v3246_v53 = vpop.eup %3245  ;;  %2175 = vst [vmem:[%s4388_s11 + $0xd0] sm:$0xff] %v2143_v17  ;;  %v2141_v51 = vadd.f32 %v2109_v16, %v4673_v15 }
 0x4cd   : > { %v3248_v18 = vpop.eup %3247  ;;  %v2112_v35 = vmul.f32 %v3246_v53, %v4476_v42 }
 0x4ce   : > { %v3250_v22 = vpop.eup %3249  ;;  %2173 = vst [vmem:[%s4388_s11 + $0xc0] sm:$0xff] %v2141_v51  ;;  %v2110_v0 = vmul.f32 %v3248_v18, %v4480_v32 }
 0x4cf   : > { %v3252_v9 = vpop.eup %3251  ;;  %v2144_v60 = vadd.f32 %v2112_v35, %v4674_v7  ;;  %v2115_v46 = vmul.f32 %v3250_v22, %v4487_v62 }
 0x4d0   : > { %v2142_v37 = vadd.f32 %v2110_v0, %v4675_v4  ;;  %v2113_v2 = vmul.f32 %v3252_v9, %v4491_v63 }
 0x4d1   : > { %2176 = vst [vmem:[%s4388_s11 + $0xd8] sm:$0xff] %v2144_v60  ;;  %v2147_v42 = vadd.f32 %v2115_v46, %v4676_v56 }
 0x4d2   : > { %v3254_v23 = vpop.eup %3253  ;;  %2174 = vst [vmem:[%s4388_s11 + $0xc8] sm:$0xff] %v2142_v37  ;;  %v2145_v41 = vadd.f32 %v2113_v2, %v4677_v36 }
 0x4d3   : > { %2179 = vst [vmem:[%s4388_s11 + $0xf0] sm:$0xff] %v2147_v42  ;;  %v2116_v32 = vmul.f32 %v3254_v23, %v4496_v19 }
 0x4d4   : > { %2177 = vst [vmem:[%s4388_s11 + $0xe0] sm:$0xff] %v2145_v41  ;;  %2188 = sbr.rel (!%p4680_p9) target bundleno = 1271 (0x4f7), region = 56 }
 0x4d5   : > { %v3256_v54 = vpop.eup %3255  ;;  %v2148_v62 = vadd.f32 %v2116_v32, %v4678_v20 }
 0x4d6   : > { %v2114_v34 = vmul.f32 %v3256_v54, %v4501_v30 }
 0x4d7   : > { %2180 = vst [vmem:[%s4388_s11 + $0xf8] sm:$0xff] %v2148_v62 }
 0x4d8   : > { %v2146_v28 = vadd.f32 %v2114_v34, %v4679_v43 }
 0x4da   : > { %2178 = vst [vmem:[%s4388_s11 + $0xe8] sm:$0xff] %v2146_v28 }
 0x4db   : > { %s4690_s25 = smov (!%p2191_p10, %s2190_s25), 32 }
 0x4dc   : > { %s4564_s27 = sshll.u32 %s4690_s25, 7 }
 0x4dd   : > { %s2195_s14 = ssub.s32 4096, %s4564_s27 }
 0x4de   : > { %2196 = vsyncadd %s2182_s28, %s2195_s14  ;;  %p2351_p1 = scmp.ne.s32.totalorder %s4564_s27, 0  ;;  %s2358_s30 = sshll.u32 %s3506_s22, 12 }
 0x4df   : > { %s4574_s29 = scalar_lea.hbm %s4628_s5, %s2358_s30  ;;  %s2201_s7 = sshll.u32 %s4388_s11, 4  ;;  %s4577_s7 = int_to_ptr.vmem [resolvable:$true] %s2201_s7 }
 0x4e0   : > { %s3373_s10 = scalar_lea.vmem %s4577_s7, %s4564_s27  ;;  %s3452_s8 = smov [#allocation8]  }
 0x4e1   : > { %p3374_p3 = scmp.ne.s32.totalorder %s4577_s7, %s3373_s10  ;;  %s3377_s26 = sshll.u32 %s3452_s8, 4  ;;  %s3378_s26 = int_to_ptr.vmem [resolvable:$false] %s3377_s26 }
 0x4e2   : > { %s3379_s22 = scalar_lea.vmem %s3378_s26, 8192  ;;  %p3380_p11 = scmp.lt.s32.totalorder %s4577_s7, %s3378_s26 }
 0x4e3   : > { %p3375_p5 = pnand %p3374_p3, %p2351_p1  ;;  %p3381_p13 = scmp.lt.s32.totalorder %s3379_s22, %s3373_s10 }
 0x4e5   : > { %p3376_p6 = pneg %p3375_p5  ;;  %p3382_p0 = por %p3381_p13, %p3380_p11 }
 0x4e7   : > { %p3383_p12 = pnand %p3382_p0, %p3376_p6 }
 0x4e9   : > { %3386 = shalt.err (!%p3383_p12)
}
 0x4ea   : > { %s3387_s9 = scalar_lea.hbm %s4574_s29, %s4564_s27  ;;  %s3391_s11 = scalar_lea.hbm %s4628_s5, 8064 }
 0x4eb   : > { %p3388_p7 = scmp.ne.s32.totalorder %s4574_s29, %s3387_s9  ;;  %p3392_p9 = scmp.lt.u32.totalorder %s4574_s29, %s4628_s5 }
 0x4ec   : > { %p3393_p10 = scmp.lt.u32.totalorder %s3391_s11, %s3387_s9  ;;  %p3395_p5 = scmp.lt.u32.totalorder %s3387_s9, %s4574_s29 }
 0x4ed   : > { %p3389_p2 = pnand %p3388_p7, %p2351_p1 }
 0x4ee   : > { %p3394_p3 = por %p3393_p10, %p3392_p9 }
 0x4ef   : > { %p3390_p8 = pneg %p3389_p2 }
 0x4f0   : > { %p3396_p6 = por %p3395_p5, %p3394_p3 }
 0x4f2   : > { %p3397_p11 = pnand %p3396_p6, %p3390_p8 }
 0x4f4   : > { %3400 = shalt.err (!%p3397_p11)
}
 0x4f5   : > { %s3453_s14 = smov 128   ;;  %s3454_s30 = smov 8  }
 0x4f6   : > { %2207 = dma.vmem_to_hbm [thread:$0]  (%p2351_p1), %s4577_s7, %s4564_s27, %s4574_s29, %s2182_s28, %s3453_s14, %s3453_s14, %s3454_s30  }
 0x4f7 PF: > { %s2216_s15 = sand.u32 1, %s3431_s18   ;;  %p4681_p13 = scmp.ne.s32.totalorder %s4648_s6, 0 }
 0x4f8   : > { %s2217_s16 = scalar_lea.sflag [#allocation4], %s2216_s15 }
 0x4f9   : > { %p2665_p0 = pnand %p2297_p4, %p4681_p13 }
 0x4fb   : > { %3426 = dma.done.wait (!%p2665_p0), %s2217_s16, 4096  }
 0x4fc   : > { %3428 = vsyncadd (!%p2665_p0), %s2217_s16, 4294963200  ;;  %s4682_s10 = sld [smem:[#allocation12_spill]]  ;;  %p19_p12 = scmp.ge.s32.totalorder %s3510_s24, 4  }
 0x4fd   : > { %s4683_s18 = smov %s3435_s19  ;;  %s4684_s19 = smov %s3439_s20 }
 0x4fe   : > { %s4686_s21 = smov %s3510_s24  ;;  %21 = sbr.rel (!%p19_p12) target bundleno = 6 (0x6), region = 97 }
 0x502   : > { %s4685_s20 = smov %s4682_s10 }
 0x505   :  { %2222 = vsyncpa [#allocation3], 1 }
 0x506   :  { %2224 = vsyncpa [#allocation3 + $0x1], 1 }
 0x507   :  { %2225 = vsyncpa [#allocation6], 1 }
 0x508   :  { %2226 = vsyncpa [#allocation4], 1 }
 0x509   :  { %2228 = vsyncpa [#allocation4 + $0x1], 1 }

// kernel: tpu_custom_call.1
= control target key start
LH: loop header
LB: loop body
LE: loop exit
PB: predicated region body
PF: predicated region fallthrough
CT: control target
= control target key end

     0   :  { %10 = vsyncpa [#allocation3], 0  ;;  %s4623_s0 = inlined_call_operand.hbm [shape: f32[500,128], index: 0, kind: input, shape index: {}]   ;;  %s4624_s1 = inlined_call_operand.hbm [shape: bf16[2,128,128], index: 1, kind: input, shape index: {}]   ;;  %s4625_s2 = inlined_call_operand.vmem [shape: f32[2,1,128], index: 2, kind: input, shape index: {}]   ;;  %s4626_s3 = inlined_call_operand.hbm [shape: bf16[2,128,128], index: 3, kind: input, shape index: {}]   ;;  %s4627_s4 = inlined_call_operand.vmem [shape: f32[2,1,128], index: 4, kind: input, shape index: {}]   ;;  %s4628_s5 = inlined_call_operand.hbm [shape: f32[500,128], index: 5, kind: output, shape index: {}]  }
   0x1   :  { %12 = vsyncpa [#allocation3 + $0x1], 0 }
   0x2   :  { %13 = vsyncpa [#allocation6], 0 }
   0x3   :  { %14 = vsyncpa [#allocation4], 0 }
   0x4   :  { %16 = vsyncpa [#allocation4 + $0x1], 0  ;;  %s3485_s18 = smov 0   ;;  %s3487_s19 = smov 0  }
   0x5   :  { %s3489_s20 = smov 0   ;;  %s3491_s21 = smov 0  }
   0x6 LB: > { %s3506_s22 = sadd.s32 4294967295, %s3443_s21   ;;  %s2293_s23 = sadd.s32 4294967294, %s3443_s21   ;;  %s3443_s21 = sphi %s3491_s21, %s4686_s21   ;;  %s3439_s20 = sphi %s3489_s20, %s4685_s20   ;;  %s3435_s19 = sphi %s3487_s19, %s4684_s19   ;;  %s3431_s18 = sphi %s3485_s18, %s4683_s18  }
   0x7   : > { %s3510_s24 = sadd.s32 1, %s3443_s21   ;;  %s29_s25 = sadd.s32 1, %s3439_s20 }
   0x8   : > { %s26_s26 = ssub.s32 %s3443_s21, %s3510_s24  ;;  %p36_p0 = scmp.ne.s32.totalorder %s3439_s20, %s3435_s19 }
   0x9   : > { %p27_p1 = scmp.eq.s32.totalorder %s26_s26, 0  ;;  %p37_p2 = scmp.eq.s32.totalorder %s3443_s21, 0 }
   0xa   : > { %p42_p3 = scmp.ne.s32.totalorder %s3435_s19, %s3431_s18  ;;  %p4629_p4 = scmp.eq.s32.totalorder %s3506_s22, 0 }
   0xb   : > { %s3522_s27 = scalar_select %p27_p1, %s3439_s20, %s29_s25  }
   0xc   : > { %p3524_p5 = por %p37_p2, %p36_p0  ;;  %p3530_p6 = por %p4629_p4, %p42_p3 }
   0xd   : > { %4644 = sst [smem:[#allocation12_spill]] %s3522_s27  ;;  %p150_p7 = scmp.eq.s32.totalorder %s3506_s22, 1 }
   0xe   : > { %s4645_s28 = scalar_select %p3524_p5, 1, 0 }
   0xf   : > { %s4646_s29 = scalar_select %p3530_p6, 1, 0 }
  0x10   : > { %p156_p8 = scmp.eq.s32.totalorder %s2293_s23, 1  ;;  %p2294_p9 = scmp.ge.s32.totalorder %s3443_s21, 1 }
  0x11   : > { %p163_p10 = scmp.lt.s32.totalorder %s3443_s21, 3  ;;  %p3537_p11 = por %p150_p7, %p36_p0 }
  0x12   : > { %p3541_p12 = por %p156_p8, %p42_p3  ;;  %s3445_s8 = smov [#allocation5]  }
  0x13   : > { %s4647_s30 = scalar_select %p3537_p11, 1, 0 }
  0x14   : > { %s4648_s6 = scalar_select %p3541_p12, 1, 0 }
  0x15   : > { %p3545_p13 = pnand %p2294_p9, %p163_p10  ;;  %s175_s9 = sshll.u32 %s3445_s8, 4  ;;  %s176_s9 = int_to_ptr.vmem [resolvable:$true] %s175_s9 }
  0x16   : > { %s3446_s11 = smov [#allocation7]   ;;  %s3289_s15 = scalar_lea.hbm %s4624_s1, 2048 }
  0x17   : > { %s4649_s7 = scalar_select %p3545_p13, 1, 0 }
  0x18   : > { %p2657_p1 = pneg %p3545_p13  ;;  %s191_s12 = sshll.u32 %s3446_s11, 4  ;;  %s3557_s12 = int_to_ptr.vmem [resolvable:$true] %s191_s12 }
  0x19   : > { %p3290_p0 = scmp.ne.s32.totalorder %s4624_s1, %s3289_s15  ;;  %p3296_p9 = scmp.lt.u32.totalorder %s3289_s15, %s4624_s1 }
  0x1a   : > { %p3553_p2 = pnand %p2657_p1, %p4629_p4 }
  0x1c   : > { %p3291_p3 = pneg %p3553_p2 }
  0x1e   : > { %p3292_p7 = pnand %p3291_p3, %p3290_p0 }
  0x20   : > { %p3293_p8 = pneg %p3292_p7 }
  0x22   : > { %p3298_p10 = pnand %p3296_p9, %p3293_p8 }
  0x24   : > { %3301 = shalt.err (!%p3298_p10)
}
  0x25   : > { %s3302_s26 = scalar_lea.vmem %s176_s9, 2048  ;;  %p3310_p11 = scmp.lt.s32.totalorder %s176_s9, %s176_s9 }
  0x26   : > { %p3303_p1 = scmp.ne.s32.totalorder %s176_s9, %s3302_s26  ;;  %p3311_p6 = scmp.lt.s32.totalorder %s3302_s26, %s3302_s26 }
  0x28   : > { %p3305_p4 = pnand %p3303_p1, %p3291_p3  ;;  %p3312_p13 = por %p3311_p6, %p3310_p11 }
  0x2a   : > { %p3306_p12 = pneg %p3305_p4 }
  0x2c   : > { %p3313_p5 = pnand %p3312_p13, %p3306_p12 }
  0x2e   : > { %3316 = shalt.err (!%p3313_p5)
}
  0x2f   : > { %s3447_s8 = smov 64   ;;  %s3448_s11 = smov 4  }
  0x30   : > { %2660 = dma.hbm_to_vmem [thread:$0]  (!%p3553_p2), %s4624_s1, 2048, %s176_s9, [#allocation6], %s3447_s8, %s3447_s8, %s3448_s11  }
  0x31   : > { %s3317_s17 = scalar_lea.hbm %s4626_s3, 2048 }
  0x32   : > { %p3318_p4 = scmp.ne.s32.totalorder %s4626_s3, %s3317_s17  ;;  %p3324_p11 = scmp.lt.u32.totalorder %s3317_s17, %s4626_s3 }
  0x34   : > { %p3320_p5 = pnand %p3318_p4, %p3291_p3 }
  0x36   : > { %p3321_p6 = pneg %p3320_p5 }
  0x38   : > { %p3326_p12 = pnand %p3324_p11, %p3321_p6 }
  0x3a   : > { %3329 = shalt.err (!%p3326_p12)
}
  0x3b   : > { %s3330_s9 = scalar_lea.vmem %s3557_s12, 2048  ;;  %p3338_p8 = scmp.lt.s32.totalorder %s3557_s12, %s3557_s12 }
  0x3c   : > { %p3331_p13 = scmp.ne.s32.totalorder %s3557_s12, %s3330_s9  ;;  %p3339_p9 = scmp.lt.s32.totalorder %s3330_s9, %s3330_s9 }
  0x3e   : > { %p3333_p0 = pnand %p3331_p13, %p3291_p3  ;;  %p3340_p10 = por %p3339_p9, %p3338_p8 }
  0x40   : > { %p3334_p7 = pneg %p3333_p0 }
  0x42   : > { %p3341_p1 = pnand %p3340_p10, %p3334_p7 }
  0x44   : > { %3344 = shalt.err (!%p3341_p1)
}
  0x45   : > { %2663 = dma.hbm_to_vmem [thread:$0]  (!%p3553_p2), %s4626_s3, 2048, %s3557_s12, [#allocation6], %s3447_s8, %s3447_s8, %s3448_s11  }
  0x46   : > { %p2297_p4 = scmp.ge.s32.totalorder %s3443_s21, 2 }
  0x47   : > { %p4651_p3 = scmp.ne.s32.totalorder (!%p2297_p4), %s4645_s28, 0 }
  0x48   : > { %204 = sbr.rel (%p2297_p4) target bundleno = 114 (0x72), region = 32 }
  0x4f   : > { %207 = sbr.rel (!%p4651_p3) target bundleno = 114 (0x72), region = 36  ;;  %s208_s14 = sand.u32 (%p4651_p3), 1, %s3439_s20  }
  0x50   : > { %s2299_s15 = sshll.u32 (%p4651_p3), %s3443_s21, 5  ;;  %s2298_s16 = sshll.u32 (%p4651_p3), %s208_s14, 8 }
  0x51   : > { %s214_s17 = ssub.s32 (%p4651_p3), 63, %s2299_s15  ;;  %s3616_s8 = scalar_lea.sflag (%p4651_p3), [#allocation3], %s208_s14 }
  0x52   : > { %p215_p5 = scmp.lt.s32.totalorder (%p4651_p3), %s214_s17, 32  ;;  %s212_s11 = scalar_lea.vmem (%p4651_p3), [#allocation2], %s2298_s16 }
  0x56   : > { %s4688_s17 = smov (!%p215_p5, %s214_s17), 32 }
  0x57   : > { %s3613_s10 = sshll.u32 %s4688_s17, 7 }
  0x58   : > { %s219_s12 = ssub.s32 4096, %s3613_s10 }
  0x59   : > { %220 = vsyncadd %s3616_s8, %s219_s12  ;;  %p2301_p2 = scmp.ne.s32.totalorder %s3613_s10, 0  ;;  %s2357_s28 = sshll.u32 %s3443_s21, 12 }
  0x5a   : > { %s3624_s26 = scalar_lea.hbm %s4623_s0, %s2357_s28  ;;  %s225_s9 = sshll.u32 %s212_s11, 4  ;;  %s3626_s9 = int_to_ptr.vmem [resolvable:$true] %s225_s9 }
  0x5b   : > { %s3345_s27 = scalar_lea.hbm %s3624_s26, %s3613_s10  ;;  %s3349_s15 = scalar_lea.hbm %s4623_s0, 8064 }
  0x5c   : > { %p3346_p6 = scmp.ne.s32.totalorder %s3624_s26, %s3345_s27  ;;  %p3350_p13 = scmp.lt.u32.totalorder %s3624_s26, %s4623_s0 }
  0x5d   : > { %p3351_p0 = scmp.lt.u32.totalorder %s3349_s15, %s3345_s27  ;;  %p3353_p8 = scmp.lt.u32.totalorder %s3345_s27, %s3624_s26 }
  0x5e   : > { %p3347_p11 = pnand %p3346_p6, %p2301_p2 }
  0x5f   : > { %p3352_p7 = por %p3351_p0, %p3350_p13 }
  0x60   : > { %p3348_p12 = pneg %p3347_p11 }
  0x61   : > { %p3354_p9 = por %p3353_p8, %p3352_p7 }
  0x63   : > { %p3355_p10 = pnand %p3354_p9, %p3348_p12 }
  0x65   : > { %3358 = shalt.err (!%p3355_p10)
}
  0x66   : > { %s3359_s12 = scalar_lea.vmem %s3626_s9, %s3613_s10  ;;  %s3449_s11 = smov [#allocation2]  }
  0x67   : > { %p3360_p1 = scmp.ne.s32.totalorder %s3626_s9, %s3359_s12  ;;  %s3363_s28 = sshll.u32 %s3449_s11, 4  ;;  %s3364_s28 = int_to_ptr.vmem [resolvable:$false] %s3363_s28 }
  0x68   : > { %s3365_s23 = scalar_lea.vmem %s3364_s28, 8192  ;;  %p3366_p6 = scmp.lt.s32.totalorder %s3626_s9, %s3364_s28 }
  0x69   : > { %p3361_p3 = pnand %p3360_p1, %p2301_p2  ;;  %p3367_p11 = scmp.lt.s32.totalorder %s3365_s23, %s3359_s12 }
  0x6b   : > { %p3362_p5 = pneg %p3361_p3  ;;  %p3368_p13 = por %p3367_p11, %p3366_p6 }
  0x6d   : > { %p3369_p0 = pnand %p3368_p13, %p3362_p5 }
  0x6f   : > { %3372 = shalt.err (!%p3369_p0)
}
  0x70   : > { %s3450_s25 = smov 128   ;;  %s3451_s27 = smov 8  }
  0x71   : > { %231 = dma.hbm_to_vmem [thread:$0]  (%p2301_p2), %s3624_s26, %s3613_s10, %s3626_s9, %s3616_s8, %s3450_s25, %s3450_s25, %s3451_s27  }
  0x72 PF: > { %p4652_p12 = scmp.ne.s32.totalorder %s4649_s7, 0 }
  0x74   : > { %237 = sbr.rel (%p4652_p12) target bundleno = 1271 (0x4f7), region = 40 }
  0x7b   : > { %s3656_s13 = sand.u32 1, %s3435_s19   ;;  %p4653_p7 = scmp.ne.s32.totalorder %s4646_s29, 0 }
  0x7c   : > { %s2306_s14 = sshll.u32 %s3656_s13, 8  ;;  %s240_s15 = scalar_lea.sflag [#allocation3], %s3656_s13 }
  0x7d   : > { %s3662_s16 = scalar_lea.vmem [#allocation2], %s2306_s14 }
  0x7e   : > { %3418 = dma.done.wait (%p4653_p7), %s240_s15, 4096  }
  0x7f   : > { %3420 = vsyncadd (%p4653_p7), %s240_s15, 4294963200  ;;  %p4654_p2 = scmp.eq.s32.totalorder %s3506_s22, 0 }
  0x81   : > { %3422 = dma.done.wait (%p4654_p2), [#allocation6], 4096   ;;  %p4655_p8 = pmov %p4654_p2 }
  0x82   : > { %v2713_v0 = vld [vmem:[#allocation5] sm:$0xff]   ;;  %v2714_v1 = vld [vmem:[#allocation5 + $0x8] sm:$0xff]   ;;  %v2715_v2 = vld [vmem:[#allocation5 + $0x10] sm:$0xff]   ;;  %s4388_s11 = scalar_lea.vmem [#allocation8], %s2306_s14  ;;  %s2182_s28 = scalar_lea.sflag [#allocation4], %s3656_s13 }
  0x83   : > { %3424 = vsyncadd (%p4655_p8), [#allocation6], 4294963200  ;;  %2455 = vmatprep.subr.bf16.mxu0 %v2713_v0  ;;  %v2716_v3 = vld [vmem:[#allocation5 + $0x18] sm:$0xff]   ;;  %v289_v4 = vld [vmem:[%s3662_s16] sm:$0xff]  ;;  %p4680_p9 = scmp.ne.s32.totalorder %s4647_s30, 0 }
  0x84   : > { %2456 = vmatpush3.bf16.msra.mxu0 %v2713_v0  ;;  %v290_v5 = vld [vmem:[%s3662_s16 + $0x8] sm:$0xff]  ;;  %v2717_v7 = vld [vmem:[#allocation5 + $0x20] sm:$0xff]   ;;  %v2719_v9 = vld [vmem:[#allocation5 + $0x30] sm:$0xff]   ;;  %s2349_s23 = sshll.u32 (%p4680_p9), %s3506_s22, 5 }
  0x85   : > { %2457 = vmatprep.subr.bf16.mxu0 %v2714_v1  ;;  %v321_v6 = vpack.c.bf16 %v290_v5, %v289_v4  ;;  %v2718_v8 = vld [vmem:[#allocation5 + $0x28] sm:$0xff]   ;;  %v2720_v10 = vld [vmem:[#allocation5 + $0x38] sm:$0xff]   ;;  %v291_v11 = vld [vmem:[%s3662_s16 + $0x10] sm:$0xff]  ;;  %s2190_s25 = ssub.s32 (%p4680_p9), 63, %s2349_s23 }
  0x86   : > { %v292_v12 = vld [vmem:[%s3662_s16 + $0x18] sm:$0xff]  ;;  %v293_v13 = vld [vmem:[%s3662_s16 + $0x20] sm:$0xff]  ;;  %v294_v14 = vld [vmem:[%s3662_s16 + $0x28] sm:$0xff]  ;;  %p2191_p10 = scmp.lt.s32.totalorder (%p4680_p9), %s2190_s25, 32 }
  0x87   : > { %2471 = vmatprep.mubr.bf16.mxu0 %v321_v6  ;;  %v322_v15 = vpack.c.bf16 %v292_v12, %v291_v11  ;;  %v323_v16 = vpack.c.bf16 %v294_v14, %v293_v13  ;;  %v295_v17 = vld [vmem:[%s3662_s16 + $0x30] sm:$0xff]  ;;  %v296_v18 = vld [vmem:[%s3662_s16 + $0x38] sm:$0xff]  ;;  %v297_v19 = vld [vmem:[%s3662_s16 + $0x40] sm:$0xff] }
  0x88   : > { %2458 = vmatpush3.bf16.msra.mxu0 %v2714_v1  ;;  %v298_v20 = vld [vmem:[%s3662_s16 + $0x48] sm:$0xff]  ;;  %v324_v21 = vpack.c.bf16 %v296_v18, %v295_v17  ;;  %v299_v23 = vld [vmem:[%s3662_s16 + $0x50] sm:$0xff]  ;;  %v300_v24 = vld [vmem:[%s3662_s16 + $0x58] sm:$0xff] }
  0x89   : > { %2459 = vmatprep.subr.bf16.mxu0 %v2715_v2  ;;  %v325_v22 = vpack.c.bf16 %v298_v20, %v297_v19  ;;  %v301_v25 = vld [vmem:[%s3662_s16 + $0x60] sm:$0xff]  ;;  %v302_v26 = vld [vmem:[%s3662_s16 + $0x68] sm:$0xff]  ;;  %v326_v27 = vpack.c.bf16 %v300_v24, %v299_v23  ;;  %v303_v29 = vld [vmem:[%s3662_s16 + $0x70] sm:$0xff] }
  0x8a   : > { %v327_v28 = vpack.c.bf16 %v302_v26, %v301_v25  ;;  %v304_v30 = vld [vmem:[%s3662_s16 + $0x78] sm:$0xff]  ;;  %v305_v31 = vld [vmem:[%s3662_s16 + $0x80] sm:$0xff]  ;;  %v306_v32 = vld [vmem:[%s3662_s16 + $0x88] sm:$0xff] }
  0x8b   : > { %v328_v33 = vpack.c.bf16 %v304_v30, %v303_v29  ;;  %v329_v34 = vpack.c.bf16 %v306_v32, %v305_v31  ;;  %v307_v35 = vld [vmem:[%s3662_s16 + $0x90] sm:$0xff]  ;;  %v308_v36 = vld [vmem:[%s3662_s16 + $0x98] sm:$0xff]  ;;  %v309_v37 = vld [vmem:[%s3662_s16 + $0xa0] sm:$0xff] }
  0x8c   : > { %2460 = vmatpush3.bf16.msra.mxu0 %v2715_v2  ;;  %v310_v38 = vld [vmem:[%s3662_s16 + $0xa8] sm:$0xff]  ;;  %v330_v39 = vpack.c.bf16 %v308_v36, %v307_v35  ;;  %v311_v41 = vld [vmem:[%s3662_s16 + $0xb0] sm:$0xff]  ;;  %v312_v42 = vld [vmem:[%s3662_s16 + $0xb8] sm:$0xff] }
  0x8d   : > { %2461 = vmatprep.subr.bf16.mxu0 %v2716_v3  ;;  %v331_v40 = vpack.c.bf16 %v310_v38, %v309_v37  ;;  %v313_v43 = vld [vmem:[%s3662_s16 + $0xc0] sm:$0xff]  ;;  %v314_v44 = vld [vmem:[%s3662_s16 + $0xc8] sm:$0xff]  ;;  %v332_v45 = vpack.c.bf16 %v312_v42, %v311_v41  ;;  %v315_v47 = vld [vmem:[%s3662_s16 + $0xd0] sm:$0xff] }
  0x8e   : > { %v333_v46 = vpack.c.bf16 %v314_v44, %v313_v43  ;;  %v316_v48 = vld [vmem:[%s3662_s16 + $0xd8] sm:$0xff]  ;;  %v317_v49 = vld [vmem:[%s3662_s16 + $0xe0] sm:$0xff]  ;;  %v318_v50 = vld [vmem:[%s3662_s16 + $0xe8] sm:$0xff] }
  0x8f   : > { %v334_v51 = vpack.c.bf16 %v316_v48, %v315_v47  ;;  %v335_v52 = vpack.c.bf16 %v318_v50, %v317_v49  ;;  %v319_v53 = vld [vmem:[%s3662_s16 + $0xf0] sm:$0xff]  ;;  %v320_v54 = vld [vmem:[%s3662_s16 + $0xf8] sm:$0xff]  ;;  %v2721_v56 = vld [vmem:[#allocation7] sm:$0xff]  }
  0x90   : > { %2462 = vmatpush3.bf16.msra.mxu0 %v2716_v3  ;;  %v336_v55 = vpack.c.bf16 %v320_v54, %v319_v53  ;;  %2503 = vmatprep.subr.bf16.mxu1 %v2721_v56  ;;  %v2722_v57 = vld [vmem:[#allocation7 + $0x8] sm:$0xff]   ;;  %v2723_v58 = vld [vmem:[#allocation7 + $0x10] sm:$0xff]   ;;  %v2724_v59 = vld [vmem:[#allocation7 + $0x18] sm:$0xff]  }
  0x91   : > { %2463 = vmatprep.subr.bf16.mxu0 %v2717_v7  ;;  %2504 = vmatpush3.bf16.msra.mxu1 %v2721_v56  ;;  %v2725_v60 = vld [vmem:[#allocation7 + $0x20] sm:$0xff]   ;;  %v2726_v61 = vld [vmem:[#allocation7 + $0x28] sm:$0xff]   ;;  %v2727_v62 = vld [vmem:[#allocation7 + $0x30] sm:$0xff]  }
  0x92   : > { %2505 = vmatprep.subr.bf16.mxu1 %v2722_v57  ;;  %v2728_v63 = vld [vmem:[#allocation7 + $0x38] sm:$0xff]   ;;  %v2729_v0 = vld [vmem:[#allocation5 + $0x40] sm:$0xff]   ;;  %v2730_v1 = vld [vmem:[#allocation5 + $0x48] sm:$0xff]  }
  0x93   : > { %v2731_v2 = vld [vmem:[#allocation5 + $0x50] sm:$0xff]   ;;  %v3707_v3 = vld [vmem:[%s4625_s2] ss:$0 sm:$0xff] }
  0x94   : > { %2464 = vmatpush3.bf16.msra.mxu0 %v2717_v7 }
  0x95   : > { %2465 = vmatprep.subr.bf16.mxu0 %v2718_v8  ;;  %2506 = vmatpush3.bf16.msra.mxu1 %v2722_v57 }
  0x96   : > { %2507 = vmatprep.subr.bf16.mxu1 %v2723_v58 }
  0x98   : > { %2466 = vmatpush3.bf16.msra.mxu0 %v2718_v8 }
  0x99   : > { %2467 = vmatprep.subr.bf16.mxu0 %v2719_v9  ;;  %2508 = vmatpush3.bf16.msra.mxu1 %v2723_v58 }
  0x9a   : > { %2509 = vmatprep.subr.bf16.mxu1 %v2724_v59 }
  0x9c   : > { %2468 = vmatpush3.bf16.msra.mxu0 %v2719_v9 }
  0x9d   : > { %2469 = vmatprep.subr.bf16.mxu0 %v2720_v10  ;;  %2510 = vmatpush3.bf16.msra.mxu1 %v2724_v59 }
  0x9e   : > { %2511 = vmatprep.subr.bf16.mxu1 %v2725_v60 }
  0xa0   : > { %2470 = vmatpush3.bf16.msra.mxu0 %v2720_v10 }
  0xa1   : > { %2512 = vmatpush3.bf16.msra.mxu1 %v2725_v60  ;;  %2551 = vmatprep.subr.bf16.mxu0 %v2729_v0 }
  0xa2   : > { %2513 = vmatprep.subr.bf16.mxu1 %v2726_v61 }
  0xa3   : > { %2472 = vmatmul.mubr.bf16.vlgmr.msra.gmra.mrb[0].mxu0 %v322_v15 }
  0xa4   : > { %2475 = vmatprep.mubr.bf16.mxu0 %v323_v16  ;;  %2552 = vmatpush3.bf16.msra.mxu0 %v2729_v0 }
  0xa5   : > { %2514 = vmatpush3.bf16.msra.mxu1 %v2726_v61  ;;  %2553 = vmatprep.subr.bf16.mxu0 %v2730_v1 }
  0xa6   : > { %2515 = vmatprep.subr.bf16.mxu1 %v2727_v62 }
  0xa8   : > { %2554 = vmatpush3.bf16.msra.mxu0 %v2730_v1 }
  0xa9   : > { %2516 = vmatpush3.bf16.msra.mxu1 %v2727_v62  ;;  %2555 = vmatprep.subr.bf16.mxu0 %v2731_v2 }
  0xaa   : > { %2517 = vmatprep.subr.bf16.mxu1 %v2728_v63 }
  0xab   : > { %2476 = vmatmul.mubr.bf16.gmra.mrb[4].mxu0 %v324_v21 }
  0xac   : > { %2479 = vmatprep.mubr.bf16.mxu0 %v325_v22  ;;  %2556 = vmatpush3.bf16.msra.mxu0 %v2731_v2 }
  0xad   : > { %2518 = vmatpush3.bf16.msra.mxu1 %v2728_v63 }
  0xb3   : > { %2480 = vmatmul.mubr.bf16.gmra.mrb[8].mxu0 %v326_v27 }
  0xb4   : > { %2483 = vmatprep.mubr.bf16.mxu0 %v327_v28 }
  0xbb   : > { %2484 = vmatmul.mubr.bf16.gmra.mrb[12].mxu0 %v328_v33 }
  0xbc   : > { %2487 = vmatprep.mubr.bf16.mxu0 %v329_v34 }
  0xc3   : > { %2488 = vmatmul.mubr.bf16.gmra.mrb[16].mxu0 %v330_v39 }
  0xc4   : > { %2491 = vmatprep.mubr.bf16.mxu0 %v331_v40 }
  0xcb   : > { %2492 = vmatmul.mubr.bf16.gmra.mrb[20].mxu0 %v332_v45 }
  0xcc   : > { %2495 = vmatprep.mubr.bf16.mxu0 %v333_v46 }
  0xd3   : > { %2496 = vmatmul.mubr.bf16.gmra.mrb[24].mxu0 %v334_v51 }
  0xd4   : > { %2499 = vmatprep.mubr.bf16.mxu0 %v335_v52 }
  0xdb   : > { %2500 = vmatmul.mubr.bf16.gmra.mrb[28].mxu0 %v336_v55 }
 0x176   : > { %v2473_v4 = vpop.f32.mrb[0].mxu0 }
 0x177   : > { %v3710_v5 = vadd.f32 %v2473_v4, %v3707_v3  ;;  %v442_v6 = vpop.f32.mrb[1].mxu0 }
 0x178   : > { %v3713_v7 = vadd.f32 %v3707_v3, %v442_v6  ;;  %v2474_v8 = vpop.f32.mrb[2].mxu0 }
 0x179   : > { %v571_v9 = vsub.f32 0.0, %v3710_v5  ;;  %v3717_v10 = vadd.f32 %v2474_v8, %v3707_v3  ;;  %v445_v11 = vpop.f32.mrb[3].mxu0 }
 0x17a   : > { %v569_v12 = vsub.f32 0.0, %v3713_v7  ;;  %v3721_v13 = vadd.f32 %v3707_v3, %v445_v11 }
 0x17b   : > { %v605_v14 = vmul.f32 1.442695, %v571_v9  ;;  %v572_v15 = vsub.f32 0.0, %v3717_v10 }
 0x17c   : > { %v601_v16 = vmul.f32 1.442695, %v569_v12  ;;  %v570_v17 = vsub.f32 0.0, %v3721_v13 }
 0x17d   : > { %2745 = vpow2.f32 %v605_v14  ;;  %v607_v18 = vmul.f32 1.442695, %v572_v15 }
 0x17e   : > { %2747 = vpow2.f32 %v601_v16  ;;  %v603_v19 = vmul.f32 1.442695, %v570_v17  ;;  %v2477_v20 = vpop.f32.mrb[4].mxu0 }
 0x17f   : > { %2749 = vpow2.f32 %v607_v18  ;;  %v3726_v21 = vadd.f32 %v2477_v20, %v3707_v3  ;;  %v458_v22 = vpop.f32.mrb[5].mxu0 }
 0x180   : > { %2751 = vpow2.f32 %v603_v19  ;;  %v3729_v23 = vadd.f32 %v3707_v3, %v458_v22  ;;  %v2478_v24 = vpop.f32.mrb[6].mxu0 }
 0x181   : > { %v575_v25 = vsub.f32 0.0, %v3726_v21  ;;  %v3733_v26 = vadd.f32 %v2478_v24, %v3707_v3  ;;  %v461_v27 = vpop.f32.mrb[7].mxu0 }
 0x182   : > { %v573_v28 = vsub.f32 0.0, %v3729_v23  ;;  %v3737_v29 = vadd.f32 %v3707_v3, %v461_v27 }
 0x183   : > { %v613_v30 = vmul.f32 1.442695, %v575_v25  ;;  %v576_v31 = vsub.f32 0.0, %v3733_v26 }
 0x184   : > { %v609_v32 = vmul.f32 1.442695, %v573_v28  ;;  %v574_v33 = vsub.f32 0.0, %v3737_v29 }
 0x185   : > { %2753 = vpow2.f32 %v613_v30  ;;  %v615_v34 = vmul.f32 1.442695, %v576_v31 }
 0x186   : > { %2755 = vpow2.f32 %v609_v32  ;;  %v611_v35 = vmul.f32 1.442695, %v574_v33  ;;  %v2481_v36 = vpop.f32.mrb[8].mxu0 }
 0x187   : > { %v2746_v37 = vpop.eup %2745  ;;  %2757 = vpow2.f32 %v615_v34  ;;  %v3742_v38 = vadd.f32 %v2481_v36, %v3707_v3  ;;  %v474_v39 = vpop.f32.mrb[9].mxu0 }
 0x188   : > { %v2748_v40 = vpop.eup %2747  ;;  %v667_v41 = vadd.f32 1.0, %v2746_v37  ;;  %2759 = vpow2.f32 %v611_v35  ;;  %v3745_v42 = vadd.f32 %v3707_v3, %v474_v39  ;;  %v2482_v43 = vpop.f32.mrb[10].mxu0 }
 0x189   : > { %v2750_v44 = vpop.eup %2749  ;;  %v665_v45 = vadd.f32 1.0, %v2748_v40  ;;  %v579_v46 = vsub.f32 0.0, %v3742_v38  ;;  %v3749_v47 = vadd.f32 %v2482_v43, %v3707_v3  ;;  %v477_v48 = vpop.f32.mrb[11].mxu0 }
 0x18a   : > { %v2752_v49 = vpop.eup %2751  ;;  %2761 = vrcp.f32 %v667_v41  ;;  %v668_v50 = vadd.f32 1.0, %v2750_v44  ;;  %v577_v51 = vsub.f32 0.0, %v3745_v42  ;;  %v3753_v52 = vadd.f32 %v3707_v3, %v477_v48 }
 0x18b   : > { %2763 = vrcp.f32 %v665_v45  ;;  %v666_v53 = vadd.f32 1.0, %v2752_v49  ;;  %v621_v54 = vmul.f32 1.442695, %v579_v46  ;;  %v580_v55 = vsub.f32 0.0, %v3749_v47 }
 0x18c   : > { %2765 = vrcp.f32 %v668_v50  ;;  %v617_v56 = vmul.f32 1.442695, %v577_v51  ;;  %v578_v57 = vsub.f32 0.0, %v3753_v52 }
 0x18d   : > { %2767 = vrcp.f32 %v666_v53  ;;  %v623_v58 = vmul.f32 1.442695, %v580_v55 }
 0x18e   : > { %2769 = vpow2.f32 %v621_v54  ;;  %v619_v59 = vmul.f32 1.442695, %v578_v57  ;;  %v2485_v60 = vpop.f32.mrb[12].mxu0 }
 0x18f   : > { %v2754_v61 = vpop.eup %2753  ;;  %2771 = vpow2.f32 %v617_v56  ;;  %v3758_v62 = vadd.f32 %v2485_v60, %v3707_v3  ;;  %v490_v63 = vpop.f32.mrb[13].mxu0 }
 0x190   : > { %v2756_v0 = vpop.eup %2755  ;;  %v671_v1 = vadd.f32 1.0, %v2754_v61  ;;  %2773 = vpow2.f32 %v623_v58  ;;  %v3761_v2 = vadd.f32 %v3707_v3, %v490_v63  ;;  %v2486_v4 = vpop.f32.mrb[14].mxu0 }
 0x191   : > { %v2758_v6 = vpop.eup %2757  ;;  %v669_v8 = vadd.f32 1.0, %v2756_v0  ;;  %2775 = vpow2.f32 %v619_v59  ;;  %v583_v9 = vsub.f32 0.0, %v3758_v62  ;;  %v3765_v11 = vadd.f32 %v2486_v4, %v3707_v3  ;;  %v493_v12 = vpop.f32.mrb[15].mxu0 }
 0x192   : > { %v2760_v14 = vpop.eup %2759  ;;  %2777 = vrcp.f32 %v671_v1  ;;  %v672_v15 = vadd.f32 1.0, %v2758_v6  ;;  %v581_v16 = vsub.f32 0.0, %v3761_v2  ;;  %v3769_v17 = vadd.f32 %v3707_v3, %v493_v12 }
 0x193   : > { %2779 = vrcp.f32 %v669_v8  ;;  %v670_v18 = vadd.f32 1.0, %v2760_v14  ;;  %v629_v19 = vmul.f32 1.442695, %v583_v9  ;;  %v584_v20 = vsub.f32 0.0, %v3765_v11 }
 0x194   : > { %v2762_v22 = vpop.eup %2761  ;;  %2781 = vrcp.f32 %v672_v15  ;;  %v625_v24 = vmul.f32 1.442695, %v581_v16  ;;  %v582_v25 = vsub.f32 0.0, %v3769_v17 }
 0x195   : > { %v2764_v27 = vpop.eup %2763  ;;  %2783 = vrcp.f32 %v670_v18  ;;  %v631_v28 = vmul.f32 1.442695, %v584_v20  ;;  %v731_v34 = vmul.f32 %v2762_v22, %v3710_v5 }
 0x196   : > { %v2766_v30 = vpop.eup %2765  ;;  %2785 = vpow2.f32 %v629_v19  ;;  %v627_v31 = vmul.f32 1.442695, %v582_v25  ;;  %v2489_v32 = vpop.f32.mrb[16].mxu0  ;;  %v729_v37 = vmul.f32 %v2764_v27, %v3713_v7 }
 0x197   : > { %v2768_v33 = vpop.eup %2767  ;;  %2787 = vpow2.f32 %v625_v24  ;;  %v3775_v35 = vadd.f32 %v2489_v32, %v3707_v3  ;;  %v506_v36 = vpop.f32.mrb[17].mxu0  ;;  %v732_v40 = vmul.f32 %v2766_v30, %v3717_v10 }
 0x198   : > { %v2770_v39 = vpop.eup %2769  ;;  %2789 = vpow2.f32 %v631_v28  ;;  %v3780_v41 = vadd.f32 %v3707_v3, %v506_v36  ;;  %v2490_v43 = vpop.f32.mrb[18].mxu0  ;;  %v730_v44 = vmul.f32 %v2768_v33, %v3721_v13 }
 0x199   : > { %v2772_v45 = vpop.eup %2771  ;;  %v675_v46 = vadd.f32 1.0, %v2770_v39  ;;  %2791 = vpow2.f32 %v627_v31  ;;  %v587_v5 = vsub.f32 0.0, %v3775_v35  ;;  %v3785_v48 = vadd.f32 %v2490_v43, %v3707_v3  ;;  %v509_v49 = vpop.f32.mrb[19].mxu0 }
 0x19a   : > { %v2774_v7 = vpop.eup %2773  ;;  %v673_v50 = vadd.f32 1.0, %v2772_v45  ;;  %v585_v10 = vsub.f32 0.0, %v3780_v41  ;;  %v3789_v51 = vadd.f32 %v3707_v3, %v509_v49  ;;  %v761_v53 = vpack.c.bf16 %v730_v44, %v729_v37 }
 0x19b   : > { %v2776_v54 = vpop.eup %2775  ;;  %2793 = vrcp.f32 %v675_v46  ;;  %v676_v13 = vadd.f32 1.0, %v2774_v7  ;;  %v637_v55 = vmul.f32 1.442695, %v587_v5  ;;  %v588_v56 = vsub.f32 0.0, %v3785_v48 }
 0x19c   : > { %v2778_v57 = vpop.eup %2777  ;;  %2795 = vrcp.f32 %v673_v50  ;;  %v674_v58 = vadd.f32 1.0, %v2776_v54  ;;  %v633_v59 = vmul.f32 1.442695, %v585_v10  ;;  %v586_v60 = vsub.f32 0.0, %v3789_v51  ;;  %2519 = vmatprep.mubr.bf16.mxu1 %v761_v53 }
 0x19d   : > { %v2780_v61 = vpop.eup %2779  ;;  %2797 = vrcp.f32 %v676_v13  ;;  %v639_v63 = vmul.f32 1.442695, %v588_v56  ;;  %v762_v0 = vpack.c.bf16 %v732_v40, %v731_v34  ;;  %v735_v9 = vmul.f32 %v2778_v57, %v3726_v21 }
 0x19e   : > { %v2782_v1 = vpop.eup %2781  ;;  %2799 = vrcp.f32 %v674_v58  ;;  %v635_v4 = vmul.f32 1.442695, %v586_v60  ;;  %v2493_v6 = vpop.f32.mrb[20].mxu0  ;;  %v733_v12 = vmul.f32 %v2780_v61, %v3729_v23 }
 0x19f   : > { %v2784_v8 = vpop.eup %2783  ;;  %2801 = vpow2.f32 %v637_v55  ;;  %2520 = vmatmul.mubr.bf16.vlgmr.msra.gmra.mrb[0].mxu1 %v762_v0  ;;  %v3796_v14 = vadd.f32 %v2493_v6, %v3707_v3  ;;  %v522_v15 = vpop.f32.mrb[21].mxu0  ;;  %v736_v18 = vmul.f32 %v2782_v1, %v3733_v26 }
 0x1a0   : > { %v2786_v16 = vpop.eup %2785  ;;  %v734_v19 = vmul.f32 %v2784_v8, %v3737_v29  ;;  %2803 = vpow2.f32 %v633_v59  ;;  %v3801_v20 = vadd.f32 %v3707_v3, %v522_v15  ;;  %v2494_v22 = vpop.f32.mrb[22].mxu0 }
 0x1a1   : > { %v2788_v24 = vpop.eup %2787  ;;  %v679_v21 = vadd.f32 1.0, %v2786_v16  ;;  %2805 = vpow2.f32 %v639_v63  ;;  %v591_v23 = vsub.f32 0.0, %v3796_v14  ;;  %v3805_v25 = vadd.f32 %v2494_v22, %v3707_v3  ;;  %v525_v27 = vpop.f32.mrb[23].mxu0 }
 0x1a2   : > { %v2790_v28 = vpop.eup %2789  ;;  %v677_v30 = vadd.f32 1.0, %v2788_v24  ;;  %2807 = vpow2.f32 %v635_v4  ;;  %v589_v26 = vsub.f32 0.0, %v3801_v20  ;;  %v3809_v29 = vadd.f32 %v3707_v3, %v525_v27 }
 0x1a3   : > { %v2792_v31 = vpop.eup %2791  ;;  %2809 = vrcp.f32 %v679_v21  ;;  %v680_v32 = vadd.f32 1.0, %v2790_v28  ;;  %v645_v33 = vmul.f32 1.442695, %v591_v23  ;;  %v592_v34 = vsub.f32 0.0, %v3805_v25 }
 0x1a4   : > { %2811 = vrcp.f32 %v677_v30  ;;  %v678_v36 = vadd.f32 1.0, %v2792_v31  ;;  %v641_v37 = vmul.f32 1.442695, %v589_v26  ;;  %v590_v39 = vsub.f32 0.0, %v3809_v29 }
 0x1a5   : > { %v2794_v40 = vpop.eup %2793  ;;  %2813 = vrcp.f32 %v680_v32  ;;  %v647_v43 = vmul.f32 1.442695, %v592_v34  ;;  %v763_v44 = vpack.c.bf16 %v734_v19, %v733_v12  ;;  %v764_v45 = vpack.c.bf16 %v736_v18, %v735_v9 }
 0x1a6   : > { %v2796_v46 = vpop.eup %2795  ;;  %2815 = vrcp.f32 %v678_v36  ;;  %v643_v5 = vmul.f32 1.442695, %v590_v39  ;;  %v2497_v49 = vpop.f32.mrb[24].mxu0  ;;  %v739_v4 = vmul.f32 %v2794_v40, %v3742_v38 }
 0x1a7   : > { %v2798_v7 = vpop.eup %2797  ;;  %2817 = vpow2.f32 %v645_v33  ;;  %2523 = vmatprep.mubr.bf16.mxu1 %v763_v44  ;;  %v3814_v50 = vadd.f32 %v2497_v49, %v3707_v3  ;;  %v538_v10 = vpop.f32.mrb[25].mxu0  ;;  %v737_v54 = vmul.f32 %v2796_v46, %v3745_v42 }
 0x1a8   : > { %v2800_v53 = vpop.eup %2799  ;;  %v740_v13 = vmul.f32 %v2798_v7, %v3749_v47  ;;  %2819 = vpow2.f32 %v641_v37  ;;  %2524 = vmatmul.mubr.bf16.gmra.mrb[4].mxu1 %v764_v45  ;;  %v3819_v55 = vadd.f32 %v3707_v3, %v538_v10  ;;  %v2498_v56 = vpop.f32.mrb[26].mxu0 }
 0x1a9   : > { %v2802_v57 = vpop.eup %2801  ;;  %v738_v58 = vmul.f32 %v2800_v53, %v3753_v52  ;;  %2821 = vpow2.f32 %v647_v43  ;;  %v595_v59 = vsub.f32 0.0, %v3814_v50  ;;  %v3824_v60 = vadd.f32 %v2498_v56, %v3707_v3  ;;  %v541_v61 = vpop.f32.mrb[27].mxu0 }
 0x1aa   : > { %v2804_v63 = vpop.eup %2803  ;;  %v683_v42 = vadd.f32 1.0, %v2802_v57  ;;  %2823 = vpow2.f32 %v643_v5  ;;  %v593_v47 = vsub.f32 0.0, %v3819_v55  ;;  %v3828_v0 = vadd.f32 %v3707_v3, %v541_v61 }
 0x1ab   : > { %v2806_v1 = vpop.eup %2805  ;;  %v681_v6 = vadd.f32 1.0, %v2804_v63  ;;  %v596_v52 = vsub.f32 0.0, %v3824_v60  ;;  %v765_v8 = vpack.c.bf16 %v738_v58, %v737_v54  ;;  %v653_v15 = vmul.f32 1.442695, %v595_v59 }
 0x1ac   : > { %v2808_v9 = vpop.eup %2807  ;;  %2825 = vrcp.f32 %v683_v42  ;;  %v684_v12 = vadd.f32 1.0, %v2806_v1  ;;  %v594_v16 = vsub.f32 0.0, %v3828_v0  ;;  %v649_v22 = vmul.f32 1.442695, %v593_v47 }
 0x1ad   : > { %v2810_v18 = vpop.eup %2809  ;;  %2827 = vrcp.f32 %v681_v6  ;;  %v682_v19 = vadd.f32 1.0, %v2808_v9  ;;  %2527 = vmatprep.mubr.bf16.mxu1 %v765_v8  ;;  %v766_v24 = vpack.c.bf16 %v740_v13, %v739_v4  ;;  %v655_v23 = vmul.f32 1.442695, %v596_v52 }
 0x1ae   : > { %v2812_v21 = vpop.eup %2811  ;;  %2829 = vrcp.f32 %v684_v12  ;;  %v2501_v38 = vpop.f32.mrb[28].mxu0  ;;  %v651_v28 = vmul.f32 1.442695, %v594_v16  ;;  %v743_v32 = vmul.f32 %v2810_v18, %v3758_v62 }
 0x1af   : > { %v2814_v27 = vpop.eup %2813  ;;  %2831 = vrcp.f32 %v682_v19  ;;  %v3834_v30 = vadd.f32 %v2501_v38, %v3707_v3  ;;  %v554_v26 = vpop.f32.mrb[29].mxu0  ;;  %v741_v49 = vmul.f32 %v2812_v21, %v3761_v2 }
 0x1b0   : > { %v2816_v31 = vpop.eup %2815  ;;  %v744_v33 = vmul.f32 %v2814_v27, %v3765_v11  ;;  %2833 = vpow2.f32 %v653_v15  ;;  %2528 = vmatmul.mubr.bf16.gmra.mrb[8].mxu1 %v766_v24  ;;  %v3839_v34 = vadd.f32 %v3707_v3, %v554_v26  ;;  %v2502_v36 = vpop.f32.mrb[30].mxu0 }
 0x1b1   : > { %v2818_v37 = vpop.eup %2817  ;;  %v742_v39 = vmul.f32 %v2816_v31, %v3769_v17  ;;  %2835 = vpow2.f32 %v649_v22  ;;  %v599_v40 = vsub.f32 0.0, %v3834_v30  ;;  %v3844_v43 = vadd.f32 %v2502_v36, %v3707_v3  ;;  %v557_v44 = vpop.f32.mrb[31].mxu0 }
 0x1b2   : > { %v2820_v45 = vpop.eup %2819  ;;  %v687_v62 = vadd.f32 1.0, %v2818_v37  ;;  %2837 = vpow2.f32 %v655_v23  ;;  %v597_v11 = vsub.f32 0.0, %v3839_v34  ;;  %v3848_v46 = vadd.f32 %v3707_v3, %v557_v44 }
 0x1b3   : > { %v2822_v5 = vpop.eup %2821  ;;  %v685_v7 = vadd.f32 1.0, %v2820_v45  ;;  %2839 = vpow2.f32 %v651_v28  ;;  %v600_v17 = vsub.f32 0.0, %v3844_v43  ;;  %v661_v54 = vmul.f32 1.442695, %v599_v40 }
 0x1b4   : > { %v2824_v10 = vpop.eup %2823  ;;  %2841 = vrcp.f32 %v687_v62  ;;  %v688_v53 = vadd.f32 1.0, %v2822_v5  ;;  %v598_v13 = vsub.f32 0.0, %v3848_v46  ;;  %v657_v57 = vmul.f32 1.442695, %v597_v11 }
 0x1b5   : > { %2843 = vrcp.f32 %v685_v7  ;;  %v686_v56 = vadd.f32 1.0, %v2824_v10  ;;  %v767_v58 = vpack.c.bf16 %v742_v39, %v741_v49  ;;  %v663_v3 = vmul.f32 1.442695, %v600_v17 }
 0x1b6   : > { %v2826_v59 = vpop.eup %2825  ;;  %2845 = vrcp.f32 %v688_v53  ;;  %v768_v61 = vpack.c.bf16 %v744_v33, %v743_v32  ;;  %v659_v2 = vmul.f32 1.442695, %v598_v13 }
 0x1b7   : > { %v2828_v63 = vpop.eup %2827  ;;  %2847 = vrcp.f32 %v686_v56  ;;  %2531 = vmatprep.mubr.bf16.mxu1 %v767_v58  ;;  %v747_v1 = vmul.f32 %v2826_v59, %v3775_v35  ;;  %v2733_v59 = vld [vmem:[#allocation5 + $0x60] sm:$0xff]  }
 0x1b8   : > { %v2830_v42 = vpop.eup %2829  ;;  %2849 = vpow2.f32 %v661_v54  ;;  %2532 = vmatmul.mubr.bf16.gmra.mrb[12].mxu1 %v768_v61  ;;  %v745_v52 = vmul.f32 %v2828_v63, %v3780_v41  ;;  %v2739_v61 = vld [vmem:[#allocation7 + $0x50] sm:$0xff]   ;;  %v2740_v63 = vld [vmem:[#allocation7 + $0x58] sm:$0xff]  }
 0x1b9   : > { %v2832_v47 = vpop.eup %2831  ;;  %v748_v4 = vmul.f32 %v2830_v42, %v3785_v48  ;;  %2851 = vpow2.f32 %v657_v57 }
 0x1ba   : > { %v2834_v6 = vpop.eup %2833  ;;  %v746_v8 = vmul.f32 %v2832_v47, %v3789_v51  ;;  %2853 = vpow2.f32 %v663_v3  ;;  %v2734_v3 = vld [vmem:[#allocation5 + $0x68] sm:$0xff]  }
 0x1bb   : > { %v2836_v9 = vpop.eup %2835  ;;  %v691_v12 = vadd.f32 1.0, %v2834_v6  ;;  %2855 = vpow2.f32 %v659_v2  ;;  %v770_v15 = vpack.c.bf16 %v748_v4, %v747_v1  ;;  %v3872_v2 = vld [vmem:[%s4627_s4] ss:$0 sm:$0xff] }
 0x1bc   : > { %v2838_v16 = vpop.eup %2837  ;;  %v689_v18 = vadd.f32 1.0, %v2836_v9  ;;  %v769_v19 = vpack.c.bf16 %v746_v8, %v745_v52 }
 0x1bd   : > { %v2840_v22 = vpop.eup %2839  ;;  %2857 = vrcp.f32 %v691_v12  ;;  %v692_v24 = vadd.f32 1.0, %v2838_v16 }
 0x1be   : > { %v2842_v35 = vpop.eup %2841  ;;  %2859 = vrcp.f32 %v689_v18  ;;  %v690_v48 = vadd.f32 1.0, %v2840_v22  ;;  %2535 = vmatprep.mubr.bf16.mxu1 %v769_v19 }
 0x1bf   : > { %v2844_v21 = vpop.eup %2843  ;;  %2861 = vrcp.f32 %v692_v24  ;;  %v751_v23 = vmul.f32 %v2842_v35, %v3796_v14 }
 0x1c0   : > { %v2846_v41 = vpop.eup %2845  ;;  %2863 = vrcp.f32 %v690_v48  ;;  %2536 = vmatmul.mubr.bf16.gmra.mrb[16].mxu1 %v770_v15  ;;  %v749_v28 = vmul.f32 %v2844_v21, %v3801_v20 }
 0x1c1   : > { %v2848_v51 = vpop.eup %2847  ;;  %v752_v38 = vmul.f32 %v2846_v41, %v3805_v25 }
 0x1c2   : > { %v2850_v27 = vpop.eup %2849  ;;  %v750_v26 = vmul.f32 %v2848_v51, %v3809_v29 }
 0x1c3   : > { %v2852_v31 = vpop.eup %2851  ;;  %v695_v32 = vadd.f32 1.0, %v2850_v27  ;;  %v772_v33 = vpack.c.bf16 %v752_v38, %v751_v23 }
 0x1c4   : > { %v2854_v36 = vpop.eup %2853  ;;  %v693_v37 = vadd.f32 1.0, %v2852_v31  ;;  %v771_v39 = vpack.c.bf16 %v750_v26, %v749_v28 }
 0x1c5   : > { %v2856_v40 = vpop.eup %2855  ;;  %2865 = vrcp.f32 %v695_v32  ;;  %v696_v44 = vadd.f32 1.0, %v2854_v36 }
 0x1c6   : > { %2867 = vrcp.f32 %v693_v37  ;;  %v694_v45 = vadd.f32 1.0, %v2856_v40  ;;  %2539 = vmatprep.mubr.bf16.mxu1 %v771_v39 }
 0x1c7   : > { %v2858_v14 = vpop.eup %2857  ;;  %2869 = vrcp.f32 %v696_v44 }
 0x1c8   : > { %v2860_v25 = vpop.eup %2859  ;;  %2871 = vrcp.f32 %v694_v45  ;;  %2540 = vmatmul.mubr.bf16.gmra.mrb[20].mxu1 %v772_v33  ;;  %v755_v29 = vmul.f32 %v2858_v14, %v3814_v50 }
 0x1c9   : > { %v2862_v20 = vpop.eup %2861  ;;  %v753_v5 = vmul.f32 %v2860_v25, %v3819_v55 }
 0x1ca   : > { %v2864_v62 = vpop.eup %2863  ;;  %v756_v11 = vmul.f32 %v2862_v20, %v3824_v60 }
 0x1cb   : > { %v754_v49 = vmul.f32 %v2864_v62, %v3828_v0  ;;  %v2732_v0 = vld [vmem:[#allocation5 + $0x58] sm:$0xff]  }
 0x1cc   : > { %v774_v7 = vpack.c.bf16 %v756_v11, %v755_v29  ;;  %2557 = vmatprep.subr.bf16.mxu0 %v2732_v0 }
 0x1cd   : > { %v773_v17 = vpack.c.bf16 %v754_v49, %v753_v5  ;;  %2558 = vmatpush3.bf16.msra.mxu0 %v2732_v0 }
 0x1ce   : > { %2559 = vmatprep.subr.bf16.mxu0 %v2733_v59 }
 0x1cf   : > { %v2866_v10 = vpop.eup %2865  ;;  %2543 = vmatprep.mubr.bf16.mxu1 %v773_v17 }
 0x1d0   : > { %v2868_v53 = vpop.eup %2867  ;;  %2544 = vmatmul.mubr.bf16.gmra.mrb[24].mxu1 %v774_v7  ;;  %v759_v56 = vmul.f32 %v2866_v10, %v3834_v30  ;;  %v2735_v30 = vld [vmem:[#allocation5 + $0x70] sm:$0xff]  }
 0x1d1   : > { %v2870_v54 = vpop.eup %2869  ;;  %v757_v50 = vmul.f32 %v2868_v53, %v3839_v34  ;;  %2560 = vmatpush3.bf16.msra.mxu0 %v2733_v59  ;;  %v2737_v34 = vld [vmem:[#allocation7 + $0x40] sm:$0xff]  }
 0x1d2   : > { %v2872_v13 = vpop.eup %2871  ;;  %v760_v57 = vmul.f32 %v2870_v54, %v3844_v43  ;;  %2561 = vmatprep.subr.bf16.mxu0 %v2734_v3  ;;  %v2736_v43 = vld [vmem:[#allocation5 + $0x78] sm:$0xff]   ;;  %2599 = vmatprep.subr.bf16.mxu1 %v2737_v34 }
 0x1d3   : > { %v758_v60 = vmul.f32 %v2872_v13, %v3848_v46  ;;  %v2738_v46 = vld [vmem:[#allocation7 + $0x48] sm:$0xff]   ;;  %2600 = vmatpush3.bf16.msra.mxu1 %v2737_v34 }
 0x1d4   : > { %v776_v58 = vpack.c.bf16 %v760_v57, %v759_v56  ;;  %2601 = vmatprep.subr.bf16.mxu1 %v2738_v46 }
 0x1d5   : > { %v775_v55 = vpack.c.bf16 %v758_v60, %v757_v50  ;;  %2562 = vmatpush3.bf16.msra.mxu0 %v2734_v3 }
 0x1d6   : > { %2563 = vmatprep.subr.bf16.mxu0 %v2735_v30 }
 0x1d7   : > { %2547 = vmatprep.mubr.bf16.mxu1 %v775_v55  ;;  %2602 = vmatpush3.bf16.msra.mxu1 %v2738_v46 }
 0x1d8   : > { %2548 = vmatmul.mubr.bf16.gmra.mrb[28].mxu1 %v776_v58  ;;  %2603 = vmatprep.subr.bf16.mxu1 %v2739_v61 }
 0x1d9   : > { %2564 = vmatpush3.bf16.msra.mxu0 %v2735_v30 }
 0x1da   : > { %2565 = vmatprep.subr.bf16.mxu0 %v2736_v43 }
 0x1db   : > { %2604 = vmatpush3.bf16.msra.mxu1 %v2739_v61 }
 0x1dc   : > { %2605 = vmatprep.subr.bf16.mxu1 %v2740_v63 }
 0x1dd   : > { %2566 = vmatpush3.bf16.msra.mxu0 %v2736_v43 }
 0x1df   : > { %2606 = vmatpush3.bf16.msra.mxu1 %v2740_v63 }
 0x272   : > { %v2521_v42 = vpop.f32.mrb[0].mxu1 }
 0x273   : > { %v3875_v47 = vadd.f32 %v2521_v42, %v3872_v2  ;;  %v882_v1 = vpop.f32.mrb[1].mxu1 }
 0x274   : > { %v3878_v4 = vadd.f32 %v3872_v2, %v882_v1  ;;  %v2522_v6 = vpop.f32.mrb[2].mxu1 }
 0x275   : > { %v1011_v52 = vsub.f32 0.0, %v3875_v47  ;;  %v3882_v8 = vadd.f32 %v2522_v6, %v3872_v2  ;;  %v885_v9 = vpop.f32.mrb[3].mxu1 }
 0x276   : > { %v1009_v12 = vsub.f32 0.0, %v3878_v4  ;;  %v3886_v15 = vadd.f32 %v3872_v2, %v885_v9 }
 0x277   : > { %v1045_v16 = vmul.f32 1.442695, %v1011_v52  ;;  %v1012_v18 = vsub.f32 0.0, %v3882_v8 }
 0x278   : > { %v1041_v19 = vmul.f32 1.442695, %v1009_v12  ;;  %v1010_v22 = vsub.f32 0.0, %v3886_v15 }
 0x279   : > { %2873 = vpow2.f32 %v1045_v16  ;;  %v1047_v24 = vmul.f32 1.442695, %v1012_v18 }
 0x27a   : > { %2875 = vpow2.f32 %v1041_v19  ;;  %v1043_v35 = vmul.f32 1.442695, %v1010_v22 }
 0x27b   : > { %2877 = vpow2.f32 %v1047_v24  ;;  %v2525_v48 = vpop.f32.mrb[4].mxu1 }
 0x27c   : > { %2879 = vpow2.f32 %v1043_v35  ;;  %v3891_v21 = vadd.f32 %v2525_v48, %v3872_v2  ;;  %v898_v41 = vpop.f32.mrb[5].mxu1 }
 0x27d   : > { %v3894_v51 = vadd.f32 %v3872_v2, %v898_v41  ;;  %v2526_v23 = vpop.f32.mrb[6].mxu1 }
 0x27e   : > { %v1015_v38 = vsub.f32 0.0, %v3891_v21  ;;  %v3898_v27 = vadd.f32 %v2526_v23, %v3872_v2  ;;  %v901_v28 = vpop.f32.mrb[7].mxu1 }
 0x27f   : > { %v1013_v26 = vsub.f32 0.0, %v3894_v51  ;;  %v3902_v31 = vadd.f32 %v3872_v2, %v901_v28 }
 0x280   : > { %v1053_v32 = vmul.f32 1.442695, %v1015_v38  ;;  %v1016_v33 = vsub.f32 0.0, %v3898_v27 }
 0x281   : > { %v1049_v36 = vmul.f32 1.442695, %v1013_v26  ;;  %v1014_v37 = vsub.f32 0.0, %v3902_v31 }
 0x282   : > { %2881 = vpow2.f32 %v1053_v32  ;;  %v1055_v39 = vmul.f32 1.442695, %v1016_v33 }
 0x283   : > { %v2874_v40 = vpop.eup %2873  ;;  %2883 = vpow2.f32 %v1049_v36  ;;  %v1051_v44 = vmul.f32 1.442695, %v1014_v37  ;;  %v2529_v45 = vpop.f32.mrb[8].mxu1 }
 0x284   : > { %v2876_v14 = vpop.eup %2875  ;;  %v1107_v25 = vadd.f32 1.0, %v2874_v40  ;;  %2885 = vpow2.f32 %v1055_v39  ;;  %v3907_v20 = vadd.f32 %v2529_v45, %v3872_v2  ;;  %v914_v62 = vpop.f32.mrb[9].mxu1 }
 0x285   : > { %v2878_v29 = vpop.eup %2877  ;;  %v1105_v11 = vadd.f32 1.0, %v2876_v14  ;;  %2887 = vpow2.f32 %v1051_v44  ;;  %v3910_v5 = vadd.f32 %v3872_v2, %v914_v62  ;;  %v2530_v49 = vpop.f32.mrb[10].mxu1  ;;  %v3257_v14 = vld [vmem:[%s3662_s16 + $0x10] sm:$0xff] }
 0x286   : > { %v2880_v7 = vpop.eup %2879  ;;  %2889 = vrcp.f32 %v1107_v25  ;;  %v1108_v17 = vadd.f32 1.0, %v2878_v29  ;;  %v1019_v10 = vsub.f32 0.0, %v3907_v20  ;;  %v3914_v53 = vadd.f32 %v2530_v49, %v3872_v2  ;;  %v917_v54 = vpop.f32.mrb[11].mxu1 }
 0x287   : > { %2891 = vrcp.f32 %v1105_v11  ;;  %v1106_v13 = vadd.f32 1.0, %v2880_v7  ;;  %v1017_v56 = vsub.f32 0.0, %v3910_v5  ;;  %v3918_v57 = vadd.f32 %v3872_v2, %v917_v54  ;;  %v3259_v54 = vld [vmem:[%s3662_s16 + $0x8] sm:$0xff] }
 0x288   : > { %2893 = vrcp.f32 %v1108_v17  ;;  %v1061_v50 = vmul.f32 1.442695, %v1019_v10  ;;  %v1020_v60 = vsub.f32 0.0, %v3914_v53 }
 0x289   : > { %2895 = vrcp.f32 %v1106_v13  ;;  %v1057_v58 = vmul.f32 1.442695, %v1017_v56  ;;  %v1018_v55 = vsub.f32 0.0, %v3918_v57 }
 0x28a   : > { %2897 = vpow2.f32 %v1061_v50  ;;  %v1063_v0 = vmul.f32 1.442695, %v1020_v60 }
 0x28b   : > { %2899 = vpow2.f32 %v1057_v58  ;;  %v1059_v59 = vmul.f32 1.442695, %v1018_v55  ;;  %v2533_v3 = vpop.f32.mrb[12].mxu1  ;;  %v3260_v58 = vld [vmem:[%s3662_s16] sm:$0xff] }
 0x28c   : > { %v2882_v30 = vpop.eup %2881  ;;  %2901 = vpow2.f32 %v1063_v0  ;;  %v3923_v43 = vadd.f32 %v2533_v3, %v3872_v2  ;;  %v930_v34 = vpop.f32.mrb[13].mxu1 }
 0x28d   : > { %v2884_v46 = vpop.eup %2883  ;;  %v1111_v61 = vadd.f32 1.0, %v2882_v30  ;;  %2903 = vpow2.f32 %v1059_v59  ;;  %v3926_v63 = vadd.f32 %v3872_v2, %v930_v34  ;;  %v2534_v42 = vpop.f32.mrb[14].mxu1 }
 0x28e   : > { %v2886_v1 = vpop.eup %2885  ;;  %v1109_v6 = vadd.f32 1.0, %v2884_v46  ;;  %v1023_v52 = vsub.f32 0.0, %v3923_v43  ;;  %v3930_v9 = vadd.f32 %v2534_v42, %v3872_v2  ;;  %v933_v12 = vpop.f32.mrb[15].mxu1 }
 0x28f   : > { %v2888_v16 = vpop.eup %2887  ;;  %2905 = vrcp.f32 %v1111_v61  ;;  %v1112_v18 = vadd.f32 1.0, %v2886_v1  ;;  %v1021_v19 = vsub.f32 0.0, %v3926_v63  ;;  %v3934_v22 = vadd.f32 %v3872_v2, %v933_v12 }
 0x290   : > { %v2890_v24 = vpop.eup %2889  ;;  %2907 = vrcp.f32 %v1109_v6  ;;  %v1110_v35 = vadd.f32 1.0, %v2888_v16  ;;  %v1069_v48 = vmul.f32 1.442695, %v1023_v52  ;;  %v1024_v41 = vsub.f32 0.0, %v3930_v9 }
 0x291   : > { %v2892_v23 = vpop.eup %2891  ;;  %v1171_v38 = vmul.f32 %v2890_v24, %v3875_v47  ;;  %2909 = vrcp.f32 %v1112_v18  ;;  %v1065_v28 = vmul.f32 1.442695, %v1021_v19  ;;  %v1022_v26 = vsub.f32 0.0, %v3934_v22 }
 0x292   : > { %v2894_v32 = vpop.eup %2893  ;;  %2911 = vrcp.f32 %v1110_v35  ;;  %v1071_v33 = vmul.f32 1.442695, %v1024_v41  ;;  %v1169_v37 = vmul.f32 %v2892_v23, %v3878_v4  ;;  %v3258_v4 = vld [vmem:[%s3662_s16 + $0x18] sm:$0xff] }
 0x293   : > { %v2896_v36 = vpop.eup %2895  ;;  %v1172_v39 = vmul.f32 %v2894_v32, %v3882_v8  ;;  %2913 = vpow2.f32 %v1069_v48  ;;  %v1067_v40 = vmul.f32 1.442695, %v1022_v26  ;;  %v2537_v44 = vpop.f32.mrb[16].mxu1  ;;  %v3942_v47 = vadd.f32 %v3257_v14, %v1171_v38  ;;  %v3262_v14 = vld [vmem:[%s3662_s16 + $0x28] sm:$0xff] }
 0x294   : > { %v2898_v45 = vpop.eup %2897  ;;  %v1170_v25 = vmul.f32 %v2896_v36, %v3886_v15  ;;  %2915 = vpow2.f32 %v1065_v28  ;;  %v3946_v62 = vadd.f32 %v2537_v44, %v3872_v2  ;;  %v946_v29 = vpop.f32.mrb[17].mxu1  ;;  %v3959_v55 = vadd.f32 %v3260_v58, %v1169_v37  ;;  %v3261_v37 = vld [vmem:[%s3662_s16 + $0x20] sm:$0xff] }
 0x295   : > { %v2900_v11 = vpop.eup %2899  ;;  %v3949_v49 = vadd.f32 %v3258_v4, %v1172_v39  ;;  %v1115_v8 = vadd.f32 1.0, %v2898_v45  ;;  %2917 = vpow2.f32 %v1071_v33  ;;  %v3952_v7 = vadd.f32 %v3872_v2, %v946_v29  ;;  %v2538_v17 = vpop.f32.mrb[18].mxu1 }
 0x296   : > { %v2902_v10 = vpop.eup %2901  ;;  %v3955_v13 = vadd.f32 %v3259_v54, %v1170_v25  ;;  %v1113_v15 = vadd.f32 1.0, %v2900_v11  ;;  %2919 = vpow2.f32 %v1067_v40  ;;  %v1027_v56 = vsub.f32 0.0, %v3946_v62  ;;  %v949_v50 = vpop.f32.mrb[19].mxu1 }
 0x297   : > { %v2904_v60 = vpop.eup %2903  ;;  %2921 = vrcp.f32 %v1115_v8  ;;  %v1116_v0 = vadd.f32 1.0, %v2902_v10  ;;  %v1025_v59 = vsub.f32 0.0, %v3952_v7  ;;  %v3963_v34 = vadd.f32 %v2538_v17, %v3872_v2 }
 0x298   : > { %2923 = vrcp.f32 %v1113_v15  ;;  %v1114_v3 = vadd.f32 1.0, %v2904_v60  ;;  %v1077_v30 = vmul.f32 1.442695, %v1027_v56  ;;  %v3966_v42 = vadd.f32 %v3872_v2, %v949_v50  ;;  %v3263_v50 = vld [vmem:[%s3662_s16 + $0x30] sm:$0xff] }
 0x299   : > { %v2906_v46 = vpop.eup %2905  ;;  %2925 = vrcp.f32 %v1116_v0  ;;  %v1073_v61 = vmul.f32 1.442695, %v1025_v59  ;;  %v1233_v1 = vpack.c.bf16 %v3955_v13, %v3959_v55  ;;  %v1234_v52 = vpack.c.bf16 %v3949_v49, %v3942_v47 }
 0x29a   : > { %v2908_v6 = vpop.eup %2907  ;;  %2927 = vrcp.f32 %v1114_v3  ;;  %v1028_v12 = vsub.f32 0.0, %v3963_v34  ;;  %v1026_v19 = vsub.f32 0.0, %v3966_v42  ;;  %v1175_v48 = vmul.f32 %v2906_v46, %v3891_v21 }
 0x29b   : > { %v2910_v16 = vpop.eup %2909  ;;  %v1173_v18 = vmul.f32 %v2908_v6, %v3894_v51  ;;  %2929 = vpow2.f32 %v1077_v30  ;;  %v2541_v24 = vpop.f32.mrb[20].mxu1  ;;  %2567 = vmatprep.mubr.bf16.mxu0 %v1233_v1  ;;  %v3264_v6 = vld [vmem:[%s3662_s16 + $0x38] sm:$0xff] }
 0x29c   : > { %v2912_v35 = vpop.eup %2911  ;;  %2931 = vpow2.f32 %v1073_v61  ;;  %v1079_v41 = vmul.f32 1.442695, %v1028_v12  ;;  %v962_v23 = vpop.f32.mrb[21].mxu1  ;;  %2568 = vmatmul.mubr.bf16.vlgmr.msra.gmra.mrb[32].mxu0 %v1234_v52  ;;  %v1176_v28 = vmul.f32 %v2910_v16, %v3898_v27  ;;  %v1075_v51 = vmul.f32 1.442695, %v1026_v19 }
 0x29d   : > { %v2914_v38 = vpop.eup %2913  ;;  %v1174_v26 = vmul.f32 %v2912_v35, %v3902_v31  ;;  %v3979_v32 = vadd.f32 %v2541_v24, %v3872_v2  ;;  %v2542_v33 = vpop.f32.mrb[22].mxu1  ;;  %v3982_v39 = vadd.f32 %v3261_v37, %v1173_v18  ;;  %v3985_v40 = vadd.f32 %v3872_v2, %v962_v23  ;;  %v3265_v23 = vld [vmem:[%s3662_s16 + $0x40] sm:$0xff] }
 0x29e   : > { %v2916_v36 = vpop.eup %2915  ;;  %v1119_v21 = vadd.f32 1.0, %v2914_v38  ;;  %2933 = vpow2.f32 %v1079_v41  ;;  %v965_v44 = vpop.f32.mrb[23].mxu1  ;;  %v3993_v8 = vadd.f32 %v2542_v33, %v3872_v2  ;;  %v3999_v60 = vadd.f32 %v3263_v50, %v1175_v48 }
 0x29f   : > { %v2918_v45 = vpop.eup %2917  ;;  %v3988_v27 = vadd.f32 %v3262_v14, %v1174_v26  ;;  %v1117_v31 = vadd.f32 1.0, %v2916_v36  ;;  %2935 = vpow2.f32 %v1075_v51  ;;  %v1031_v25 = vsub.f32 0.0, %v3979_v32  ;;  %v3266_v51 = vld [vmem:[%s3662_s16 + $0x48] sm:$0xff] }
 0x2a0   : > { %v2920_v29 = vpop.eup %2919  ;;  %2937 = vrcp.f32 %v1119_v21  ;;  %v1120_v11 = vadd.f32 1.0, %v2918_v45  ;;  %v1029_v4 = vsub.f32 0.0, %v3985_v40  ;;  %v3996_v15 = vadd.f32 %v3872_v2, %v965_v44 }
 0x2a1   : > { %v2922_v17 = vpop.eup %2921  ;;  %2939 = vrcp.f32 %v1117_v31  ;;  %v1118_v10 = vadd.f32 1.0, %v2920_v29  ;;  %v1085_v54 = vmul.f32 1.442695, %v1031_v25  ;;  %v1032_v0 = vsub.f32 0.0, %v3993_v8 }
 0x2a2   : > { %v2924_v56 = vpop.eup %2923  ;;  %2941 = vrcp.f32 %v1120_v11  ;;  %v1081_v58 = vmul.f32 1.442695, %v1029_v4  ;;  %v1030_v30 = vsub.f32 0.0, %v3996_v15  ;;  %v1235_v61 = vpack.c.bf16 %v3988_v27, %v3982_v39 }
 0x2a3   : > { %v2926_v59 = vpop.eup %2925  ;;  %v1177_v3 = vmul.f32 %v2924_v56, %v3910_v5  ;;  %2943 = vrcp.f32 %v1118_v10  ;;  %v2545_v46 = vpop.f32.mrb[24].mxu1  ;;  %v4007_v52 = vadd.f32 %v3264_v6, %v1176_v28  ;;  %v1179_v12 = vmul.f32 %v2922_v17, %v3907_v20  ;;  %v3267_v56 = vld [vmem:[%s3662_s16 + $0x50] sm:$0xff] }
 0x2a4   : > { %v2928_v1 = vpop.eup %2927  ;;  %2945 = vpow2.f32 %v1085_v54  ;;  %v1087_v16 = vmul.f32 1.442695, %v1032_v0  ;;  %v978_v18 = vpop.f32.mrb[25].mxu1  ;;  %v1180_v5 = vmul.f32 %v2926_v59, %v3914_v53  ;;  %v1083_v35 = vmul.f32 1.442695, %v1030_v30  ;;  %2571 = vmatprep.mubr.bf16.mxu0 %v1235_v61 }
 0x2a5   : > { %v2930_v19 = vpop.eup %2929  ;;  %v1178_v24 = vmul.f32 %v2928_v1, %v3918_v57  ;;  %2947 = vpow2.f32 %v1081_v58  ;;  %v2546_v48 = vpop.f32.mrb[26].mxu1  ;;  %v4013_v38 = vadd.f32 %v3265_v23, %v1177_v3  ;;  %v4016_v20 = vadd.f32 %v2545_v46, %v3872_v2 }
 0x2a6   : > { %v2932_v41 = vpop.eup %2931  ;;  %v1123_v28 = vadd.f32 1.0, %v2930_v19  ;;  %2949 = vpow2.f32 %v1087_v16  ;;  %v981_v26 = vpop.f32.mrb[27].mxu1  ;;  %v4022_v57 = vadd.f32 %v3872_v2, %v978_v18  ;;  %v1236_v21 = vpack.c.bf16 %v4007_v52, %v3999_v60  ;;  %v3268_v16 = vld [vmem:[%s3662_s16 + $0x58] sm:$0xff] }
 0x2a7   : > { %v4019_v33 = vadd.f32 %v3266_v51, %v1178_v24  ;;  %v1121_v53 = vadd.f32 1.0, %v2932_v41  ;;  %2951 = vpow2.f32 %v1083_v35  ;;  %v1035_v37 = vsub.f32 0.0, %v4016_v20 }
 0x2a8   : > { %v2934_v36 = vpop.eup %2933  ;;  %2953 = vrcp.f32 %v1123_v28  ;;  %v4028_v44 = vadd.f32 %v2546_v48, %v3872_v2  ;;  %v1033_v31 = vsub.f32 0.0, %v4022_v57  ;;  %v4032_v25 = vadd.f32 %v3872_v2, %v981_v26  ;;  %2572 = vmatmul.mubr.bf16.gmra.mrb[36].mxu0 %v1236_v21  ;;  %v3269_v26 = vld [vmem:[%s3662_s16 + $0x60] sm:$0xff] }
 0x2a9   : > { %v2936_v45 = vpop.eup %2935  ;;  %2955 = vrcp.f32 %v1121_v53  ;;  %v1124_v14 = vadd.f32 1.0, %v2934_v36  ;;  %v1093_v4 = vmul.f32 1.442695, %v1035_v37  ;;  %v1237_v10 = vpack.c.bf16 %v4019_v33, %v4013_v38  ;;  %v3270_v36 = vld [vmem:[%s3662_s16 + $0x68] sm:$0xff] }
 0x2aa   : > { %v2938_v29 = vpop.eup %2937  ;;  %v1122_v11 = vadd.f32 1.0, %v2936_v45  ;;  %v1036_v17 = vsub.f32 0.0, %v4028_v44  ;;  %v4038_v50 = vadd.f32 %v3267_v56, %v1179_v12  ;;  %v1089_v58 = vmul.f32 1.442695, %v1033_v31 }
 0x2ab   : > { %v2940_v54 = vpop.eup %2939  ;;  %2957 = vrcp.f32 %v1124_v14  ;;  %v1034_v0 = vsub.f32 0.0, %v4032_v25  ;;  %v2549_v59 = vpop.f32.mrb[28].mxu1  ;;  %2575 = vmatprep.mubr.bf16.mxu0 %v1237_v10  ;;  %v4046_v12 = vadd.f32 %v3268_v16, %v1180_v5  ;;  %v1183_v18 = vmul.f32 %v2938_v29, %v3923_v43 }
 0x2ac   : > { %v2942_v3 = vpop.eup %2941  ;;  %v1181_v30 = vmul.f32 %v2940_v54, %v3926_v63  ;;  %2959 = vrcp.f32 %v1122_v11  ;;  %v1095_v46 = vmul.f32 1.442695, %v1036_v17  ;;  %v4043_v61 = vadd.f32 %v2549_v59, %v3872_v2  ;;  %v994_v1 = vpop.f32.mrb[29].mxu1 }
 0x2ad   : > { %v2944_v6 = vpop.eup %2943  ;;  %2961 = vpow2.f32 %v1093_v4  ;;  %v1091_v19 = vmul.f32 1.442695, %v1034_v0  ;;  %v2550_v24 = vpop.f32.mrb[30].mxu1  ;;  %v1184_v63 = vmul.f32 %v2942_v3, %v3930_v9  ;;  %v4056_v43 = vadd.f32 %v3872_v2, %v994_v1  ;;  %v3272_v1 = vld [vmem:[%s3662_s16 + $0x70] sm:$0xff] }
 0x2ae   : > { %v2946_v35 = vpop.eup %2945  ;;  %v1182_v48 = vmul.f32 %v2944_v6, %v3934_v22  ;;  %2963 = vpow2.f32 %v1089_v58  ;;  %v1039_v41 = vsub.f32 0.0, %v4043_v61  ;;  %v997_v23 = vpop.f32.mrb[31].mxu1  ;;  %v4053_v51 = vadd.f32 %v3269_v26, %v1181_v30  ;;  %v3271_v58 = vld [vmem:[%s3662_s16 + $0x78] sm:$0xff] }
 0x2af   : > { %v2948_v28 = vpop.eup %2947  ;;  %v1127_v5 = vadd.f32 1.0, %v2946_v35  ;;  %2965 = vpow2.f32 %v1095_v46  ;;  %v1037_v14 = vsub.f32 0.0, %v4056_v43  ;;  %v1238_v31 = vpack.c.bf16 %v4046_v12, %v4038_v50 }
 0x2b0   : > { %v2950_v53 = vpop.eup %2949  ;;  %v4059_v37 = vadd.f32 %v3270_v36, %v1182_v48  ;;  %v1125_v9 = vadd.f32 1.0, %v2948_v28  ;;  %2967 = vpow2.f32 %v1091_v19  ;;  %v1101_v22 = vmul.f32 1.442695, %v1039_v41 }
 0x2b1   : > { %v2952_v21 = vpop.eup %2951  ;;  %2969 = vrcp.f32 %v1127_v5  ;;  %v1128_v45 = vadd.f32 1.0, %v2950_v53  ;;  %v4065_v4 = vadd.f32 %v2550_v24, %v3872_v2  ;;  %v4068_v17 = vadd.f32 %v3872_v2, %v997_v23  ;;  %2576 = vmatmul.mubr.bf16.gmra.mrb[40].mxu0 %v1238_v31  ;;  %v3273_v23 = vld [vmem:[%s3662_s16 + $0x80] sm:$0xff] }
 0x2b2   : > { %v2954_v29 = vpop.eup %2953  ;;  %2971 = vrcp.f32 %v1125_v9  ;;  %v1126_v11 = vadd.f32 1.0, %v2952_v21  ;;  %v1097_v54 = vmul.f32 1.442695, %v1037_v14  ;;  %v1239_v56 = vpack.c.bf16 %v4059_v37, %v4053_v51  ;;  %v3275_v14 = vld [vmem:[%s3662_s16 + $0x98] sm:$0xff] }
 0x2b3   : > { %v2956_v10 = vpop.eup %2955  ;;  %2973 = vrcp.f32 %v1128_v45  ;;  %v4073_v0 = vadd.f32 %v3271_v58, %v1184_v63  ;;  %v1040_v59 = vsub.f32 0.0, %v4065_v4  ;;  %v1038_v3 = vsub.f32 0.0, %v4068_v17 }
 0x2b4   : > { %2975 = vrcp.f32 %v1126_v11  ;;  %v1185_v2 = vmul.f32 %v2956_v10, %v3952_v7  ;;  %2579 = vmatprep.mubr.bf16.mxu0 %v1239_v56  ;;  %v4079_v6 = vadd.f32 %v3272_v1, %v1183_v18  ;;  %v3274_v18 = vld [vmem:[%s3662_s16 + $0x88] sm:$0xff]  ;;  %v3276_v10 = vld [vmem:[%s3662_s16 + $0x90] sm:$0xff] }
 0x2b5   : > { %v2958_v30 = vpop.eup %2957  ;;  %2977 = vpow2.f32 %v1101_v22  ;;  %v1103_v16 = vmul.f32 1.442695, %v1040_v59  ;;  %v1099_v35 = vmul.f32 1.442695, %v1038_v3  ;;  %v3278_v1 = vld [vmem:[%s3662_s16 + $0xa8] sm:$0xff] }
 0x2b6   : > { %v2960_v46 = vpop.eup %2959  ;;  %2979 = vpow2.f32 %v1097_v54  ;;  %v1188_v48 = vmul.f32 %v2958_v30, %v3963_v34  ;;  %v1240_v7 = vpack.c.bf16 %v4073_v0, %v4079_v6  ;;  %v4086_v28 = vadd.f32 %v3273_v23, %v1185_v2  ;;  %v3277_v2 = vld [vmem:[%s3662_s16 + $0xa0] sm:$0xff] }
 0x2b7   : > { %v2962_v19 = vpop.eup %2961  ;;  %v1186_v24 = vmul.f32 %v2960_v46, %v3966_v42  ;;  %2981 = vpow2.f32 %v1103_v16  ;;  %v1187_v42 = vmul.f32 %v2954_v29, %v3946_v62 }
 0x2b8   : > { %v2964_v63 = vpop.eup %2963  ;;  %2983 = vpow2.f32 %v1099_v35  ;;  %v1131_v36 = vadd.f32 1.0, %v2962_v19  ;;  %v4095_v31 = vadd.f32 %v3275_v14, %v1188_v48  ;;  %v3282_v14 = vld [vmem:[%s3662_s16 + $0xc8] sm:$0xff] }
 0x2b9   : > { %v2966_v41 = vpop.eup %2965  ;;  %v4089_v26 = vadd.f32 %v3274_v18, %v1186_v24  ;;  %v1129_v5 = vadd.f32 1.0, %v2964_v63  ;;  %2580 = vmatmul.mubr.bf16.gmra.mrb[44].mxu0 %v1240_v7  ;;  %v4099_v54 = vadd.f32 %v3276_v10, %v1187_v42 }
 0x2ba   : > { %v2968_v53 = vpop.eup %2967  ;;  %v1132_v34 = vadd.f32 1.0, %v2966_v41 }
 0x2bb   : > { %v2970_v9 = vpop.eup %2969  ;;  %2985 = vrcp.f32 %v1129_v5  ;;  %v1130_v22 = vadd.f32 1.0, %v2968_v53  ;;  %v1241_v21 = vpack.c.bf16 %v4089_v26, %v4086_v28  ;;  %v1242_v30 = vpack.c.bf16 %v4095_v31, %v4099_v54  ;;  %v3280_v53 = vld [vmem:[%s3662_s16 + $0xb0] sm:$0xff] }
 0x2bc   : > { %v2972_v45 = vpop.eup %2971  ;;  %2987 = vrcp.f32 %v1132_v34  ;;  %v1191_v63 = vmul.f32 %v2970_v9, %v3979_v32 }
 0x2bd   : > { %v2974_v11 = vpop.eup %2973  ;;  %v1189_v62 = vmul.f32 %v2972_v45, %v3985_v40  ;;  %2989 = vrcp.f32 %v1130_v22  ;;  %2583 = vmatprep.mubr.bf16.mxu0 %v1241_v21  ;;  %v3281_v21 = vld [vmem:[%s3662_s16 + $0xc0] sm:$0xff] }
 0x2be   : > { %v2976_v29 = vpop.eup %2975  ;;  %2991 = vrcp.f32 %v1131_v36  ;;  %v1192_v40 = vmul.f32 %v2974_v11, %v3993_v8  ;;  %v3279_v8 = vld [vmem:[%s3662_s16 + $0xb8] sm:$0xff]  ;;  %v4119_v42 = vadd.f32 %v3280_v53, %v1191_v63 }
 0x2bf   : > { %v2978_v56 = vpop.eup %2977  ;;  %v1190_v58 = vmul.f32 %v2976_v29, %v3996_v15  ;;  %v4105_v46 = vadd.f32 %v3277_v2, %v1189_v62  ;;  %v3283_v29 = vld [vmem:[%s3662_s16 + $0xd8] sm:$0xff] }
 0x2c0   : > { %v2980_v59 = vpop.eup %2979  ;;  %v1135_v3 = vadd.f32 1.0, %v2978_v56  ;;  %v4115_v23 = vadd.f32 %v3279_v8, %v1192_v40  ;;  %4659 = vst [vmem:[#allocation16_spill] sm:$0xff] %v4119_v42  ;;  %v2743_v8 = vld [vmem:[#allocation7 + $0x70] sm:$0xff]  }
 0x2c1   : > { %4656 = vst [vmem:[#allocation13_spill] sm:$0xff] %v4105_v46  ;;  %v4109_v16 = vadd.f32 %v3278_v1, %v1190_v58  ;;  %v1133_v19 = vadd.f32 1.0, %v2980_v59  ;;  %v2982_v24 = vpop.eup %2981  ;;  %2584 = vmatmul.mubr.bf16.gmra.mrb[48].mxu0 %v1242_v30  ;;  %v3284_v58 = vld [vmem:[%s3662_s16 + $0xd0] sm:$0xff] }
 0x2c2   : > { %v2984_v35 = vpop.eup %2983  ;;  %v1136_v15 = vadd.f32 1.0, %v2982_v24  ;;  %4658 = vst [vmem:[#allocation15_spill] sm:$0xff] %v4115_v23  ;;  %v1244_v22 = vpack.c.bf16 %v4115_v23, %v4119_v42 }
 0x2c3   : > { %4657 = vst [vmem:[#allocation14_spill] sm:$0xff] %v4109_v16  ;;  %2993 = vrcp.f32 %v1133_v19  ;;  %v1243_v48 = vpack.c.bf16 %v4109_v16, %v4105_v46  ;;  %v1134_v7 = vadd.f32 1.0, %v2984_v35  ;;  %v3285_v19 = vld [vmem:[%s3662_s16 + $0xe0] sm:$0xff]  ;;  %v3286_v35 = vld [vmem:[%s3662_s16 + $0xe8] sm:$0xff] }
 0x2c4   : > { %2995 = vrcp.f32 %v1135_v3 }
 0x2c5   : > { %v2986_v41 = vpop.eup %2985  ;;  %2997 = vrcp.f32 %v1136_v15  ;;  %2587 = vmatprep.mubr.bf16.mxu0 %v1243_v48  ;;  %v3287_v15 = vld [vmem:[%s3662_s16 + $0xf8] sm:$0xff] }
 0x2c6   : > { %v2988_v18 = vpop.eup %2987  ;;  %v1193_v32 = vmul.f32 %v2986_v41, %v4022_v57  ;;  %2999 = vrcp.f32 %v1134_v7  ;;  %v2741_v7 = vld [vmem:[#allocation7 + $0x60] sm:$0xff]   ;;  %v2742_v41 = vld [vmem:[#allocation7 + $0x68] sm:$0xff]  }
 0x2c7   : > { %v2990_v5 = vpop.eup %2989  ;;  %v1196_v9 = vmul.f32 %v2988_v18, %v4028_v44  ;;  %2607 = vmatprep.subr.bf16.mxu1 %v2741_v7  ;;  %v2744_v18 = vld [vmem:[#allocation7 + $0x78] sm:$0xff]  }
 0x2c8   : > { %v2992_v36 = vpop.eup %2991  ;;  %v1194_v34 = vmul.f32 %v2990_v5, %v4032_v25  ;;  %v4126_v45 = vadd.f32 %v3281_v21, %v1193_v32  ;;  %2608 = vmatpush3.bf16.msra.mxu1 %v2741_v7  ;;  %v4165_v32 = vld [vmem:[%s4625_s2 + $0x1] ss:$0 sm:$0xff] }
 0x2c9   : > { %v1195_v11 = vmul.f32 %v2992_v36, %v4016_v20  ;;  %2588 = vmatmul.mubr.bf16.gmra.mrb[52].mxu0 %v1244_v22  ;;  %v4135_v44 = vadd.f32 %v3283_v29, %v1196_v9  ;;  %2609 = vmatprep.subr.bf16.mxu1 %v2742_v41 }
 0x2ca   : > { %4660 = vst [vmem:[#allocation17_spill] sm:$0xff] %v4126_v45  ;;  %v4129_v57 = vadd.f32 %v3282_v14, %v1194_v34 }
 0x2cb   : > { %4662 = vst [vmem:[#allocation19_spill] sm:$0xff] %v4135_v44  ;;  %v4138_v59 = vadd.f32 %v3284_v58, %v1195_v11 }
 0x2cc   : > { %4661 = vst [vmem:[#allocation18_spill] sm:$0xff] %v4129_v57  ;;  %v1245_v62 = vpack.c.bf16 %v4129_v57, %v4126_v45  ;;  %2610 = vmatpush3.bf16.msra.mxu1 %v2742_v41 }
 0x2cd   : > { %v2994_v25 = vpop.eup %2993  ;;  %4663 = vst [vmem:[#allocation20_spill] sm:$0xff] %v4138_v59  ;;  %v1246_v40 = vpack.c.bf16 %v4135_v44, %v4138_v59  ;;  %2611 = vmatprep.subr.bf16.mxu1 %v2743_v8 }
 0x2ce   : > { %v2996_v10 = vpop.eup %2995  ;;  %2591 = vmatprep.mubr.bf16.mxu0 %v1245_v62  ;;  %v1197_v20 = vmul.f32 %v2994_v25, %v4056_v43 }
 0x2cf   : > { %v2998_v56 = vpop.eup %2997  ;;  %v1199_v1 = vmul.f32 %v2996_v10, %v4043_v61 }
 0x2d0   : > { %v3000_v3 = vpop.eup %2999  ;;  %v1200_v30 = vmul.f32 %v2998_v56, %v4065_v4  ;;  %v4147_v24 = vadd.f32 %v3285_v19, %v1197_v20  ;;  %v3288_v4 = vld [vmem:[%s3662_s16 + $0xf0] sm:$0xff]  ;;  %2612 = vmatpush3.bf16.msra.mxu1 %v2743_v8 }
 0x2d1   : > { %v1198_v2 = vmul.f32 %v3000_v3, %v4068_v17  ;;  %2592 = vmatmul.mubr.bf16.gmra.mrb[56].mxu0 %v1246_v40  ;;  %v4158_v17 = vadd.f32 %v3288_v4, %v1199_v1  ;;  %2613 = vmatprep.subr.bf16.mxu1 %v2744_v18 }
 0x2d2   : > { %4664 = vst [vmem:[#allocation21_spill] sm:$0xff] %v4147_v24  ;;  %v4153_v48 = vadd.f32 %v3287_v15, %v1200_v30 }
 0x2d3   : > { %v4150_v63 = vadd.f32 %v3286_v35, %v1198_v2  ;;  %4667 = vst [vmem:[#allocation24_spill] sm:$0xff] %v4158_v17 }
 0x2d4   : > { %4666 = vst [vmem:[#allocation23_spill] sm:$0xff] %v4153_v48  ;;  %v1248_v61 = vpack.c.bf16 %v4153_v48, %v4158_v17  ;;  %2614 = vmatpush3.bf16.msra.mxu1 %v2744_v18 }
 0x2d5   : > { %4665 = vst [vmem:[#allocation22_spill] sm:$0xff] %v4150_v63  ;;  %v1247_v43 = vpack.c.bf16 %v4150_v63, %v4147_v24 }
 0x2d7   : > { %2595 = vmatprep.mubr.bf16.mxu0 %v1247_v43 }
 0x2d9   : > { %2596 = vmatmul.mubr.bf16.gmra.mrb[60].mxu0 %v1248_v61 }
 0x36f   : > { %v2569_v5 = vpop.f32.mrb[32].mxu0 }
 0x370   : > { %v4168_v53 = vadd.f32 %v2569_v5, %v4165_v32  ;;  %v1356_v36 = vpop.f32.mrb[33].mxu0 }
 0x371   : > { %v4171_v34 = vadd.f32 %v4165_v32, %v1356_v36  ;;  %v2570_v9 = vpop.f32.mrb[34].mxu0 }
 0x372   : > { %v1485_v22 = vsub.f32 0.0, %v4168_v53  ;;  %v4175_v21 = vadd.f32 %v2570_v9, %v4165_v32  ;;  %v1359_v14 = vpop.f32.mrb[35].mxu0 }
 0x373   : > { %v1483_v11 = vsub.f32 0.0, %v4171_v34  ;;  %v4179_v62 = vadd.f32 %v4165_v32, %v1359_v14 }
 0x374   : > { %v1519_v25 = vmul.f32 1.442695, %v1485_v22  ;;  %v1486_v29 = vsub.f32 0.0, %v4175_v21 }
 0x375   : > { %v1515_v10 = vmul.f32 1.442695, %v1483_v11  ;;  %v1484_v56 = vsub.f32 0.0, %v4179_v62 }
 0x376   : > { %3001 = vpow2.f32 %v1519_v25  ;;  %v1521_v58 = vmul.f32 1.442695, %v1486_v29 }
 0x377   : > { %3003 = vpow2.f32 %v1515_v10  ;;  %v1517_v20 = vmul.f32 1.442695, %v1484_v56 }
 0x378   : > { %3005 = vpow2.f32 %v1521_v58 }
 0x379   : > { %3007 = vpow2.f32 %v1517_v20 }
 0x37b   : > { %v2573_v3 = vpop.f32.mrb[36].mxu0 }
 0x37c   : > { %v4184_v30 = vadd.f32 %v2573_v3, %v4165_v32  ;;  %v1372_v2 = vpop.f32.mrb[37].mxu0 }
 0x37d   : > { %v4187_v40 = vadd.f32 %v4165_v32, %v1372_v2  ;;  %v2574_v1 = vpop.f32.mrb[38].mxu0 }
 0x37e   : > { %v1489_v35 = vsub.f32 0.0, %v4184_v30  ;;  %v4191_v15 = vadd.f32 %v2574_v1, %v4165_v32  ;;  %v1375_v43 = vpop.f32.mrb[39].mxu0 }
 0x37f   : > { %v1487_v7 = vsub.f32 0.0, %v4187_v40  ;;  %v4195_v41 = vadd.f32 %v4165_v32, %v1375_v43 }
 0x380   : > { %v3002_v19 = vpop.eup %3001  ;;  %v1490_v5 = vsub.f32 0.0, %v4191_v15  ;;  %v1527_v22 = vmul.f32 1.442695, %v1489_v35 }
 0x381   : > { %v3004_v4 = vpop.eup %3003  ;;  %v1581_v61 = vadd.f32 1.0, %v3002_v19  ;;  %v1488_v14 = vsub.f32 0.0, %v4195_v41  ;;  %v1523_v25 = vmul.f32 1.442695, %v1487_v7 }
 0x382   : > { %v3006_v8 = vpop.eup %3005  ;;  %v1579_v18 = vadd.f32 1.0, %v3004_v4  ;;  %v1529_v29 = vmul.f32 1.442695, %v1490_v5 }
 0x383   : > { %v3008_v36 = vpop.eup %3007  ;;  %3009 = vrcp.f32 %v1581_v61  ;;  %v1582_v9 = vadd.f32 1.0, %v3006_v8  ;;  %v1525_v10 = vmul.f32 1.442695, %v1488_v14 }
 0x384   : > { %3011 = vrcp.f32 %v1579_v18  ;;  %v1580_v11 = vadd.f32 1.0, %v3008_v36  ;;  %v2577_v56 = vpop.f32.mrb[40].mxu0 }
 0x385   : > { %3013 = vrcp.f32 %v1582_v9  ;;  %v4200_v58 = vadd.f32 %v2577_v56, %v4165_v32  ;;  %v1388_v20 = vpop.f32.mrb[41].mxu0 }
 0x386   : > { %3015 = vrcp.f32 %v1580_v11  ;;  %v4203_v3 = vadd.f32 %v4165_v32, %v1388_v20  ;;  %v2578_v2 = vpop.f32.mrb[42].mxu0 }
 0x387   : > { %3017 = vpow2.f32 %v1527_v22  ;;  %v1493_v1 = vsub.f32 0.0, %v4200_v58  ;;  %v4207_v19 = vadd.f32 %v2578_v2, %v4165_v32  ;;  %v1391_v35 = vpop.f32.mrb[43].mxu0 }
 0x388   : > { %3019 = vpow2.f32 %v1523_v25  ;;  %v1491_v43 = vsub.f32 0.0, %v4203_v3  ;;  %v4211_v4 = vadd.f32 %v4165_v32, %v1391_v35 }
 0x389   : > { %3021 = vpow2.f32 %v1529_v29  ;;  %v1535_v61 = vmul.f32 1.442695, %v1493_v1  ;;  %v1494_v7 = vsub.f32 0.0, %v4207_v19 }
 0x38a   : > { %3023 = vpow2.f32 %v1525_v10  ;;  %v1531_v8 = vmul.f32 1.442695, %v1491_v43  ;;  %v1492_v18 = vsub.f32 0.0, %v4211_v4 }
 0x38b   : > { %3025 = vpow2.f32 %v1535_v61  ;;  %v1537_v36 = vmul.f32 1.442695, %v1494_v7 }
 0x38c   : > { %3027 = vpow2.f32 %v1531_v8  ;;  %v1533_v22 = vmul.f32 1.442695, %v1492_v18  ;;  %v2581_v14 = vpop.f32.mrb[44].mxu0 }
 0x38d   : > { %v3010_v5 = vpop.eup %3009  ;;  %3029 = vpow2.f32 %v1537_v36  ;;  %v4216_v25 = vadd.f32 %v2581_v14, %v4165_v32  ;;  %v1404_v29 = vpop.f32.mrb[45].mxu0 }
 0x38e   : > { %v3012_v9 = vpop.eup %3011  ;;  %v1645_v56 = vmul.f32 %v3010_v5, %v4168_v53  ;;  %3031 = vpow2.f32 %v1533_v22  ;;  %v4221_v2 = vadd.f32 %v4165_v32, %v1404_v29  ;;  %v2582_v1 = vpop.f32.mrb[46].mxu0 }
 0x38f   : > { %v3014_v11 = vpop.eup %3013  ;;  %v1643_v43 = vmul.f32 %v3012_v9, %v4171_v34  ;;  %v1497_v7 = vsub.f32 0.0, %v4216_v25  ;;  %v4227_v8 = vadd.f32 %v2582_v1, %v4165_v32  ;;  %v1407_v18 = vpop.f32.mrb[47].mxu0 }
 0x390   : > { %v3016_v10 = vpop.eup %3015  ;;  %v1646_v20 = vmul.f32 %v3014_v11, %v4175_v21  ;;  %v1495_v21 = vsub.f32 0.0, %v4221_v2  ;;  %v4231_v11 = vadd.f32 %v4165_v32, %v1407_v18 }
 0x391   : > { %v3018_v35 = vpop.eup %3017  ;;  %v1644_v61 = vmul.f32 %v3016_v10, %v4179_v62  ;;  %v1543_v9 = vmul.f32 1.442695, %v1497_v7  ;;  %v1498_v10 = vsub.f32 0.0, %v4227_v8 }
 0x392   : > { %v3020_v36 = vpop.eup %3019  ;;  %v1676_v53 = vpack.c.bf16 %v1646_v20, %v1645_v56  ;;  %v1585_v5 = vadd.f32 1.0, %v3018_v35  ;;  %v1539_v63 = vmul.f32 1.442695, %v1495_v21  ;;  %v1496_v35 = vsub.f32 0.0, %v4231_v11 }
 0x393   : > { %v3022_v22 = vpop.eup %3021  ;;  %v1583_v14 = vadd.f32 1.0, %v3020_v36  ;;  %v1675_v29 = vpack.c.bf16 %v1644_v61, %v1643_v43  ;;  %v1545_v7 = vmul.f32 1.442695, %v1498_v10 }
 0x394   : > { %v3024_v34 = vpop.eup %3023  ;;  %3033 = vrcp.f32 %v1585_v5  ;;  %v1586_v62 = vadd.f32 1.0, %v3022_v22  ;;  %v2585_v56 = vpop.f32.mrb[48].mxu0 }
 0x395   : > { %3035 = vrcp.f32 %v1583_v14  ;;  %v1584_v1 = vadd.f32 1.0, %v3024_v34  ;;  %2615 = vmatprep.mubr.bf16.mxu1 %v1675_v29  ;;  %v3026_v20 = vpop.eup %3025  ;;  %v4236_v18 = vadd.f32 %v2585_v56, %v4165_v32  ;;  %v1420_v43 = vpop.f32.mrb[49].mxu0 }
 0x396   : > { %3037 = vrcp.f32 %v1586_v62  ;;  %2616 = vmatmul.mubr.bf16.vlgmr.msra.gmra.mrb[32].mxu1 %v1676_v53  ;;  %v3028_v61 = vpop.eup %3027  ;;  %v1589_v36 = vadd.f32 1.0, %v3026_v20  ;;  %v4239_v5 = vadd.f32 %v4165_v32, %v1420_v43  ;;  %v2586_v21 = vpop.f32.mrb[50].mxu0  ;;  %v1541_v20 = vmul.f32 1.442695, %v1496_v35 }
 0x397   : > { %3039 = vrcp.f32 %v1584_v1  ;;  %v3030_v22 = vpop.eup %3029  ;;  %v1587_v14 = vadd.f32 1.0, %v3028_v61  ;;  %v1501_v53 = vsub.f32 0.0, %v4236_v18  ;;  %v4243_v29 = vadd.f32 %v2586_v21, %v4165_v32  ;;  %v1423_v34 = vpop.f32.mrb[51].mxu0 }
 0x398   : > { %3041 = vpow2.f32 %v1543_v9  ;;  %v3032_v62 = vpop.eup %3031  ;;  %v1590_v1 = vadd.f32 1.0, %v3030_v22  ;;  %v1499_v56 = vsub.f32 0.0, %v4239_v5  ;;  %v4247_v9 = vadd.f32 %v4165_v32, %v1423_v34 }
 0x399   : > { %3043 = vpow2.f32 %v1539_v63  ;;  %v1588_v10 = vadd.f32 1.0, %v3032_v62  ;;  %v1502_v43 = vsub.f32 0.0, %v4243_v29  ;;  %v1551_v63 = vmul.f32 1.442695, %v1501_v53 }
 0x39a   : > { %3045 = vrcp.f32 %v1589_v36  ;;  %v1500_v61 = vsub.f32 0.0, %v4247_v9  ;;  %v1547_v21 = vmul.f32 1.442695, %v1499_v56 }
 0x39b   : > { %3047 = vrcp.f32 %v1587_v14  ;;  %v1553_v36 = vmul.f32 1.442695, %v1502_v43 }
 0x39c   : > { %3049 = vrcp.f32 %v1590_v1  ;;  %v2589_v22 = vpop.f32.mrb[52].mxu0  ;;  %v1549_v17 = vmul.f32 1.442695, %v1500_v61 }
 0x39d   : > { %3051 = vrcp.f32 %v1588_v10  ;;  %v4252_v34 = vadd.f32 %v2589_v22, %v4165_v32  ;;  %v1436_v14 = vpop.f32.mrb[53].mxu0 }
 0x39e   : > { %v3034_v48 = vpop.eup %3033  ;;  %3053 = vpow2.f32 %v1545_v7  ;;  %v4257_v1 = vadd.f32 %v4165_v32, %v1436_v14  ;;  %v2590_v56 = vpop.f32.mrb[54].mxu0 }
 0x39f   : > { %v3036_v24 = vpop.eup %3035  ;;  %3055 = vpow2.f32 %v1541_v20  ;;  %v1649_v62 = vmul.f32 %v3034_v48, %v4184_v30  ;;  %v1505_v20 = vsub.f32 0.0, %v4252_v34  ;;  %v4262_v43 = vadd.f32 %v2590_v56, %v4165_v32  ;;  %v1439_v61 = vpop.f32.mrb[55].mxu0 }
 0x3a0   : > { %v3038_v35 = vpop.eup %3037  ;;  %v1647_v53 = vmul.f32 %v3036_v24, %v4187_v40  ;;  %3057 = vpow2.f32 %v1551_v63  ;;  %v1503_v24 = vsub.f32 0.0, %v4257_v1  ;;  %v4267_v30 = vadd.f32 %v4165_v32, %v1439_v61 }
 0x3a1   : > { %v3040_v7 = vpop.eup %3039  ;;  %v1650_v10 = vmul.f32 %v3038_v35, %v4191_v15  ;;  %3059 = vpow2.f32 %v1547_v21  ;;  %v1559_v15 = vmul.f32 1.442695, %v1505_v20  ;;  %v1506_v21 = vsub.f32 0.0, %v4262_v43 }
 0x3a2   : > { %v3042_v22 = vpop.eup %3041  ;;  %v1648_v48 = vmul.f32 %v3040_v7, %v4195_v41  ;;  %3061 = vpow2.f32 %v1553_v36  ;;  %v1555_v56 = vmul.f32 1.442695, %v1503_v24  ;;  %v1504_v57 = vsub.f32 0.0, %v4267_v30 }
 0x3a3   : > { %v3044_v40 = vpop.eup %3043  ;;  %v1593_v63 = vadd.f32 1.0, %v3042_v22  ;;  %3063 = vpow2.f32 %v1549_v17  ;;  %v1561_v41 = vmul.f32 1.442695, %v1506_v21  ;;  %v1678_v36 = vpack.c.bf16 %v1650_v10, %v1649_v62 }
 0x3a4   : > { %v3046_v14 = vpop.eup %3045  ;;  %v1591_v35 = vadd.f32 1.0, %v3044_v40  ;;  %v1677_v44 = vpack.c.bf16 %v1648_v48, %v1647_v53  ;;  %v1557_v61 = vmul.f32 1.442695, %v1504_v57  ;;  %v2593_v59 = vpop.f32.mrb[56].mxu0 }
 0x3a5   : > { %v3048_v45 = vpop.eup %3047  ;;  %3065 = vrcp.f32 %v1593_v63  ;;  %v4272_v17 = vadd.f32 %v2593_v59, %v4165_v32  ;;  %v1452_v20 = vpop.f32.mrb[57].mxu0 }
 0x3a6   : > { %v3050_v7 = vpop.eup %3049  ;;  %3067 = vrcp.f32 %v1591_v35  ;;  %2619 = vmatprep.mubr.bf16.mxu1 %v1677_v44  ;;  %v4276_v53 = vadd.f32 %v4165_v32, %v1452_v20  ;;  %v2594_v62 = vpop.f32.mrb[58].mxu0  ;;  %v1653_v20 = vmul.f32 %v3046_v14, %v4200_v58 }
 0x3a7   : > { %v3052_v22 = vpop.eup %3051  ;;  %3069 = vpow2.f32 %v1559_v15  ;;  %2620 = vmatmul.mubr.bf16.gmra.mrb[36].mxu1 %v1678_v36  ;;  %v1509_v57 = vsub.f32 0.0, %v4272_v17  ;;  %v4280_v44 = vadd.f32 %v2594_v62, %v4165_v32  ;;  %v1455_v63 = vpop.f32.mrb[59].mxu0  ;;  %v1654_v15 = vmul.f32 %v3050_v7, %v4207_v19 }
 0x3a8   : > { %v3054_v24 = vpop.eup %3053  ;;  %v1652_v40 = vmul.f32 %v3052_v22, %v4211_v4  ;;  %3071 = vpow2.f32 %v1555_v56  ;;  %v1507_v4 = vsub.f32 0.0, %v4276_v53  ;;  %v1651_v56 = vmul.f32 %v3048_v45, %v4203_v3 }
 0x3a9   : > { %v3056_v10 = vpop.eup %3055  ;;  %v1594_v48 = vadd.f32 1.0, %v3054_v24  ;;  %3073 = vpow2.f32 %v1561_v41  ;;  %v1510_v41 = vsub.f32 0.0, %v4280_v44  ;;  %v4288_v62 = vadd.f32 %v4165_v32, %v1455_v63 }
 0x3aa   : > { %v3058_v59 = vpop.eup %3057  ;;  %v1592_v21 = vadd.f32 1.0, %v3056_v10  ;;  %3075 = vpow2.f32 %v1557_v61  ;;  %v1567_v61 = vmul.f32 1.442695, %v1509_v57  ;;  %v1679_v10 = vpack.c.bf16 %v1652_v40, %v1651_v56 }
 0x3ab   : > { %v3060_v35 = vpop.eup %3059  ;;  %3077 = vrcp.f32 %v1594_v48  ;;  %v1597_v36 = vadd.f32 1.0, %v3058_v59  ;;  %v1563_v45 = vmul.f32 1.442695, %v1507_v4  ;;  %v1680_v3 = vpack.c.bf16 %v1654_v15, %v1653_v20 }
 0x3ac   : > { %v3062_v22 = vpop.eup %3061  ;;  %3079 = vrcp.f32 %v1592_v21  ;;  %v1595_v24 = vadd.f32 1.0, %v3060_v35  ;;  %v2597_v48 = vpop.f32.mrb[60].mxu0  ;;  %v1569_v23 = vmul.f32 1.442695, %v1510_v41  ;;  %2623 = vmatprep.mubr.bf16.mxu1 %v1679_v10  ;;  %v1508_v21 = vsub.f32 0.0, %v4288_v62 }
 0x3ad   : > { %v3064_v19 = vpop.eup %3063  ;;  %3081 = vrcp.f32 %v1597_v36  ;;  %v1598_v7 = vadd.f32 1.0, %v3062_v22  ;;  %v4291_v58 = vadd.f32 %v2597_v48, %v4165_v32  ;;  %v1468_v14 = vpop.f32.mrb[61].mxu0 }
 0x3ae   : > { %3083 = vrcp.f32 %v1595_v24  ;;  %v1596_v16 = vadd.f32 1.0, %v3064_v19  ;;  %v4295_v40 = vadd.f32 %v4165_v32, %v1468_v14  ;;  %v2598_v57 = vpop.f32.mrb[62].mxu0  ;;  %v1565_v10 = vmul.f32 1.442695, %v1508_v21 }
 0x3af   : > { %v3066_v59 = vpop.eup %3065  ;;  %3085 = vrcp.f32 %v1598_v7  ;;  %2624 = vmatmul.mubr.bf16.gmra.mrb[40].mxu1 %v1680_v3  ;;  %v1513_v15 = vsub.f32 0.0, %v4291_v58  ;;  %v4299_v35 = vadd.f32 %v2598_v57, %v4165_v32  ;;  %v1471_v56 = vpop.f32.mrb[63].mxu0 }
 0x3b0   : > { %v3068_v63 = vpop.eup %3067  ;;  %3087 = vrcp.f32 %v1596_v16  ;;  %v1511_v16 = vsub.f32 0.0, %v4295_v40  ;;  %v4303_v22 = vadd.f32 %v4165_v32, %v1471_v56 }
 0x3b1   : > { %v3070_v4 = vpop.eup %3069  ;;  %3089 = vpow2.f32 %v1567_v61  ;;  %v1514_v19 = vsub.f32 0.0, %v4299_v35 }
 0x3b2   : > { %v3072_v36 = vpop.eup %3071  ;;  %v1601_v41 = vadd.f32 1.0, %v3070_v4  ;;  %3091 = vpow2.f32 %v1563_v45  ;;  %v1512_v3 = vsub.f32 0.0, %v4303_v22  ;;  %v1575_v45 = vmul.f32 1.442695, %v1513_v15 }
 0x3b3   : > { %v3074_v20 = vpop.eup %3073  ;;  %v1599_v24 = vadd.f32 1.0, %v3072_v36  ;;  %3093 = vpow2.f32 %v1569_v23  ;;  %v1657_v4 = vmul.f32 %v3066_v59, %v4216_v25  ;;  %v1571_v56 = vmul.f32 1.442695, %v1511_v16 }
 0x3b4   : > { %v3076_v7 = vpop.eup %3075  ;;  %3095 = vrcp.f32 %v1601_v41  ;;  %v1602_v61 = vadd.f32 1.0, %v3074_v20  ;;  %v1655_v36 = vmul.f32 %v3068_v63, %v4221_v2  ;;  %v1577_v21 = vmul.f32 1.442695, %v1514_v19 }
 0x3b5   : > { %v3078_v48 = vpop.eup %3077  ;;  %3097 = vrcp.f32 %v1599_v24  ;;  %v1600_v14 = vadd.f32 1.0, %v3076_v7  ;;  %v1573_v46 = vmul.f32 1.442695, %v1512_v3 }
 0x3b6   : > { %v3080_v57 = vpop.eup %3079  ;;  %v1658_v32 = vmul.f32 %v3078_v48, %v4227_v8  ;;  %3099 = vrcp.f32 %v1602_v61 }
 0x3b7   : > { %v3082_v23 = vpop.eup %3081  ;;  %v1656_v41 = vmul.f32 %v3080_v57, %v4231_v11  ;;  %3101 = vrcp.f32 %v1600_v14 }
 0x3b8   : > { %v3084_v20 = vpop.eup %3083  ;;  %3103 = vpow2.f32 %v1565_v10  ;;  %v1682_v24 = vpack.c.bf16 %v1658_v32, %v1657_v4  ;;  %v1661_v25 = vmul.f32 %v3082_v23, %v4236_v18 }
 0x3b9   : > { %v3086_v7 = vpop.eup %3085  ;;  %3105 = vpow2.f32 %v1575_v45  ;;  %v1681_v15 = vpack.c.bf16 %v1656_v41, %v1655_v36  ;;  %v1659_v2 = vmul.f32 %v3084_v20, %v4239_v5 }
 0x3ba   : > { %v3088_v42 = vpop.eup %3087  ;;  %v1662_v8 = vmul.f32 %v3086_v7, %v4243_v29  ;;  %3107 = vpow2.f32 %v1571_v56 }
 0x3bb   : > { %v3090_v59 = vpop.eup %3089  ;;  %v1660_v11 = vmul.f32 %v3088_v42, %v4247_v9  ;;  %3109 = vpow2.f32 %v1577_v21  ;;  %2627 = vmatprep.mubr.bf16.mxu1 %v1681_v15 }
 0x3bc   : > { %v3092_v63 = vpop.eup %3091  ;;  %v1605_v16 = vadd.f32 1.0, %v3090_v59  ;;  %3111 = vpow2.f32 %v1573_v46  ;;  %2628 = vmatmul.mubr.bf16.gmra.mrb[44].mxu1 %v1682_v24  ;;  %v1684_v19 = vpack.c.bf16 %v1662_v8, %v1661_v25 }
 0x3bd   : > { %v3094_v61 = vpop.eup %3093  ;;  %v1683_v10 = vpack.c.bf16 %v1660_v11, %v1659_v2  ;;  %v1603_v29 = vadd.f32 1.0, %v3092_v63 }
 0x3be   : > { %v3096_v3 = vpop.eup %3095  ;;  %3113 = vrcp.f32 %v1605_v16  ;;  %v1606_v18 = vadd.f32 1.0, %v3094_v61 }
 0x3bf   : > { %v3098_v48 = vpop.eup %3097  ;;  %2631 = vmatprep.mubr.bf16.mxu1 %v1683_v10  ;;  %v1665_v42 = vmul.f32 %v3096_v3, %v4252_v34 }
 0x3c0   : > { %v3100_v14 = vpop.eup %3099  ;;  %3115 = vrcp.f32 %v1606_v18  ;;  %v1663_v46 = vmul.f32 %v3098_v48, %v4257_v1 }
 0x3c1   : > { %v3102_v5 = vpop.eup %3101  ;;  %v1666_v9 = vmul.f32 %v3100_v14, %v4262_v43  ;;  %3117 = vrcp.f32 %v1603_v29 }
 0x3c2   : > { %v3104_v45 = vpop.eup %3103  ;;  %v1664_v57 = vmul.f32 %v3102_v5, %v4267_v30 }
 0x3c3   : > { %v3106_v4 = vpop.eup %3105  ;;  %v1604_v32 = vadd.f32 1.0, %v3104_v45  ;;  %v1686_v56 = vpack.c.bf16 %v1666_v9, %v1665_v42 }
 0x3c4   : > { %v3108_v23 = vpop.eup %3107  ;;  %v1609_v36 = vadd.f32 1.0, %v3106_v4  ;;  %2632 = vmatmul.mubr.bf16.gmra.mrb[48].mxu1 %v1684_v19  ;;  %v1685_v41 = vpack.c.bf16 %v1664_v57, %v1663_v46 }
 0x3c5   : > { %v3110_v21 = vpop.eup %3109  ;;  %3119 = vrcp.f32 %v1604_v32  ;;  %v1607_v20 = vadd.f32 1.0, %v3108_v23 }
 0x3c6   : > { %v3112_v24 = vpop.eup %3111  ;;  %3121 = vrcp.f32 %v1609_v36  ;;  %v1610_v34 = vadd.f32 1.0, %v3110_v21  ;;  %2635 = vmatprep.mubr.bf16.mxu1 %v1685_v41 }
 0x3c7   : > { %3123 = vrcp.f32 %v1607_v20  ;;  %v1608_v43 = vadd.f32 1.0, %v3112_v24 }
 0x3c8   : > { %v3114_v1 = vpop.eup %3113  ;;  %3125 = vrcp.f32 %v1610_v34 }
 0x3c9   : > { %3127 = vrcp.f32 %v1608_v43  ;;  %v1669_v7 = vmul.f32 %v3114_v1, %v4272_v17 }
 0x3ca   : > { %v3116_v30 = vpop.eup %3115 }
 0x3cb   : > { %v1670_v15 = vmul.f32 %v3116_v30, %v4280_v44  ;;  %v3118_v25 = vpop.eup %3117 }
 0x3cc   : > { %2636 = vmatmul.mubr.bf16.gmra.mrb[52].mxu1 %v1686_v56  ;;  %v1667_v11 = vmul.f32 %v3118_v25, %v4276_v53  ;;  %v4330_v53 = vld [vmem:[%s4627_s4 + $0x1] ss:$0 sm:$0xff] }
 0x3cd   : > { %v1688_v8 = vpack.c.bf16 %v1670_v15, %v1669_v7 }
 0x3cf   : > { %v3120_v59 = vpop.eup %3119 }
 0x3d0   : > { %v3122_v2 = vpop.eup %3121  ;;  %v1668_v63 = vmul.f32 %v3120_v59, %v4288_v62 }
 0x3d1   : > { %v3124_v16 = vpop.eup %3123  ;;  %v1673_v3 = vmul.f32 %v3122_v2, %v4291_v58 }
 0x3d2   : > { %v3126_v19 = vpop.eup %3125  ;;  %v1687_v61 = vpack.c.bf16 %v1668_v63, %v1667_v11  ;;  %v1671_v17 = vmul.f32 %v3124_v16, %v4295_v40 }
 0x3d3   : > { %v3128_v10 = vpop.eup %3127  ;;  %v1674_v18 = vmul.f32 %v3126_v19, %v4299_v35 }
 0x3d4   : > { %v1672_v44 = vmul.f32 %v3128_v10, %v4303_v22  ;;  %2639 = vmatprep.mubr.bf16.mxu1 %v1687_v61 }
 0x3d5   : > { %2640 = vmatmul.mubr.bf16.gmra.mrb[56].mxu1 %v1688_v8  ;;  %v1690_v48 = vpack.c.bf16 %v1674_v18, %v1673_v3 }
 0x3d6   : > { %v1689_v29 = vpack.c.bf16 %v1672_v44, %v1671_v17 }
 0x3d8   : > { %2643 = vmatprep.mubr.bf16.mxu1 %v1689_v29 }
 0x3dd   : > { %2644 = vmatmul.mubr.bf16.gmra.mrb[60].mxu1 %v1690_v48 }
 0x469   : > { %v2617_v62 = vpop.f32.mrb[32].mxu1 }
 0x46a   : > { %v4333_v58 = vadd.f32 %v2617_v62, %v4330_v53  ;;  %v1798_v35 = vpop.f32.mrb[33].mxu1 }
 0x46b   : > { %v4336_v40 = vadd.f32 %v4330_v53, %v1798_v35  ;;  %v2618_v22 = vpop.f32.mrb[34].mxu1 }
 0x46c   : > { %v1927_v14 = vsub.f32 0.0, %v4333_v58  ;;  %v4340_v5 = vadd.f32 %v2618_v22, %v4330_v53  ;;  %v1801_v42 = vpop.f32.mrb[35].mxu1 }
 0x46d   : > { %v1925_v9 = vsub.f32 0.0, %v4336_v40  ;;  %v4344_v45 = vadd.f32 %v4330_v53, %v1801_v42 }
 0x46e   : > { %v1961_v46 = vmul.f32 1.442695, %v1927_v14  ;;  %v1928_v57 = vsub.f32 0.0, %v4340_v5 }
 0x46f   : > { %v1957_v4 = vmul.f32 1.442695, %v1925_v9  ;;  %v1926_v32 = vsub.f32 0.0, %v4344_v45 }
 0x470   : > { %3129 = vpow2.f32 %v1961_v46  ;;  %v1963_v56 = vmul.f32 1.442695, %v1928_v57 }
 0x471   : > { %3131 = vpow2.f32 %v1957_v4  ;;  %v1959_v23 = vmul.f32 1.442695, %v1926_v32 }
 0x472   : > { %3133 = vpow2.f32 %v1963_v56 }
 0x473   : > { %3135 = vpow2.f32 %v1959_v23 }
 0x47a   : > { %v3130_v36 = vpop.eup %3129  ;;  %v2621_v41 = vpop.f32.mrb[36].mxu1 }
 0x47b   : > { %v3132_v21 = vpop.eup %3131  ;;  %v2023_v20 = vadd.f32 1.0, %v3130_v36  ;;  %v4349_v24 = vadd.f32 %v2621_v41, %v4330_v53  ;;  %v1814_v34 = vpop.f32.mrb[37].mxu1 }
 0x47c   : > { %v3134_v43 = vpop.eup %3133  ;;  %v2021_v1 = vadd.f32 1.0, %v3132_v21  ;;  %v4352_v30 = vadd.f32 %v4330_v53, %v1814_v34  ;;  %v2622_v7 = vpop.f32.mrb[38].mxu1 }
 0x47d   : > { %v3136_v15 = vpop.eup %3135  ;;  %3137 = vrcp.f32 %v2023_v20  ;;  %v2024_v25 = vadd.f32 1.0, %v3134_v43  ;;  %v1931_v8 = vsub.f32 0.0, %v4349_v24  ;;  %v4356_v59 = vadd.f32 %v2622_v7, %v4330_v53  ;;  %v1817_v2 = vpop.f32.mrb[39].mxu1 }
 0x47e   : > { %3139 = vrcp.f32 %v2021_v1  ;;  %v2022_v11 = vadd.f32 1.0, %v3136_v15  ;;  %v1929_v63 = vsub.f32 0.0, %v4352_v30  ;;  %v4360_v16 = vadd.f32 %v4330_v53, %v1817_v2 }
 0x47f   : > { %3141 = vrcp.f32 %v2024_v25  ;;  %v1969_v19 = vmul.f32 1.442695, %v1931_v8  ;;  %v1932_v61 = vsub.f32 0.0, %v4356_v59 }
 0x480   : > { %3143 = vrcp.f32 %v2022_v11  ;;  %v1965_v10 = vmul.f32 1.442695, %v1929_v63  ;;  %v1930_v3 = vsub.f32 0.0, %v4360_v16 }
 0x481   : > { %3145 = vpow2.f32 %v1969_v19  ;;  %v1971_v18 = vmul.f32 1.442695, %v1932_v61 }
 0x482   : > { %3147 = vpow2.f32 %v1965_v10  ;;  %v1967_v17 = vmul.f32 1.442695, %v1930_v3  ;;  %v2625_v44 = vpop.f32.mrb[40].mxu1 }
 0x483   : > { %3149 = vpow2.f32 %v1971_v18  ;;  %v4365_v48 = vadd.f32 %v2625_v44, %v4330_v53  ;;  %v1830_v29 = vpop.f32.mrb[41].mxu1 }
 0x484   : > { %3151 = vpow2.f32 %v1967_v17  ;;  %v4368_v62 = vadd.f32 %v4330_v53, %v1830_v29  ;;  %v2626_v35 = vpop.f32.mrb[42].mxu1 }
 0x485   : > { %v1935_v22 = vsub.f32 0.0, %v4365_v48  ;;  %v4372_v14 = vadd.f32 %v2626_v35, %v4330_v53  ;;  %v1833_v42 = vpop.f32.mrb[43].mxu1 }
 0x486   : > { %v1933_v46 = vsub.f32 0.0, %v4368_v62  ;;  %v4376_v57 = vadd.f32 %v4330_v53, %v1833_v42 }
 0x487   : > { %v3138_v9 = vpop.eup %3137  ;;  %v1977_v56 = vmul.f32 1.442695, %v1935_v22  ;;  %v1936_v23 = vsub.f32 0.0, %v4372_v14 }
 0x488   : > { %v3140_v4 = vpop.eup %3139  ;;  %v2087_v32 = vmul.f32 %v3138_v9, %v4333_v58  ;;  %v1973_v21 = vmul.f32 1.442695, %v1933_v46  ;;  %v1934_v20 = vsub.f32 0.0, %v4376_v57 }
 0x489   : > { %v3142_v36 = vpop.eup %3141  ;;  %v2085_v41 = vmul.f32 %v3140_v4, %v4336_v40  ;;  %3153 = vpow2.f32 %v1977_v56  ;;  %v1979_v7 = vmul.f32 1.442695, %v1936_v23 }
 0x48a   : > { %v3144_v34 = vpop.eup %3143  ;;  %v2119_v43 = vadd.f32 %v2087_v32, %v3942_v47  ;;  %v2088_v1 = vmul.f32 %v3142_v36, %v4340_v5  ;;  %3155 = vpow2.f32 %v1973_v21  ;;  %v1975_v8 = vmul.f32 1.442695, %v1934_v20 }
 0x48b   : > { %v3146_v15 = vpop.eup %3145  ;;  %v2117_v58 = vadd.f32 %v2085_v41, %v3959_v55  ;;  %v2086_v25 = vmul.f32 %v3144_v34, %v4344_v45  ;;  %3157 = vpow2.f32 %v1979_v7 }
 0x48c   : > { %v3148_v2 = vpop.eup %3147  ;;  %2151 = vst [vmem:[%s4388_s11 + $0x10] sm:$0xff] %v2119_v43  ;;  %v2120_v47 = vadd.f32 %v2088_v1, %v3949_v49  ;;  %v2027_v40 = vadd.f32 1.0, %v3146_v15  ;;  %3159 = vpow2.f32 %v1975_v8 }
 0x48d   : > { %v3150_v5 = vpop.eup %3149  ;;  %2149 = vst [vmem:[%s4388_s11] sm:$0xff] %v2117_v58  ;;  %v2118_v55 = vadd.f32 %v2086_v25, %v3955_v13  ;;  %v2025_v45 = vadd.f32 1.0, %v3148_v2 }
 0x48e   : > { %v3152_v11 = vpop.eup %3151  ;;  %2152 = vst [vmem:[%s4388_s11 + $0x18] sm:$0xff] %v2120_v47  ;;  %3161 = vrcp.f32 %v2027_v40  ;;  %v2028_v63 = vadd.f32 1.0, %v3150_v5 }
 0x48f   : > { %2150 = vst [vmem:[%s4388_s11 + $0x8] sm:$0xff] %v2118_v55  ;;  %3163 = vrcp.f32 %v2025_v45  ;;  %v2026_v19 = vadd.f32 1.0, %v3152_v11  ;;  %v2629_v61 = vpop.f32.mrb[44].mxu1 }
 0x490   : > { %3165 = vrcp.f32 %v2028_v63  ;;  %v4397_v10 = vadd.f32 %v2629_v61, %v4330_v53  ;;  %v1846_v49 = vpop.f32.mrb[45].mxu1 }
 0x491   : > { %3167 = vrcp.f32 %v2026_v19  ;;  %v4400_v3 = vadd.f32 %v4330_v53, %v1846_v49  ;;  %v2630_v13 = vpop.f32.mrb[46].mxu1 }
 0x492   : > { %v1939_v18 = vsub.f32 0.0, %v4397_v10  ;;  %v4404_v17 = vadd.f32 %v2630_v13, %v4330_v53  ;;  %v1849_v44 = vpop.f32.mrb[47].mxu1 }
 0x493   : > { %v1937_v29 = vsub.f32 0.0, %v4400_v3  ;;  %v4408_v35 = vadd.f32 %v4330_v53, %v1849_v44  ;;  %v3154_v22 = vpop.eup %3153 }
 0x494   : > { %v1985_v42 = vmul.f32 1.442695, %v1939_v18  ;;  %v1940_v9 = vsub.f32 0.0, %v4404_v17  ;;  %v3156_v46 = vpop.eup %3155  ;;  %v2031_v4 = vadd.f32 1.0, %v3154_v22 }
 0x495   : > { %v1938_v32 = vsub.f32 0.0, %v4408_v35  ;;  %v3158_v56 = vpop.eup %3157  ;;  %v2029_v23 = vadd.f32 1.0, %v3156_v46  ;;  %v1981_v21 = vmul.f32 1.442695, %v1937_v29 }
 0x496   : > { %3169 = vpow2.f32 %v1985_v42  ;;  %v3160_v36 = vpop.eup %3159  ;;  %v2032_v41 = vadd.f32 1.0, %v3158_v56  ;;  %v1987_v1 = vmul.f32 1.442695, %v1940_v9 }
 0x497   : > { %3171 = vrcp.f32 %v2031_v4  ;;  %v2633_v20 = vpop.f32.mrb[48].mxu1  ;;  %v2030_v43 = vadd.f32 1.0, %v3160_v36  ;;  %v1983_v8 = vmul.f32 1.442695, %v1938_v32 }
 0x498   : > { %v3162_v34 = vpop.eup %3161  ;;  %3173 = vrcp.f32 %v2029_v23  ;;  %v4413_v7 = vadd.f32 %v2633_v20, %v4330_v53  ;;  %v1862_v15 = vpop.f32.mrb[49].mxu1 }
 0x499   : > { %v3164_v58 = vpop.eup %3163  ;;  %v2091_v25 = vmul.f32 %v3162_v34, %v4349_v24  ;;  %3175 = vrcp.f32 %v2032_v41  ;;  %v4417_v2 = vadd.f32 %v4330_v53, %v1862_v15  ;;  %v2634_v47 = vpop.f32.mrb[50].mxu1 }
 0x49a   : > { %v3166_v40 = vpop.eup %3165  ;;  %v2089_v5 = vmul.f32 %v3164_v58, %v4352_v30  ;;  %3177 = vrcp.f32 %v2030_v43  ;;  %v1943_v55 = vsub.f32 0.0, %v4413_v7  ;;  %v4422_v45 = vadd.f32 %v2634_v47, %v4330_v53  ;;  %v1865_v11 = vpop.f32.mrb[51].mxu1 }
 0x49b   : > { %v3168_v63 = vpop.eup %3167  ;;  %v2123_v24 = vadd.f32 %v2091_v25, %v3999_v60  ;;  %v2092_v19 = vmul.f32 %v3166_v40, %v4356_v59  ;;  %3179 = vpow2.f32 %v1981_v21  ;;  %v1941_v61 = vsub.f32 0.0, %v4417_v2 }
 0x49c   : > { %v2121_v49 = vadd.f32 %v2089_v5, %v3982_v39  ;;  %v2090_v30 = vmul.f32 %v3168_v63, %v4360_v16  ;;  %3181 = vpow2.f32 %v1987_v1  ;;  %v1993_v13 = vmul.f32 1.442695, %v1943_v55 }
 0x49d   : > { %2155 = vst [vmem:[%s4388_s11 + $0x30] sm:$0xff] %v2123_v24  ;;  %v2124_v18 = vadd.f32 %v2092_v19, %v4007_v52  ;;  %3183 = vpow2.f32 %v1983_v8  ;;  %v1989_v44 = vmul.f32 1.442695, %v1941_v61  ;;  %v1944_v60 = vsub.f32 0.0, %v4422_v45 }
 0x49e   : > { %2153 = vst [vmem:[%s4388_s11 + $0x20] sm:$0xff] %v2121_v49  ;;  %v2122_v59 = vadd.f32 %v2090_v30, %v3988_v27  ;;  %3185 = vpow2.f32 %v1993_v13  ;;  %v4435_v29 = vadd.f32 %v4330_v53, %v1865_v11 }
 0x49f   : > { %2156 = vst [vmem:[%s4388_s11 + $0x38] sm:$0xff] %v2124_v18  ;;  %3187 = vpow2.f32 %v1989_v44  ;;  %v1995_v39 = vmul.f32 1.442695, %v1944_v60  ;;  %v2637_v16 = vpop.f32.mrb[52].mxu1 }
 0x4a0   : > { %v3170_v22 = vpop.eup %3169  ;;  %2154 = vst [vmem:[%s4388_s11 + $0x28] sm:$0xff] %v2122_v59  ;;  %v1942_v42 = vsub.f32 0.0, %v4435_v29  ;;  %v4441_v52 = vadd.f32 %v2637_v16, %v4330_v53  ;;  %v1878_v9 = vpop.f32.mrb[53].mxu1 }
 0x4a1   : > { %v3172_v46 = vpop.eup %3171  ;;  %v2035_v4 = vadd.f32 1.0, %v3170_v22  ;;  %3189 = vpow2.f32 %v1995_v39  ;;  %v4444_v27 = vadd.f32 %v4330_v53, %v1878_v9  ;;  %v2638_v32 = vpop.f32.mrb[54].mxu1 }
 0x4a2   : > { %v3174_v56 = vpop.eup %3173  ;;  %v2095_v23 = vmul.f32 %v3172_v46, %v4365_v48  ;;  %v1991_v36 = vmul.f32 1.442695, %v1942_v42  ;;  %v1947_v41 = vsub.f32 0.0, %v4441_v52  ;;  %v4449_v21 = vadd.f32 %v2638_v32, %v4330_v53  ;;  %v1881_v20 = vpop.f32.mrb[55].mxu1 }
 0x4a3   : > { %v3176_v34 = vpop.eup %3175  ;;  %v2093_v43 = vmul.f32 %v3174_v56, %v4368_v62  ;;  %3191 = vrcp.f32 %v2035_v4  ;;  %v1945_v1 = vsub.f32 0.0, %v4444_v27  ;;  %v4454_v15 = vadd.f32 %v4330_v53, %v1881_v20 }
 0x4a4   : > { %v3178_v58 = vpop.eup %3177  ;;  %v2127_v48 = vadd.f32 %v2095_v23, %v4038_v50  ;;  %v2096_v25 = vmul.f32 %v3176_v34, %v4372_v14  ;;  %3193 = vpow2.f32 %v1991_v36  ;;  %v2001_v8 = vmul.f32 1.442695, %v1947_v41 }
 0x4a5   : > { %v3180_v47 = vpop.eup %3179  ;;  %v2125_v40 = vadd.f32 %v2093_v43, %v4013_v38  ;;  %v2094_v62 = vmul.f32 %v3178_v58, %v4376_v57  ;;  %v1997_v5 = vmul.f32 1.442695, %v1945_v1  ;;  %v1948_v55 = vsub.f32 0.0, %v4449_v21 }
 0x4a6   : > { %v3182_v11 = vpop.eup %3181  ;;  %2159 = vst [vmem:[%s4388_s11 + $0x50] sm:$0xff] %v2127_v48  ;;  %v2128_v63 = vadd.f32 %v2096_v25, %v4046_v12  ;;  %v2033_v24 = vadd.f32 1.0, %v3180_v47  ;;  %3195 = vpow2.f32 %v2001_v8  ;;  %v1946_v38 = vsub.f32 0.0, %v4454_v15 }
 0x4a7   : > { %v3184_v50 = vpop.eup %3183  ;;  %2157 = vst [vmem:[%s4388_s11 + $0x40] sm:$0xff] %v2125_v40  ;;  %v2126_v14 = vadd.f32 %v2094_v62, %v4019_v33  ;;  %v2036_v19 = vadd.f32 1.0, %v3182_v11  ;;  %3197 = vpow2.f32 %v1997_v5  ;;  %v2003_v12 = vmul.f32 1.442695, %v1948_v55 }
 0x4a8   : > { %v3186_v61 = vpop.eup %3185  ;;  %2160 = vst [vmem:[%s4388_s11 + $0x58] sm:$0xff] %v2128_v63  ;;  %3199 = vrcp.f32 %v2033_v24  ;;  %v2034_v57 = vadd.f32 1.0, %v3184_v50  ;;  %v2641_v49 = vpop.f32.mrb[56].mxu1  ;;  %v1999_v16 = vmul.f32 1.442695, %v1946_v38 }
 0x4a9   : > { %v3188_v30 = vpop.eup %3187  ;;  %2158 = vst [vmem:[%s4388_s11 + $0x48] sm:$0xff] %v2126_v14  ;;  %3201 = vrcp.f32 %v2036_v19  ;;  %v2039_v13 = vadd.f32 1.0, %v3186_v61  ;;  %v4469_v18 = vadd.f32 %v2641_v49, %v4330_v53  ;;  %v1894_v44 = vpop.f32.mrb[57].mxu1 }
 0x4aa   : > { %3203 = vrcp.f32 %v2034_v57  ;;  %v2037_v33 = vadd.f32 1.0, %v3188_v30  ;;  %v4472_v60 = vadd.f32 %v4330_v53, %v1894_v44  ;;  %v2642_v59 = vpop.f32.mrb[58].mxu1 }
 0x4ab   : > { %v3190_v39 = vpop.eup %3189  ;;  %3205 = vrcp.f32 %v2039_v13  ;;  %v1951_v22 = vsub.f32 0.0, %v4469_v18  ;;  %v4476_v42 = vadd.f32 %v2642_v59, %v4330_v53  ;;  %v1897_v9 = vpop.f32.mrb[59].mxu1 }
 0x4ac   : > { %3207 = vrcp.f32 %v2037_v33  ;;  %v2040_v46 = vadd.f32 1.0, %v3190_v39  ;;  %v1949_v4 = vsub.f32 0.0, %v4472_v60  ;;  %v4480_v32 = vadd.f32 %v4330_v53, %v1897_v9 }
 0x4ad   : > { %v3192_v56 = vpop.eup %3191  ;;  %3209 = vpow2.f32 %v2003_v12  ;;  %v2009_v23 = vmul.f32 1.442695, %v1951_v22  ;;  %v1952_v36 = vsub.f32 0.0, %v4476_v42 }
 0x4ae   : > { %v3194_v41 = vpop.eup %3193  ;;  %v2099_v20 = vmul.f32 %v3192_v56, %v4397_v10  ;;  %3211 = vrcp.f32 %v2040_v46  ;;  %v2005_v34 = vmul.f32 1.442695, %v1949_v4  ;;  %v1950_v43 = vsub.f32 0.0, %v4480_v32 }
 0x4af   : > { %v2038_v1 = vadd.f32 1.0, %v3194_v41  ;;  %3213 = vpow2.f32 %v1999_v16  ;;  %v2011_v40 = vmul.f32 1.442695, %v1952_v36 }
 0x4b0   : > { %v3196_v58 = vpop.eup %3195  ;;  %v2131_v48 = vadd.f32 %v2099_v20, %v4079_v6  ;;  %3215 = vpow2.f32 %v2009_v23  ;;  %v2645_v25 = vpop.f32.mrb[60].mxu1  ;;  %v2007_v11 = vmul.f32 1.442695, %v1950_v43 }
 0x4b1   : > { %v3198_v8 = vpop.eup %3197  ;;  %3217 = vrcp.f32 %v2038_v1  ;;  %v2043_v47 = vadd.f32 1.0, %v3196_v58  ;;  %v4487_v62 = vadd.f32 %v2645_v25, %v4330_v53  ;;  %v1910_v10 = vpop.f32.mrb[61].mxu1 }
 0x4b2   : > { %v3200_v5 = vpop.eup %3199  ;;  %2163 = vst [vmem:[%s4388_s11 + $0x70] sm:$0xff] %v2131_v48  ;;  %v2041_v55 = vadd.f32 1.0, %v3198_v8  ;;  %3219 = vpow2.f32 %v2005_v34  ;;  %v4491_v63 = vadd.f32 %v4330_v53, %v1910_v10  ;;  %v2646_v24 = vpop.f32.mrb[62].mxu1 }
 0x4b3   : > { %v3202_v6 = vpop.eup %3201  ;;  %v2097_v50 = vmul.f32 %v3200_v5, %v4400_v3  ;;  %3221 = vrcp.f32 %v2043_v47  ;;  %v1955_v14 = vsub.f32 0.0, %v4487_v62  ;;  %v4496_v19 = vadd.f32 %v2646_v24, %v4330_v53  ;;  %v1913_v38 = vpop.f32.mrb[63].mxu1  ;;  %v4669_v5 = vld [vmem:[#allocation13_spill] sm:$0xff] }
 0x4b4   : > { %v3204_v61 = vpop.eup %3203  ;;  %v2100_v57 = vmul.f32 %v3202_v6, %v4404_v17  ;;  %3223 = vrcp.f32 %v2041_v55  ;;  %v1953_v49 = vsub.f32 0.0, %v4491_v63  ;;  %v4501_v30 = vadd.f32 %v4330_v53, %v1913_v38 }
 0x4b5   : > { %v3206_v13 = vpop.eup %3205  ;;  %v2129_v3 = vadd.f32 %v2097_v50, %v4053_v51  ;;  %v2098_v12 = vmul.f32 %v3204_v61, %v4408_v35  ;;  %3225 = vpow2.f32 %v2011_v40  ;;  %v2017_v44 = vmul.f32 1.442695, %v1955_v14 }
 0x4b6   : > { %v3208_v33 = vpop.eup %3207  ;;  %v2132_v59 = vadd.f32 %v2100_v57, %v4073_v0  ;;  %v2103_v39 = vmul.f32 %v3206_v13, %v4413_v7  ;;  %3227 = vpow2.f32 %v2007_v11  ;;  %v2013_v17 = vmul.f32 1.442695, %v1953_v49  ;;  %v4670_v57 = vld [vmem:[#allocation15_spill] sm:$0xff] }
 0x4b7   : > { %v3210_v16 = vpop.eup %3209  ;;  %2161 = vst [vmem:[%s4388_s11 + $0x60] sm:$0xff] %v2129_v3  ;;  %v2130_v53 = vadd.f32 %v2098_v12, %v4059_v37  ;;  %v2101_v51 = vmul.f32 %v3208_v33, %v4417_v2  ;;  %3229 = vpow2.f32 %v2017_v44  ;;  %v1956_v35 = vsub.f32 0.0, %v4496_v19  ;;  %v4671_v33 = vld [vmem:[#allocation14_spill] sm:$0xff] }
 0x4b8   : > { %v3212_v22 = vpop.eup %3211  ;;  %2164 = vst [vmem:[%s4388_s11 + $0x78] sm:$0xff] %v2132_v59  ;;  %v2135_v0 = vadd.f32 %v2103_v39, %v4099_v54  ;;  %v2044_v9 = vadd.f32 1.0, %v3210_v16  ;;  %3231 = vpow2.f32 %v2013_v17  ;;  %v1954_v7 = vsub.f32 0.0, %v4501_v30  ;;  %v4672_v39 = vld [vmem:[#allocation20_spill] sm:$0xff] }
 0x4b9   : > { %v3214_v46 = vpop.eup %3213  ;;  %2162 = vst [vmem:[%s4388_s11 + $0x68] sm:$0xff] %v2130_v53  ;;  %v2133_v4 = vadd.f32 %v2101_v51, %v4086_v28  ;;  %v2104_v37 = vmul.f32 %v3212_v22, %v4422_v45  ;;  %v2019_v2 = vmul.f32 1.442695, %v1956_v35 }
 0x4ba   : > { %v3216_v56 = vpop.eup %3215  ;;  %2167 = vst [vmem:[%s4388_s11 + $0x90] sm:$0xff] %v2135_v0  ;;  %3233 = vrcp.f32 %v2044_v9  ;;  %v2042_v23 = vadd.f32 1.0, %v3214_v46  ;;  %v2015_v36 = vmul.f32 1.442695, %v1954_v7  ;;  %v4674_v7 = vld [vmem:[#allocation19_spill] sm:$0xff] }
 0x4bb   : > { %v3218_v41 = vpop.eup %3217  ;;  %2165 = vst [vmem:[%s4388_s11 + $0x80] sm:$0xff] %v2133_v4  ;;  %v2136_v54 = vadd.f32 %v2104_v37, %v4095_v31  ;;  %v2047_v20 = vadd.f32 1.0, %v3216_v56  ;;  %3235 = vpow2.f32 %v2019_v2  ;;  %v4675_v4 = vld [vmem:[#allocation18_spill] sm:$0xff]  ;;  %v4676_v56 = vld [vmem:[#allocation24_spill] sm:$0xff] }
 0x4bc   : > { %v3220_v34 = vpop.eup %3219  ;;  %v2102_v43 = vmul.f32 %v3218_v41, %v4435_v29  ;;  %3237 = vrcp.f32 %v2042_v23  ;;  %v4668_v29 = vld [vmem:[#allocation16_spill] sm:$0xff] }
 0x4bd   : > { %v3222_v28 = vpop.eup %3221  ;;  %2168 = vst [vmem:[%s4388_s11 + $0x98] sm:$0xff] %v2136_v54  ;;  %3239 = vrcp.f32 %v2047_v20  ;;  %v2045_v45 = vadd.f32 1.0, %v3220_v34  ;;  %v4678_v20 = vld [vmem:[#allocation23_spill] sm:$0xff] }
 0x4be   : > { %v3224_v1 = vpop.eup %3223  ;;  %v2134_v58 = vadd.f32 %v2102_v43, %v4089_v26  ;;  %v2107_v48 = vmul.f32 %v3222_v28, %v4441_v52  ;;  %3241 = vpow2.f32 %v2015_v36  ;;  %v4677_v36 = vld [vmem:[#allocation21_spill] sm:$0xff]  ;;  %v4679_v43 = vld [vmem:[#allocation22_spill] sm:$0xff] }
 0x4bf   : > { %v3226_v31 = vpop.eup %3225  ;;  %v2105_v25 = vmul.f32 %v3224_v1, %v4444_v27  ;;  %3243 = vrcp.f32 %v2045_v45 }
 0x4c0   : > { %v3228_v8 = vpop.eup %3227  ;;  %2166 = vst [vmem:[%s4388_s11 + $0x88] sm:$0xff] %v2134_v58  ;;  %v2139_v47 = vadd.f32 %v2107_v48, %v4668_v29  ;;  %v2048_v40 = vadd.f32 1.0, %v3226_v31 }
 0x4c1   : > { %v3230_v10 = vpop.eup %3229  ;;  %v2137_v55 = vadd.f32 %v2105_v25, %v4669_v5  ;;  %v2046_v11 = vadd.f32 1.0, %v3228_v8 }
 0x4c2   : > { %v3232_v24 = vpop.eup %3231  ;;  %2171 = vst [vmem:[%s4388_s11 + $0xb0] sm:$0xff] %v2139_v47  ;;  %3245 = vrcp.f32 %v2048_v40  ;;  %v2051_v26 = vadd.f32 1.0, %v3230_v10 }
 0x4c3   : > { %2169 = vst [vmem:[%s4388_s11 + $0xa0] sm:$0xff] %v2137_v55  ;;  %3247 = vrcp.f32 %v2046_v11  ;;  %v2049_v52 = vadd.f32 1.0, %v3232_v24 }
 0x4c4   : > { %v3234_v6 = vpop.eup %3233  ;;  %3249 = vrcp.f32 %v2051_v26 }
 0x4c5   : > { %v3236_v27 = vpop.eup %3235  ;;  %v2108_v50 = vmul.f32 %v3234_v6, %v4449_v21  ;;  %3251 = vrcp.f32 %v2049_v52 }
 0x4c6   : > { %v3238_v14 = vpop.eup %3237  ;;  %v2052_v38 = vadd.f32 1.0, %v3236_v27 }
 0x4c7   : > { %v3240_v61 = vpop.eup %3239  ;;  %v2140_v49 = vadd.f32 %v2108_v50, %v4670_v57  ;;  %v2106_v13 = vmul.f32 %v3238_v14, %v4454_v15  ;;  %v4673_v15 = vld [vmem:[#allocation17_spill] sm:$0xff] }
 0x4c8   : > { %v3242_v3 = vpop.eup %3241  ;;  %v2111_v12 = vmul.f32 %v3240_v61, %v4469_v18  ;;  %3253 = vrcp.f32 %v2052_v38 }
 0x4c9   : > { %v3244_v44 = vpop.eup %3243  ;;  %2172 = vst [vmem:[%s4388_s11 + $0xb8] sm:$0xff] %v2140_v49  ;;  %v2138_v59 = vadd.f32 %v2106_v13, %v4671_v33  ;;  %v2050_v21 = vadd.f32 1.0, %v3242_v3 }
 0x4ca   : > { %v2143_v17 = vadd.f32 %v2111_v12, %v4672_v39  ;;  %v2109_v16 = vmul.f32 %v3244_v44, %v4472_v60 }
 0x4cb   : > { %2170 = vst [vmem:[%s4388_s11 + $0xa8] sm:$0xff] %v2138_v59  ;;  %3255 = vrcp.f32 %v2050_v21 }
 0x4cc   : > { %v3246_v53 = vpop.eup %3245  ;;  %2175 = vst [vmem:[%s4388_s11 + $0xd0] sm:$0xff] %v2143_v17  ;;  %v2141_v51 = vadd.f32 %v2109_v16, %v4673_v15 }
 0x4cd   : > { %v3248_v18 = vpop.eup %3247  ;;  %v2112_v35 = vmul.f32 %v3246_v53, %v4476_v42 }
 0x4ce   : > { %v3250_v22 = vpop.eup %3249  ;;  %2173 = vst [vmem:[%s4388_s11 + $0xc0] sm:$0xff] %v2141_v51  ;;  %v2110_v0 = vmul.f32 %v3248_v18, %v4480_v32 }
 0x4cf   : > { %v3252_v9 = vpop.eup %3251  ;;  %v2144_v60 = vadd.f32 %v2112_v35, %v4674_v7  ;;  %v2115_v46 = vmul.f32 %v3250_v22, %v4487_v62 }
 0x4d0   : > { %v2142_v37 = vadd.f32 %v2110_v0, %v4675_v4  ;;  %v2113_v2 = vmul.f32 %v3252_v9, %v4491_v63 }
 0x4d1   : > { %2176 = vst [vmem:[%s4388_s11 + $0xd8] sm:$0xff] %v2144_v60  ;;  %v2147_v42 = vadd.f32 %v2115_v46, %v4676_v56 }
 0x4d2   : > { %v3254_v23 = vpop.eup %3253  ;;  %2174 = vst [vmem:[%s4388_s11 + $0xc8] sm:$0xff] %v2142_v37  ;;  %v2145_v41 = vadd.f32 %v2113_v2, %v4677_v36 }
 0x4d3   : > { %2179 = vst [vmem:[%s4388_s11 + $0xf0] sm:$0xff] %v2147_v42  ;;  %v2116_v32 = vmul.f32 %v3254_v23, %v4496_v19 }
 0x4d4   : > { %2177 = vst [vmem:[%s4388_s11 + $0xe0] sm:$0xff] %v2145_v41  ;;  %2188 = sbr.rel (!%p4680_p9) target bundleno = 1271 (0x4f7), region = 56 }
 0x4d5   : > { %v3256_v54 = vpop.eup %3255  ;;  %v2148_v62 = vadd.f32 %v2116_v32, %v4678_v20 }
 0x4d6   : > { %v2114_v34 = vmul.f32 %v3256_v54, %v4501_v30 }
 0x4d7   : > { %2180 = vst [vmem:[%s4388_s11 + $0xf8] sm:$0xff] %v2148_v62 }
 0x4d8   : > { %v2146_v28 = vadd.f32 %v2114_v34, %v4679_v43 }
 0x4da   : > { %2178 = vst [vmem:[%s4388_s11 + $0xe8] sm:$0xff] %v2146_v28 }
 0x4db   : > { %s4690_s25 = smov (!%p2191_p10, %s2190_s25), 32 }
 0x4dc   : > { %s4564_s27 = sshll.u32 %s4690_s25, 7 }
 0x4dd   : > { %s2195_s14 = ssub.s32 4096, %s4564_s27 }
 0x4de   : > { %2196 = vsyncadd %s2182_s28, %s2195_s14  ;;  %p2351_p1 = scmp.ne.s32.totalorder %s4564_s27, 0  ;;  %s2358_s30 = sshll.u32 %s3506_s22, 12 }
 0x4df   : > { %s4574_s29 = scalar_lea.hbm %s4628_s5, %s2358_s30  ;;  %s2201_s7 = sshll.u32 %s4388_s11, 4  ;;  %s4577_s7 = int_to_ptr.vmem [resolvable:$true] %s2201_s7 }
 0x4e0   : > { %s3373_s10 = scalar_lea.vmem %s4577_s7, %s4564_s27  ;;  %s3452_s8 = smov [#allocation8]  }
 0x4e1   : > { %p3374_p3 = scmp.ne.s32.totalorder %s4577_s7, %s3373_s10  ;;  %s3377_s26 = sshll.u32 %s3452_s8, 4  ;;  %s3378_s26 = int_to_ptr.vmem [resolvable:$false] %s3377_s26 }
 0x4e2   : > { %s3379_s22 = scalar_lea.vmem %s3378_s26, 8192  ;;  %p3380_p11 = scmp.lt.s32.totalorder %s4577_s7, %s3378_s26 }
 0x4e3   : > { %p3375_p5 = pnand %p3374_p3, %p2351_p1  ;;  %p3381_p13 = scmp.lt.s32.totalorder %s3379_s22, %s3373_s10 }
 0x4e5   : > { %p3376_p6 = pneg %p3375_p5  ;;  %p3382_p0 = por %p3381_p13, %p3380_p11 }
 0x4e7   : > { %p3383_p12 = pnand %p3382_p0, %p3376_p6 }
 0x4e9   : > { %3386 = shalt.err (!%p3383_p12)
}
 0x4ea   : > { %s3387_s9 = scalar_lea.hbm %s4574_s29, %s4564_s27  ;;  %s3391_s11 = scalar_lea.hbm %s4628_s5, 8064 }
 0x4eb   : > { %p3388_p7 = scmp.ne.s32.totalorder %s4574_s29, %s3387_s9  ;;  %p3392_p9 = scmp.lt.u32.totalorder %s4574_s29, %s4628_s5 }
 0x4ec   : > { %p3393_p10 = scmp.lt.u32.totalorder %s3391_s11, %s3387_s9  ;;  %p3395_p5 = scmp.lt.u32.totalorder %s3387_s9, %s4574_s29 }
 0x4ed   : > { %p3389_p2 = pnand %p3388_p7, %p2351_p1 }
 0x4ee   : > { %p3394_p3 = por %p3393_p10, %p3392_p9 }
 0x4ef   : > { %p3390_p8 = pneg %p3389_p2 }
 0x4f0   : > { %p3396_p6 = por %p3395_p5, %p3394_p3 }
 0x4f2   : > { %p3397_p11 = pnand %p3396_p6, %p3390_p8 }
 0x4f4   : > { %3400 = shalt.err (!%p3397_p11)
}
 0x4f5   : > { %s3453_s14 = smov 128   ;;  %s3454_s30 = smov 8  }
 0x4f6   : > { %2207 = dma.vmem_to_hbm [thread:$0]  (%p2351_p1), %s4577_s7, %s4564_s27, %s4574_s29, %s2182_s28, %s3453_s14, %s3453_s14, %s3454_s30  }
 0x4f7 PF: > { %s2216_s15 = sand.u32 1, %s3431_s18   ;;  %p4681_p13 = scmp.ne.s32.totalorder %s4648_s6, 0 }
 0x4f8   : > { %s2217_s16 = scalar_lea.sflag [#allocation4], %s2216_s15 }
 0x4f9   : > { %p2665_p0 = pnand %p2297_p4, %p4681_p13 }
 0x4fb   : > { %3426 = dma.done.wait (!%p2665_p0), %s2217_s16, 4096  }
 0x4fc   : > { %3428 = vsyncadd (!%p2665_p0), %s2217_s16, 4294963200  ;;  %s4682_s10 = sld [smem:[#allocation12_spill]]  ;;  %p19_p12 = scmp.ge.s32.totalorder %s3510_s24, 4  }
 0x4fd   : > { %s4683_s18 = smov %s3435_s19  ;;  %s4684_s19 = smov %s3439_s20 }
 0x4fe   : > { %s4686_s21 = smov %s3510_s24  ;;  %21 = sbr.rel (!%p19_p12) target bundleno = 6 (0x6), region = 97 }
 0x502   : > { %s4685_s20 = smov %s4682_s10 }
 0x505   :  { %2222 = vsyncpa [#allocation3], 1 }
 0x506   :  { %2224 = vsyncpa [#allocation3 + $0x1], 1 }
 0x507   :  { %2225 = vsyncpa [#allocation6], 1 }
 0x508   :  { %2226 = vsyncpa [#allocation4], 1 }
 0x509   :  { %2228 = vsyncpa [#allocation4 + $0x1], 1 }

</bundles_post_ra>
